<compile_context>
chip_gen: v7x
topology: tpu7x:2x2x1
jax: 0.10.0
libtpu: 0.0.40
codegen_flags: <defaults>
</compile_context>

<pallas_src>
import math

import jax
import jax.numpy as jnp
from jax.experimental import pallas as pl
from jax.experimental.pallas import tpu as pltpu

D_MODEL = 32
N_HEADS = 4
D_HEAD = D_MODEL // N_HEADS
D_FF = 64
N_LAYERS = 2
VOCAB = 16
V_PAD = 128            # lane-dense generator output width
LN_EPS = 1e-6
NEG_INF = -1e9

SLAB_LANES = 128       # lane width of both parameter slabs
VMEM = pltpu.MemorySpace.VMEM


# ----------------------- parameter slab layout (static) -----------------------

def _build_layouts():
    w_specs, b_specs = [], []

    def add_ln(p):
        b_specs.extend([(p + '_a', D_MODEL), (p + '_b', D_MODEL)])

    def add_attn(p):
        w_specs.extend([(p + '_wqkv', D_MODEL, 3 * D_MODEL),
                        (p + '_wo', D_MODEL, D_MODEL)])
        b_specs.extend([(p + '_bqkv', 3 * D_MODEL), (p + '_bo', D_MODEL)])

    def add_ffn(p):
        w_specs.extend([(p + '_w1', D_MODEL, D_FF), (p + '_w2', D_FF, D_MODEL)])
        b_specs.extend([(p + '_b1', D_FF), (p + '_b2', D_MODEL)])

    for l in range(N_LAYERS):
        add_ln(f'enc{l}_ln1'); add_attn(f'enc{l}_attn')
        add_ln(f'enc{l}_ln2'); add_ffn(f'enc{l}_ff')
    for l in range(N_LAYERS):
        add_ln(f'dec{l}_ln1'); add_attn(f'dec{l}_sa')
        add_ln(f'dec{l}_ln2'); add_attn(f'dec{l}_ca')
        add_ln(f'dec{l}_ln3'); add_ffn(f'dec{l}_ff')
    add_ln('enc_norm'); add_ln('dec_norm')
    w_specs.append(('gen_wg', D_MODEL, V_PAD))
    b_specs.append(('gen_bg', V_PAD))

    w_layout, off = {}, 0
    for name, rows, cols in w_specs:       # rows are 32/64 -> offsets stay
        w_layout[name] = (off, rows, cols)  # 16-row (bf16 tile) aligned
        off += rows
    w_rows = off                            # 800
    b_layout, off = {}, 0
    for name, cols in b_specs:              # one bias row per 8-row f32 tile
        b_layout[name] = (off, cols)
        off += 8
    b_rows = off                            # 360
    return w_layout, w_rows, b_layout, b_rows


W_LAYOUT, W_ROWS, B_LAYOUT, B_ROWS = _build_layouts()


# ------------------------- in-kernel building blocks -------------------------

def _layer_norm(x2, a, b):
    # Annotated-Transformer LayerNorm: a * (x - mean) / (std + eps) + b,
    # torch-style unbiased std.  f32 math.  x2: [N, D], a/b: [1, D].
    mean = jnp.mean(x2, axis=-1, keepdims=True)
    diff = x2 - mean
    var = jnp.sum(diff * diff, axis=-1, keepdims=True) / (x2.shape[-1] - 1)
    return a * diff / (jnp.sqrt(var) + LN_EPS) + b


def _attention(xq2, xkv2, bias, wqkv, bqkv, wo, bo, bsz, sq, sk, *, self_attn):
    # MultiHeadedAttention with fused QKV projection + fused QKV bias.
    #   xq2 : [bsz*sq, D] f32     xkv2 : [bsz*sk, D] f32
    #   bias: [bsz, sq|1, sk] f32 additive mask bias (broadcast over heads)
    #   wqkv: [D, 3D] bf16 (columns = q|k|v, head-major within each block)
    qkv_q = jnp.dot(xq2.astype(jnp.bfloat16), wqkv,
                    preferred_element_type=jnp.float32) + bqkv
    if self_attn:
        qkv_kv = qkv_q                      # query tensor IS the key/value tensor
    else:
        qkv_kv = jnp.dot(xkv2.astype(jnp.bfloat16), wqkv,
                         preferred_element_type=jnp.float32) + bqkv

    q3 = qkv_q.reshape(bsz, sq, 3 * D_MODEL)
    kv3 = q3 if self_attn else qkv_kv.reshape(bsz, sk, 3 * D_MODEL)

    def heads(t3, col0):
        # heads stacked along the leading (batch) axis -> single 3-D einsum core.
        return jnp.concatenate(
            [t3[:, :, col0 + h * D_HEAD: col0 + (h + 1) * D_HEAD]
             for h in range(N_HEADS)], axis=0)              # [H*bsz, s, dh]

    qh = heads(q3, 0)
    kh = heads(kv3, D_MODEL)
    vh = heads(kv3, 2 * D_MODEL)

    scale = 1.0 / math.sqrt(D_HEAD)
    # f32 einsums: the 8-wide operands gain nothing from bf16, only relayout.
    scores = jnp.einsum('zqe,zke->zqk', qh, kh,
                        preferred_element_type=jnp.float32) * scale
    # Broadcast the additive mask bias over the head axis without per-head
    # copies: split the leading dim (free), broadcast-add, merge back (free).
    scores = (scores.reshape(N_HEADS, bsz, sq, sk) + bias[None]
              ).reshape(N_HEADS * bsz, sq, sk)
    m = jnp.max(scores, axis=-1, keepdims=True)              # f32 softmax
    p = jnp.exp(scores - m)
    p = p * pl.reciprocal(jnp.sum(p, axis=-1, keepdims=True), approx=True)
    ctx = jnp.einsum('zqk,zke->zqe', p, vh,
                     preferred_element_type=jnp.float32)     # [H*bsz, sq, dh]
    # merge heads back into lanes (head-major columns) + ONE output projection.
    ctx2 = jnp.concatenate(
        [ctx[h * bsz:(h + 1) * bsz].reshape(bsz * sq, D_HEAD)
         for h in range(N_HEADS)], axis=-1)                  # [bsz*sq, D]
    out = jnp.dot(ctx2.astype(jnp.bfloat16), wo,
                  preferred_element_type=jnp.float32) + bo
    return out                                               # [bsz*sq, D]


def _ffn(x2, w1, b1, w2, b2):
    h = jnp.maximum(
        jnp.dot(x2.astype(jnp.bfloat16), w1,
                preferred_element_type=jnp.float32) + b1, 0.0)
    return jnp.dot(h.astype(jnp.bfloat16), w2,
                   preferred_element_type=jnp.float32) + b2


# ------------------------------ the fused kernel ------------------------------

def fused_encdec_kernel(src_ref, tgt_ref, smask_ref, tmask_ref,
                        w_ref, b_ref, out_ref):
    bsz, ss, _ = src_ref.shape
    st = tgt_ref.shape[1]

    def W(name):
        off, rows, cols = W_LAYOUT[name]
        return w_ref[off:off + rows, 0:cols]        # bf16 [rows, cols]

    def B(name):
        off, cols = B_LAYOUT[name]
        return b_ref[off:off + 1, 0:cols]           # f32 [1, cols]

    # activations kept 2-D [tokens, D]; batch structure only used in attention.
    x = src_ref[...].reshape(bsz * ss, D_MODEL)      # embedded src
    y = tgt_ref[...].reshape(bsz * st, D_MODEL)      # embedded tgt

    # compact int masks -> additive -1e9 biases, computed ONCE (no head copies).
    src_bias = jnp.where(smask_ref[...] == 0,
                         jnp.float32(NEG_INF), jnp.float32(0.0))   # [B, 1, Ss]
    tgt_bias = jnp.where(tmask_ref[...] == 0,
                         jnp.float32(NEG_INF), jnp.float32(0.0))   # [B, St, St]

    # ------------------------------ encoder ------------------------------
    for l in range(N_LAYERS):                        # static unroll (N_LAYERS=2)
        p = f'enc{l}'
        xn = _layer_norm(x, B(p + '_ln1_a'), B(p + '_ln1_b'))
        x = x + _attention(xn, xn, src_bias,
                           W(p + '_attn_wqkv'), B(p + '_attn_bqkv'),
                           W(p + '_attn_wo'), B(p + '_attn_bo'),
                           bsz, ss, ss, self_attn=True)
        xn = _layer_norm(x, B(p + '_ln2_a'), B(p + '_ln2_b'))
        x = x + _ffn(xn, W(p + '_ff_w1'), B(p + '_ff_b1'),
                     W(p + '_ff_w2'), B(p + '_ff_b2'))
    memory = _layer_norm(x, B('enc_norm_a'), B('enc_norm_b'))     # [B*Ss, D]

    # ------------------------------ decoder ------------------------------
    for l in range(N_LAYERS):
        p = f'dec{l}'
        yn = _layer_norm(y, B(p + '_ln1_a'), B(p + '_ln1_b'))
        y = y + _attention(yn, yn, tgt_bias,
                           W(p + '_sa_wqkv'), B(p + '_sa_bqkv'),
                           W(p + '_sa_wo'), B(p + '_sa_bo'),
                           bsz, st, st, self_attn=True)
        yn = _layer_norm(y, B(p + '_ln2_a'), B(p + '_ln2_b'))
        y = y + _attention(yn, memory, src_bias,
                           W(p + '_ca_wqkv'), B(p + '_ca_bqkv'),
                           W(p + '_ca_wo'), B(p + '_ca_bo'),
                           bsz, st, ss, self_attn=False)
        yn = _layer_norm(y, B(p + '_ln3_a'), B(p + '_ln3_b'))
        y = y + _ffn(yn, W(p + '_ff_w1'), B(p + '_ff_b1'),
                     W(p + '_ff_w2'), B(p + '_ff_b2'))
    y = _layer_norm(y, B('dec_norm_a'), B('dec_norm_b'))

    # --------------- generator: log_softmax over lane-padded vocab ---------------
    logits = jnp.dot(y.astype(jnp.bfloat16), W('gen_wg'),
                     preferred_element_type=jnp.float32) + B('gen_bg')
    mx = jnp.max(logits, axis=-1, keepdims=True)
    z = logits - mx
    lse = jnp.log(jnp.sum(jnp.exp(z), axis=-1, keepdims=True))
    out_ref[...] = (z - lse).reshape(bsz, st, V_PAD)


# --------------------------------- glue / wrapper ---------------------------------

def positional_encoding(max_len, d):
    pos = jnp.arange(max_len, dtype=jnp.float32)[:, None]
    div = jnp.exp(jnp.arange(0, d, 2, dtype=jnp.float32) * -(math.log(10000.0) / d))
    pe = jnp.zeros((max_len, d), jnp.float32)
    pe = pe.at[:, 0::2].set(jnp.sin(pos * div))
    pe = pe.at[:, 1::2].set(jnp.cos(pos * div))
    return pe


def _embed(lut, tokens, pe):
    # TODO(synk): token-embedding gather + positional encoding stay as plain-JAX
    # wrapper glue (data-dependent gather); dropout layers are eval-mode identity.
    x = jnp.take(lut, tokens, axis=0) * math.sqrt(D_MODEL)
    return x + pe[None, :tokens.shape[1], :]


def encoder_decoder_forward(w_slab, b_slab, src, tgt, src_mask, tgt_mask,
                            src_lut, tgt_lut, pe):
    """EncoderDecoder.forward: generator(decoder(tgt_embed(tgt), encode(src), ...))."""
    src_emb = _embed(src_lut, src, pe)
    tgt_emb = _embed(tgt_lut, tgt, pe)
    smask = src_mask.astype(jnp.int32)              # compact [B, 1, Ss]
    tmask = tgt_mask.astype(jnp.int32)              # compact [B, St, St]

    b, st = tgt.shape
    out_pad = pl.pallas_call(
        fused_encdec_kernel,
        out_shape=jax.ShapeDtypeStruct((b, st, V_PAD), jnp.float32),
        in_specs=[pl.BlockSpec(memory_space=VMEM)] * 6,
        out_specs=pl.BlockSpec(memory_space=VMEM),
    )(src_emb, tgt_emb, smask, tmask, w_slab, b_slab)
    return out_pad[:, :, :VOCAB]


# ------------------------- parameters (deterministic) -------------------------

def init_params(key):
    keys = iter(jax.random.split(key, 128))

    def nrm(shape):
        return 0.1 * jax.random.normal(next(keys), shape, jnp.float32)

    p = {'src_lut': nrm((VOCAB, D_MODEL)), 'tgt_lut': nrm((VOCAB, D_MODEL))}

    def ln(pfx):
        p[pfx + '_a'] = jnp.ones((1, D_MODEL), jnp.float32)
        p[pfx + '_b'] = jnp.zeros((1, D_MODEL), jnp.float32)

    def attn(pfx):
        # NOTE: fused QKV column order is (q|k|v, head-major within each block)
        # and must match the in-kernel head split; loading real nn.Linear
        # checkpoints would require permuting columns to this layout.
        p[pfx + '_wqkv'] = nrm((D_MODEL, 3 * D_MODEL))
        p[pfx + '_bqkv'] = nrm((1, 3 * D_MODEL))
        p[pfx + '_wo'] = nrm((D_MODEL, D_MODEL))
        p[pfx + '_bo'] = nrm((1, D_MODEL))

    def ffn(pfx):
        p[pfx + '_w1'] = nrm((D_MODEL, D_FF)); p[pfx + '_b1'] = nrm((1, D_FF))
        p[pfx + '_w2'] = nrm((D_FF, D_MODEL)); p[pfx + '_b2'] = nrm((1, D_MODEL))

    for l in range(N_LAYERS):
        ln(f'enc{l}_ln1'); attn(f'enc{l}_attn'); ln(f'enc{l}_ln2'); ffn(f'enc{l}_ff')
    for l in range(N_LAYERS):
        ln(f'dec{l}_ln1'); attn(f'dec{l}_sa'); ln(f'dec{l}_ln2'); attn(f'dec{l}_ca')
        ln(f'dec{l}_ln3'); ffn(f'dec{l}_ff')
    ln('enc_norm'); ln('dec_norm')

    # generator, lane-padded 16 -> 128 (padded logit columns biased to -1e9;
    # the padded log-probs are ~-1e9 and are sliced away by the wrapper).
    wg = nrm((D_MODEL, VOCAB)); bg = nrm((1, VOCAB))
    p['gen_wg'] = jnp.zeros((D_MODEL, V_PAD), jnp.float32).at[:, :VOCAB].set(wg)
    p['gen_bg'] = jnp.full((1, V_PAD), NEG_INF, jnp.float32).at[:, :VOCAB].set(bg)
    return p


def pack_params(p):
    """Pack all kernel parameters into two flat VMEM slabs (2 DMAs total)."""
    w = jnp.zeros((W_ROWS, SLAB_LANES), jnp.float32)
    for name, (off, rows, cols) in W_LAYOUT.items():
        w = w.at[off:off + rows, :cols].set(p[name])
    b = jnp.zeros((B_ROWS, SLAB_LANES), jnp.float32)
    for name, (off, cols) in B_LAYOUT.items():
        b = b.at[off:off + 1, :cols].set(p[name])
    return w.astype(jnp.bfloat16), b


# ----------------------------------- main -----------------------------------

if __name__ == "__main__":
    key = jax.random.PRNGKey(0)
    pkey, skey, tkey = jax.random.split(key, 3)
    params = init_params(pkey)
    w_slab, b_slab = pack_params(params)     # packed once, reused every call

    B, S_SRC, S_TGT = 2, 8, 8
    src = jax.random.randint(skey, (B, S_SRC), 0, VOCAB, dtype=jnp.int32)
    tgt = jax.random.randint(tkey, (B, S_TGT), 0, VOCAB, dtype=jnp.int32)
    src_mask = jnp.ones((B, 1, S_SRC), dtype=jnp.bool_)
    causal = jnp.tril(jnp.ones((S_TGT, S_TGT), dtype=jnp.bool_))
    tgt_mask = jnp.broadcast_to(causal[None], (B, S_TGT, S_TGT))

    pe = positional_encoding(64, D_MODEL)

    fwd = jax.jit(encoder_decoder_forward)
    out = fwd(w_slab, b_slab, src, tgt, src_mask, tgt_mask,
              params['src_lut'], params['tgt_lut'], pe)
    out = jax.block_until_ready(out)
    assert out.shape == (B, S_TGT, VOCAB), out.shape
    assert bool(jnp.all(jnp.isfinite(out)))
    print("KERNEL_OK")
</pallas_src>

<mosaic_0001>
module attributes {stable_mosaic.version = 11 : i64} {
  func.func @fused_encdec_kernel(%arg0: memref<2x8x32xf32, #tpu.memory_space<vmem>>, %arg1: memref<2x8x32xf32, #tpu.memory_space<vmem>>, %arg2: memref<2x1x8xi32, #tpu.memory_space<vmem>>, %arg3: memref<2x8x8xi32, #tpu.memory_space<vmem>>, %arg4: memref<800x128xbf16, #tpu.memory_space<vmem>>, %arg5: memref<360x128xf32, #tpu.memory_space<vmem>>, %arg6: memref<2x8x128xf32, #tpu.memory_space<vmem>>) attributes {dimension_semantics = [], scalar_prefetch = 0 : i64, scratch_operands = 0 : i64, tpu.core_type = #tpu.core_type<tc>} {
    %c0 = arith.constant 0 : index
    %c0_0 = arith.constant 0 : index
    %c0_1 = arith.constant 0 : index
    %0 = vector.load %arg0[%c0, %c0_0, %c0_1] : memref<2x8x32xf32, #tpu.memory_space<vmem>>, vector<2x8x32xf32>
    %1 = vector.shape_cast %0 : vector<2x8x32xf32> to vector<16x32xf32>
    %c0_2 = arith.constant 0 : index
    %c0_3 = arith.constant 0 : index
    %c0_4 = arith.constant 0 : index
    %2 = vector.load %arg1[%c0_2, %c0_3, %c0_4] : memref<2x8x32xf32, #tpu.memory_space<vmem>>, vector<2x8x32xf32>
    %3 = vector.shape_cast %2 : vector<2x8x32xf32> to vector<16x32xf32>
    %c0_5 = arith.constant 0 : index
    %c0_6 = arith.constant 0 : index
    %c0_7 = arith.constant 0 : index
    %4 = vector.load %arg2[%c0_5, %c0_6, %c0_7] : memref<2x1x8xi32, #tpu.memory_space<vmem>>, vector<2x1x8xi32>
    %c0_i32 = arith.constant 0 : i32
    %5 = vector.broadcast %c0_i32 : i32 to vector<2x1x8xi32>
    %6 = arith.cmpi eq, %4, %5 : vector<2x1x8xi32>
    %cst = arith.constant -1.000000e+09 : f32
    %cst_8 = arith.constant 0.000000e+00 : f32
    %7 = vector.broadcast %cst : f32 to vector<2x1x8xf32>
    %8 = vector.broadcast %cst_8 : f32 to vector<2x1x8xf32>
    %9 = arith.select %6, %7, %8 : vector<2x1x8xi1>, vector<2x1x8xf32>
    %c0_9 = arith.constant 0 : index
    %c0_10 = arith.constant 0 : index
    %c0_11 = arith.constant 0 : index
    %10 = vector.load %arg3[%c0_9, %c0_10, %c0_11] : memref<2x8x8xi32, #tpu.memory_space<vmem>>, vector<2x8x8xi32>
    %c0_i32_12 = arith.constant 0 : i32
    %11 = vector.broadcast %c0_i32_12 : i32 to vector<2x8x8xi32>
    %12 = arith.cmpi eq, %10, %11 : vector<2x8x8xi32>
    %cst_13 = arith.constant -1.000000e+09 : f32
    %cst_14 = arith.constant 0.000000e+00 : f32
    %13 = vector.broadcast %cst_13 : f32 to vector<2x8x8xf32>
    %14 = vector.broadcast %cst_14 : f32 to vector<2x8x8xf32>
    %15 = arith.select %12, %13, %14 : vector<2x8x8xi1>, vector<2x8x8xf32>
    %c0_15 = arith.constant 0 : index
    %c0_16 = arith.constant 0 : index
    %16 = vector.load %arg5[%c0_15, %c0_16] : memref<360x128xf32, #tpu.memory_space<vmem>>, vector<1x32xf32>
    %c8 = arith.constant 8 : index
    %c0_17 = arith.constant 0 : index
    %17 = vector.load %arg5[%c8, %c0_17] : memref<360x128xf32, #tpu.memory_space<vmem>>, vector<1x32xf32>
    %cst_18 = arith.constant dense<0.000000e+00> : vector<16xf32>
    %18 = vector.multi_reduction <add>, %1, %cst_18 [1] : vector<16x32xf32> to vector<16xf32>
    %19 = vector.shape_cast %18 : vector<16xf32> to vector<16x1xf32>
    %cst_19 = arith.constant 3.200000e+01 : f32
    %20 = vector.broadcast %cst_19 : f32 to vector<16x1xf32>
    %21 = arith.divf %19, %20 : vector<16x1xf32>
    %22 = vector.broadcast %21 : vector<16x1xf32> to vector<16x32xf32>
    %23 = arith.subf %1, %22 : vector<16x32xf32>
    %24 = arith.mulf %23, %23 : vector<16x32xf32>
    %cst_20 = arith.constant dense<0.000000e+00> : vector<16xf32>
    %25 = vector.multi_reduction <add>, %24, %cst_20 [1] : vector<16x32xf32> to vector<16xf32>
    %26 = vector.shape_cast %25 : vector<16xf32> to vector<16x1xf32>
    %cst_21 = arith.constant 3.100000e+01 : f32
    %27 = vector.broadcast %cst_21 : f32 to vector<16x1xf32>
    %28 = arith.divf %26, %27 : vector<16x1xf32>
    %29 = vector.broadcast %16 : vector<1x32xf32> to vector<16x32xf32>
    %30 = arith.mulf %29, %23 : vector<16x32xf32>
    %31 = math.sqrt %28 : vector<16x1xf32>
    %cst_22 = arith.constant 9.99999997E-7 : f32
    %32 = vector.broadcast %cst_22 : f32 to vector<16x1xf32>
    %33 = arith.addf %31, %32 : vector<16x1xf32>
    %34 = vector.broadcast %33 : vector<16x1xf32> to vector<16x32xf32>
    %35 = arith.divf %30, %34 : vector<16x32xf32>
    %36 = vector.broadcast %17 : vector<1x32xf32> to vector<16x32xf32>
    %37 = arith.addf %35, %36 : vector<16x32xf32>
    %c0_23 = arith.constant 0 : index
    %c0_24 = arith.constant 0 : index
    %38 = vector.load %arg4[%c0_23, %c0_24] : memref<800x128xbf16, #tpu.memory_space<vmem>>, vector<32x96xbf16>
    %c16 = arith.constant 16 : index
    %c0_25 = arith.constant 0 : index
    %39 = vector.load %arg5[%c16, %c0_25] : memref<360x128xf32, #tpu.memory_space<vmem>>, vector<1x96xf32>
    %c32 = arith.constant 32 : index
    %c0_26 = arith.constant 0 : index
    %40 = vector.load %arg4[%c32, %c0_26] : memref<800x128xbf16, #tpu.memory_space<vmem>>, vector<32x32xbf16>
    %c24 = arith.constant 24 : index
    %c0_27 = arith.constant 0 : index
    %41 = vector.load %arg5[%c24, %c0_27] : memref<360x128xf32, #tpu.memory_space<vmem>>, vector<1x32xf32>
    %42 = arith.truncf %37 : vector<16x32xf32> to vector<16x32xbf16>
    %cst_28 = arith.constant dense<0.000000e+00> : vector<16x96xf32>
    %43 = tpu.matmul %42, %38, %cst_28 {dimension_numbers = #tpu.dot_dimension_numbers<[1], [0], [0], [1], [0, 0, 1, 1], [], []>} : vector<16x32xbf16>, vector<32x96xbf16>, vector<16x96xf32> -> vector<16x96xf32>
    %44 = vector.broadcast %39 : vector<1x96xf32> to vector<16x96xf32>
    %45 = arith.addf %43, %44 : vector<16x96xf32>
    %46 = vector.shape_cast %45 : vector<16x96xf32> to vector<2x8x96xf32>
    %47 = vector.extract_strided_slice %46 {offsets = [0, 0, 0], sizes = [2, 8, 8], strides = [1, 1, 1]} : vector<2x8x96xf32> to vector<2x8x8xf32>
    %48 = vector.extract_strided_slice %46 {offsets = [0, 0, 8], sizes = [2, 8, 8], strides = [1, 1, 1]} : vector<2x8x96xf32> to vector<2x8x8xf32>
    %49 = vector.extract_strided_slice %46 {offsets = [0, 0, 16], sizes = [2, 8, 8], strides = [1, 1, 1]} : vector<2x8x96xf32> to vector<2x8x8xf32>
    %50 = vector.extract_strided_slice %46 {offsets = [0, 0, 24], sizes = [2, 8, 8], strides = [1, 1, 1]} : vector<2x8x96xf32> to vector<2x8x8xf32>
    %51 = tpu.concatenate %47, %48, %49, %50 in 0 : vector<2x8x8xf32>, vector<2x8x8xf32>, vector<2x8x8xf32>, vector<2x8x8xf32> -> vector<8x8x8xf32>
    %52 = vector.extract_strided_slice %46 {offsets = [0, 0, 32], sizes = [2, 8, 8], strides = [1, 1, 1]} : vector<2x8x96xf32> to vector<2x8x8xf32>
    %53 = vector.extract_strided_slice %46 {offsets = [0, 0, 40], sizes = [2, 8, 8], strides = [1, 1, 1]} : vector<2x8x96xf32> to vector<2x8x8xf32>
    %54 = vector.extract_strided_slice %46 {offsets = [0, 0, 48], sizes = [2, 8, 8], strides = [1, 1, 1]} : vector<2x8x96xf32> to vector<2x8x8xf32>
    %55 = vector.extract_strided_slice %46 {offsets = [0, 0, 56], sizes = [2, 8, 8], strides = [1, 1, 1]} : vector<2x8x96xf32> to vector<2x8x8xf32>
    %56 = tpu.concatenate %52, %53, %54, %55 in 0 : vector<2x8x8xf32>, vector<2x8x8xf32>, vector<2x8x8xf32>, vector<2x8x8xf32> -> vector<8x8x8xf32>
    %57 = vector.extract_strided_slice %46 {offsets = [0, 0, 64], sizes = [2, 8, 8], strides = [1, 1, 1]} : vector<2x8x96xf32> to vector<2x8x8xf32>
    %58 = vector.extract_strided_slice %46 {offsets = [0, 0, 72], sizes = [2, 8, 8], strides = [1, 1, 1]} : vector<2x8x96xf32> to vector<2x8x8xf32>
    %59 = vector.extract_strided_slice %46 {offsets = [0, 0, 80], sizes = [2, 8, 8], strides = [1, 1, 1]} : vector<2x8x96xf32> to vector<2x8x8xf32>
    %60 = vector.extract_strided_slice %46 {offsets = [0, 0, 88], sizes = [2, 8, 8], strides = [1, 1, 1]} : vector<2x8x96xf32> to vector<2x8x8xf32>
    %61 = tpu.concatenate %57, %58, %59, %60 in 0 : vector<2x8x8xf32>, vector<2x8x8xf32>, vector<2x8x8xf32>, vector<2x8x8xf32> -> vector<8x8x8xf32>
    "tpu.trace_start"() <{level = 10 : i32, message = "zqe,zke->zqk"}> : () -> ()
    %cst_29 = arith.constant dense<0.000000e+00> : vector<8x8x8xf32>
    %62 = tpu.matmul %51, %56, %cst_29 {dimension_numbers = #tpu.dot_dimension_numbers<[2], [2], [1], [1], [0, 0, 0, 1, 1, 1], [0], [0]>} : vector<8x8x8xf32>, vector<8x8x8xf32>, vector<8x8x8xf32> -> vector<8x8x8xf32>
    "tpu.trace_stop"() : () -> ()
    %cst_30 = arith.constant 0.353553385 : f32
    %63 = vector.broadcast %cst_30 : f32 to vector<8x8x8xf32>
    %64 = arith.mulf %62, %63 : vector<8x8x8xf32>
    %65 = vector.shape_cast %64 : vector<8x8x8xf32> to vector<4x2x8x8xf32>
    %66 = vector.shape_cast %9 : vector<2x1x8xf32> to vector<1x2x1x8xf32>
    %67 = vector.broadcast %66 : vector<1x2x1x8xf32> to vector<4x2x8x8xf32>
    %68 = arith.addf %65, %67 : vector<4x2x8x8xf32>
    %69 = vector.shape_cast %68 : vector<4x2x8x8xf32> to vector<8x8x8xf32>
    %cst_31 = arith.constant dense<0xFF800000> : vector<8x8xf32>
    %70 = vector.multi_reduction <maximumf>, %69, %cst_31 [2] : vector<8x8x8xf32> to vector<8x8xf32>
    %71 = vector.shape_cast %70 : vector<8x8xf32> to vector<8x8x1xf32>
    %72 = vector.broadcast %71 : vector<8x8x1xf32> to vector<8x8x8xf32>
    %73 = arith.subf %69, %72 : vector<8x8x8xf32>
    %74 = math.exp %73 : vector<8x8x8xf32>
    %cst_32 = arith.constant dense<0.000000e+00> : vector<8x8xf32>
    %75 = vector.multi_reduction <add>, %74, %cst_32 [2] : vector<8x8x8xf32> to vector<8x8xf32>
    %76 = vector.shape_cast %75 : vector<8x8xf32> to vector<8x8x1xf32>
    %77 = tpu.reciprocal %76 {approx = true} : vector<8x8x1xf32> -> vector<8x8x1xf32>
    %78 = vector.broadcast %77 : vector<8x8x1xf32> to vector<8x8x8xf32>
    %79 = arith.mulf %74, %78 : vector<8x8x8xf32>
    "tpu.trace_start"() <{level = 10 : i32, message = "zqk,zke->zqe"}> : () -> ()
    %cst_33 = arith.constant dense<0.000000e+00> : vector<8x8x8xf32>
    %80 = tpu.matmul %79, %61, %cst_33 {dimension_numbers = #tpu.dot_dimension_numbers<[2], [1], [1], [2], [0, 0, 0, 1, 1, 2], [0], [0]>} : vector<8x8x8xf32>, vector<8x8x8xf32>, vector<8x8x8xf32> -> vector<8x8x8xf32>
    "tpu.trace_stop"() : () -> ()
    %81 = vector.extract_strided_slice %80 {offsets = [0, 0, 0], sizes = [2, 8, 8], strides = [1, 1, 1]} : vector<8x8x8xf32> to vector<2x8x8xf32>
    %82 = vector.shape_cast %81 : vector<2x8x8xf32> to vector<16x8xf32>
    %83 = vector.extract_strided_slice %80 {offsets = [2, 0, 0], sizes = [2, 8, 8], strides = [1, 1, 1]} : vector<8x8x8xf32> to vector<2x8x8xf32>
    %84 = vector.shape_cast %83 : vector<2x8x8xf32> to vector<16x8xf32>
    %85 = vector.extract_strided_slice %80 {offsets = [4, 0, 0], sizes = [2, 8, 8], strides = [1, 1, 1]} : vector<8x8x8xf32> to vector<2x8x8xf32>
    %86 = vector.shape_cast %85 : vector<2x8x8xf32> to vector<16x8xf32>
    %87 = vector.extract_strided_slice %80 {offsets = [6, 0, 0], sizes = [2, 8, 8], strides = [1, 1, 1]} : vector<8x8x8xf32> to vector<2x8x8xf32>
    %88 = vector.shape_cast %87 : vector<2x8x8xf32> to vector<16x8xf32>
    %89 = tpu.concatenate %82, %84, %86, %88 in 1 : vector<16x8xf32>, vector<16x8xf32>, vector<16x8xf32>, vector<16x8xf32> -> vector<16x32xf32>
    %90 = arith.truncf %89 : vector<16x32xf32> to vector<16x32xbf16>
    %cst_34 = arith.constant dense<0.000000e+00> : vector<16x32xf32>
    %91 = tpu.matmul %90, %40, %cst_34 {dimension_numbers = #tpu.dot_dimension_numbers<[1], [0], [0], [1], [0, 0, 1, 1], [], []>} : vector<16x32xbf16>, vector<32x32xbf16>, vector<16x32xf32> -> vector<16x32xf32>
    %92 = vector.broadcast %41 : vector<1x32xf32> to vector<16x32xf32>
    %93 = arith.addf %91, %92 : vector<16x32xf32>
    %94 = arith.addf %1, %93 : vector<16x32xf32>
    %c32_35 = arith.constant 32 : index
    %c0_36 = arith.constant 0 : index
    %95 = vector.load %arg5[%c32_35, %c0_36] : memref<360x128xf32, #tpu.memory_space<vmem>>, vector<1x32xf32>
    %c40 = arith.constant 40 : index
    %c0_37 = arith.constant 0 : index
    %96 = vector.load %arg5[%c40, %c0_37] : memref<360x128xf32, #tpu.memory_space<vmem>>, vector<1x32xf32>
    %cst_38 = arith.constant dense<0.000000e+00> : vector<16xf32>
    %97 = vector.multi_reduction <add>, %94, %cst_38 [1] : vector<16x32xf32> to vector<16xf32>
    %98 = vector.shape_cast %97 : vector<16xf32> to vector<16x1xf32>
    %cst_39 = arith.constant 3.200000e+01 : f32
    %99 = vector.broadcast %cst_39 : f32 to vector<16x1xf32>
    %100 = arith.divf %98, %99 : vector<16x1xf32>
    %101 = vector.broadcast %100 : vector<16x1xf32> to vector<16x32xf32>
    %102 = arith.subf %94, %101 : vector<16x32xf32>
    %103 = arith.mulf %102, %102 : vector<16x32xf32>
    %cst_40 = arith.constant dense<0.000000e+00> : vector<16xf32>
    %104 = vector.multi_reduction <add>, %103, %cst_40 [1] : vector<16x32xf32> to vector<16xf32>
    %105 = vector.shape_cast %104 : vector<16xf32> to vector<16x1xf32>
    %cst_41 = arith.constant 3.100000e+01 : f32
    %106 = vector.broadcast %cst_41 : f32 to vector<16x1xf32>
    %107 = arith.divf %105, %106 : vector<16x1xf32>
    %108 = vector.broadcast %95 : vector<1x32xf32> to vector<16x32xf32>
    %109 = arith.mulf %108, %102 : vector<16x32xf32>
    %110 = math.sqrt %107 : vector<16x1xf32>
    %cst_42 = arith.constant 9.99999997E-7 : f32
    %111 = vector.broadcast %cst_42 : f32 to vector<16x1xf32>
    %112 = arith.addf %110, %111 : vector<16x1xf32>
    %113 = vector.broadcast %112 : vector<16x1xf32> to vector<16x32xf32>
    %114 = arith.divf %109, %113 : vector<16x32xf32>
    %115 = vector.broadcast %96 : vector<1x32xf32> to vector<16x32xf32>
    %116 = arith.addf %114, %115 : vector<16x32xf32>
    %c64 = arith.constant 64 : index
    %c0_43 = arith.constant 0 : index
    %117 = vector.load %arg4[%c64, %c0_43] : memref<800x128xbf16, #tpu.memory_space<vmem>>, vector<32x64xbf16>
    %c48 = arith.constant 48 : index
    %c0_44 = arith.constant 0 : index
    %118 = vector.load %arg5[%c48, %c0_44] : memref<360x128xf32, #tpu.memory_space<vmem>>, vector<1x64xf32>
    %c96 = arith.constant 96 : index
    %c0_45 = arith.constant 0 : index
    %119 = vector.load %arg4[%c96, %c0_45] : memref<800x128xbf16, #tpu.memory_space<vmem>>, vector<64x32xbf16>
    %c56 = arith.constant 56 : index
    %c0_46 = arith.constant 0 : index
    %120 = vector.load %arg5[%c56, %c0_46] : memref<360x128xf32, #tpu.memory_space<vmem>>, vector<1x32xf32>
    %121 = arith.truncf %116 : vector<16x32xf32> to vector<16x32xbf16>
    %cst_47 = arith.constant dense<0.000000e+00> : vector<16x64xf32>
    %122 = tpu.matmul %121, %117, %cst_47 {dimension_numbers = #tpu.dot_dimension_numbers<[1], [0], [0], [1], [0, 0, 1, 1], [], []>} : vector<16x32xbf16>, vector<32x64xbf16>, vector<16x64xf32> -> vector<16x64xf32>
    %123 = vector.broadcast %118 : vector<1x64xf32> to vector<16x64xf32>
    %124 = arith.addf %122, %123 : vector<16x64xf32>
    %cst_48 = arith.constant 0.000000e+00 : f32
    %125 = vector.broadcast %cst_48 : f32 to vector<16x64xf32>
    %126 = arith.maximumf %124, %125 : vector<16x64xf32>
    %127 = arith.truncf %126 : vector<16x64xf32> to vector<16x64xbf16>
    %cst_49 = arith.constant dense<0.000000e+00> : vector<16x32xf32>
    %128 = tpu.matmul %127, %119, %cst_49 {dimension_numbers = #tpu.dot_dimension_numbers<[1], [0], [0], [1], [0, 0, 1, 1], [], []>} : vector<16x64xbf16>, vector<64x32xbf16>, vector<16x32xf32> -> vector<16x32xf32>
    %129 = vector.broadcast %120 : vector<1x32xf32> to vector<16x32xf32>
    %130 = arith.addf %128, %129 : vector<16x32xf32>
    %131 = arith.addf %94, %130 : vector<16x32xf32>
    %c64_50 = arith.constant 64 : index
    %c0_51 = arith.constant 0 : index
    %132 = vector.load %arg5[%c64_50, %c0_51] : memref<360x128xf32, #tpu.memory_space<vmem>>, vector<1x32xf32>
    %c72 = arith.constant 72 : index
    %c0_52 = arith.constant 0 : index
    %133 = vector.load %arg5[%c72, %c0_52] : memref<360x128xf32, #tpu.memory_space<vmem>>, vector<1x32xf32>
    %cst_53 = arith.constant dense<0.000000e+00> : vector<16xf32>
    %134 = vector.multi_reduction <add>, %131, %cst_53 [1] : vector<16x32xf32> to vector<16xf32>
    %135 = vector.shape_cast %134 : vector<16xf32> to vector<16x1xf32>
    %cst_54 = arith.constant 3.200000e+01 : f32
    %136 = vector.broadcast %cst_54 : f32 to vector<16x1xf32>
    %137 = arith.divf %135, %136 : vector<16x1xf32>
    %138 = vector.broadcast %137 : vector<16x1xf32> to vector<16x32xf32>
    %139 = arith.subf %131, %138 : vector<16x32xf32>
    %140 = arith.mulf %139, %139 : vector<16x32xf32>
    %cst_55 = arith.constant dense<0.000000e+00> : vector<16xf32>
    %141 = vector.multi_reduction <add>, %140, %cst_55 [1] : vector<16x32xf32> to vector<16xf32>
    %142 = vector.shape_cast %141 : vector<16xf32> to vector<16x1xf32>
    %cst_56 = arith.constant 3.100000e+01 : f32
    %143 = vector.broadcast %cst_56 : f32 to vector<16x1xf32>
    %144 = arith.divf %142, %143 : vector<16x1xf32>
    %145 = vector.broadcast %132 : vector<1x32xf32> to vector<16x32xf32>
    %146 = arith.mulf %145, %139 : vector<16x32xf32>
    %147 = math.sqrt %144 : vector<16x1xf32>
    %cst_57 = arith.constant 9.99999997E-7 : f32
    %148 = vector.broadcast %cst_57 : f32 to vector<16x1xf32>
    %149 = arith.addf %147, %148 : vector<16x1xf32>
    %150 = vector.broadcast %149 : vector<16x1xf32> to vector<16x32xf32>
    %151 = arith.divf %146, %150 : vector<16x32xf32>
    %152 = vector.broadcast %133 : vector<1x32xf32> to vector<16x32xf32>
    %153 = arith.addf %151, %152 : vector<16x32xf32>
    %c160 = arith.constant 160 : index
    %c0_58 = arith.constant 0 : index
    %154 = vector.load %arg4[%c160, %c0_58] : memref<800x128xbf16, #tpu.memory_space<vmem>>, vector<32x96xbf16>
    %c80 = arith.constant 80 : index
    %c0_59 = arith.constant 0 : index
    %155 = vector.load %arg5[%c80, %c0_59] : memref<360x128xf32, #tpu.memory_space<vmem>>, vector<1x96xf32>
    %c192 = arith.constant 192 : index
    %c0_60 = arith.constant 0 : index
    %156 = vector.load %arg4[%c192, %c0_60] : memref<800x128xbf16, #tpu.memory_space<vmem>>, vector<32x32xbf16>
    %c88 = arith.constant 88 : index
    %c0_61 = arith.constant 0 : index
    %157 = vector.load %arg5[%c88, %c0_61] : memref<360x128xf32, #tpu.memory_space<vmem>>, vector<1x32xf32>
    %158 = arith.truncf %153 : vector<16x32xf32> to vector<16x32xbf16>
    %cst_62 = arith.constant dense<0.000000e+00> : vector<16x96xf32>
    %159 = tpu.matmul %158, %154, %cst_62 {dimension_numbers = #tpu.dot_dimension_numbers<[1], [0], [0], [1], [0, 0, 1, 1], [], []>} : vector<16x32xbf16>, vector<32x96xbf16>, vector<16x96xf32> -> vector<16x96xf32>
    %160 = vector.broadcast %155 : vector<1x96xf32> to vector<16x96xf32>
    %161 = arith.addf %159, %160 : vector<16x96xf32>
    %162 = vector.shape_cast %161 : vector<16x96xf32> to vector<2x8x96xf32>
    %163 = vector.extract_strided_slice %162 {offsets = [0, 0, 0], sizes = [2, 8, 8], strides = [1, 1, 1]} : vector<2x8x96xf32> to vector<2x8x8xf32>
    %164 = vector.extract_strided_slice %162 {offsets = [0, 0, 8], sizes = [2, 8, 8], strides = [1, 1, 1]} : vector<2x8x96xf32> to vector<2x8x8xf32>
    %165 = vector.extract_strided_slice %162 {offsets = [0, 0, 16], sizes = [2, 8, 8], strides = [1, 1, 1]} : vector<2x8x96xf32> to vector<2x8x8xf32>
    %166 = vector.extract_strided_slice %162 {offsets = [0, 0, 24], sizes = [2, 8, 8], strides = [1, 1, 1]} : vector<2x8x96xf32> to vector<2x8x8xf32>
    %167 = tpu.concatenate %163, %164, %165, %166 in 0 : vector<2x8x8xf32>, vector<2x8x8xf32>, vector<2x8x8xf32>, vector<2x8x8xf32> -> vector<8x8x8xf32>
    %168 = vector.extract_strided_slice %162 {offsets = [0, 0, 32], sizes = [2, 8, 8], strides = [1, 1, 1]} : vector<2x8x96xf32> to vector<2x8x8xf32>
    %169 = vector.extract_strided_slice %162 {offsets = [0, 0, 40], sizes = [2, 8, 8], strides = [1, 1, 1]} : vector<2x8x96xf32> to vector<2x8x8xf32>
    %170 = vector.extract_strided_slice %162 {offsets = [0, 0, 48], sizes = [2, 8, 8], strides = [1, 1, 1]} : vector<2x8x96xf32> to vector<2x8x8xf32>
    %171 = vector.extract_strided_slice %162 {offsets = [0, 0, 56], sizes = [2, 8, 8], strides = [1, 1, 1]} : vector<2x8x96xf32> to vector<2x8x8xf32>
    %172 = tpu.concatenate %168, %169, %170, %171 in 0 : vector<2x8x8xf32>, vector<2x8x8xf32>, vector<2x8x8xf32>, vector<2x8x8xf32> -> vector<8x8x8xf32>
    %173 = vector.extract_strided_slice %162 {offsets = [0, 0, 64], sizes = [2, 8, 8], strides = [1, 1, 1]} : vector<2x8x96xf32> to vector<2x8x8xf32>
    %174 = vector.extract_strided_slice %162 {offsets = [0, 0, 72], sizes = [2, 8, 8], strides = [1, 1, 1]} : vector<2x8x96xf32> to vector<2x8x8xf32>
    %175 = vector.extract_strided_slice %162 {offsets = [0, 0, 80], sizes = [2, 8, 8], strides = [1, 1, 1]} : vector<2x8x96xf32> to vector<2x8x8xf32>
    %176 = vector.extract_strided_slice %162 {offsets = [0, 0, 88], sizes = [2, 8, 8], strides = [1, 1, 1]} : vector<2x8x96xf32> to vector<2x8x8xf32>
    %177 = tpu.concatenate %173, %174, %175, %176 in 0 : vector<2x8x8xf32>, vector<2x8x8xf32>, vector<2x8x8xf32>, vector<2x8x8xf32> -> vector<8x8x8xf32>
    "tpu.trace_start"() <{level = 10 : i32, message = "zqe,zke->zqk"}> : () -> ()
    %cst_63 = arith.constant dense<0.000000e+00> : vector<8x8x8xf32>
    %178 = tpu.matmul %167, %172, %cst_63 {dimension_numbers = #tpu.dot_dimension_numbers<[2], [2], [1], [1], [0, 0, 0, 1, 1, 1], [0], [0]>} : vector<8x8x8xf32>, vector<8x8x8xf32>, vector<8x8x8xf32> -> vector<8x8x8xf32>
    "tpu.trace_stop"() : () -> ()
    %cst_64 = arith.constant 0.353553385 : f32
    %179 = vector.broadcast %cst_64 : f32 to vector<8x8x8xf32>
    %180 = arith.mulf %178, %179 : vector<8x8x8xf32>
    %181 = vector.shape_cast %180 : vector<8x8x8xf32> to vector<4x2x8x8xf32>
    %182 = vector.shape_cast %9 : vector<2x1x8xf32> to vector<1x2x1x8xf32>
    %183 = vector.broadcast %182 : vector<1x2x1x8xf32> to vector<4x2x8x8xf32>
    %184 = arith.addf %181, %183 : vector<4x2x8x8xf32>
    %185 = vector.shape_cast %184 : vector<4x2x8x8xf32> to vector<8x8x8xf32>
    %cst_65 = arith.constant dense<0xFF800000> : vector<8x8xf32>
    %186 = vector.multi_reduction <maximumf>, %185, %cst_65 [2] : vector<8x8x8xf32> to vector<8x8xf32>
    %187 = vector.shape_cast %186 : vector<8x8xf32> to vector<8x8x1xf32>
    %188 = vector.broadcast %187 : vector<8x8x1xf32> to vector<8x8x8xf32>
    %189 = arith.subf %185, %188 : vector<8x8x8xf32>
    %190 = math.exp %189 : vector<8x8x8xf32>
    %cst_66 = arith.constant dense<0.000000e+00> : vector<8x8xf32>
    %191 = vector.multi_reduction <add>, %190, %cst_66 [2] : vector<8x8x8xf32> to vector<8x8xf32>
    %192 = vector.shape_cast %191 : vector<8x8xf32> to vector<8x8x1xf32>
    %193 = tpu.reciprocal %192 {approx = true} : vector<8x8x1xf32> -> vector<8x8x1xf32>
    %194 = vector.broadcast %193 : vector<8x8x1xf32> to vector<8x8x8xf32>
    %195 = arith.mulf %190, %194 : vector<8x8x8xf32>
    "tpu.trace_start"() <{level = 10 : i32, message = "zqk,zke->zqe"}> : () -> ()
    %cst_67 = arith.constant dense<0.000000e+00> : vector<8x8x8xf32>
    %196 = tpu.matmul %195, %177, %cst_67 {dimension_numbers = #tpu.dot_dimension_numbers<[2], [1], [1], [2], [0, 0, 0, 1, 1, 2], [0], [0]>} : vector<8x8x8xf32>, vector<8x8x8xf32>, vector<8x8x8xf32> -> vector<8x8x8xf32>
    "tpu.trace_stop"() : () -> ()
    %197 = vector.extract_strided_slice %196 {offsets = [0, 0, 0], sizes = [2, 8, 8], strides = [1, 1, 1]} : vector<8x8x8xf32> to vector<2x8x8xf32>
    %198 = vector.shape_cast %197 : vector<2x8x8xf32> to vector<16x8xf32>
    %199 = vector.extract_strided_slice %196 {offsets = [2, 0, 0], sizes = [2, 8, 8], strides = [1, 1, 1]} : vector<8x8x8xf32> to vector<2x8x8xf32>
    %200 = vector.shape_cast %199 : vector<2x8x8xf32> to vector<16x8xf32>
    %201 = vector.extract_strided_slice %196 {offsets = [4, 0, 0], sizes = [2, 8, 8], strides = [1, 1, 1]} : vector<8x8x8xf32> to vector<2x8x8xf32>
    %202 = vector.shape_cast %201 : vector<2x8x8xf32> to vector<16x8xf32>
    %203 = vector.extract_strided_slice %196 {offsets = [6, 0, 0], sizes = [2, 8, 8], strides = [1, 1, 1]} : vector<8x8x8xf32> to vector<2x8x8xf32>
    %204 = vector.shape_cast %203 : vector<2x8x8xf32> to vector<16x8xf32>
    %205 = tpu.concatenate %198, %200, %202, %204 in 1 : vector<16x8xf32>, vector<16x8xf32>, vector<16x8xf32>, vector<16x8xf32> -> vector<16x32xf32>
    %206 = arith.truncf %205 : vector<16x32xf32> to vector<16x32xbf16>
    %cst_68 = arith.constant dense<0.000000e+00> : vector<16x32xf32>
    %207 = tpu.matmul %206, %156, %cst_68 {dimension_numbers = #tpu.dot_dimension_numbers<[1], [0], [0], [1], [0, 0, 1, 1], [], []>} : vector<16x32xbf16>, vector<32x32xbf16>, vector<16x32xf32> -> vector<16x32xf32>
    %208 = vector.broadcast %157 : vector<1x32xf32> to vector<16x32xf32>
    %209 = arith.addf %207, %208 : vector<16x32xf32>
    %210 = arith.addf %131, %209 : vector<16x32xf32>
    %c96_69 = arith.constant 96 : index
    %c0_70 = arith.constant 0 : index
    %211 = vector.load %arg5[%c96_69, %c0_70] : memref<360x128xf32, #tpu.memory_space<vmem>>, vector<1x32xf32>
    %c104 = arith.constant 104 : index
    %c0_71 = arith.constant 0 : index
    %212 = vector.load %arg5[%c104, %c0_71] : memref<360x128xf32, #tpu.memory_space<vmem>>, vector<1x32xf32>
    %cst_72 = arith.constant dense<0.000000e+00> : vector<16xf32>
    %213 = vector.multi_reduction <add>, %210, %cst_72 [1] : vector<16x32xf32> to vector<16xf32>
    %214 = vector.shape_cast %213 : vector<16xf32> to vector<16x1xf32>
    %cst_73 = arith.constant 3.200000e+01 : f32
    %215 = vector.broadcast %cst_73 : f32 to vector<16x1xf32>
    %216 = arith.divf %214, %215 : vector<16x1xf32>
    %217 = vector.broadcast %216 : vector<16x1xf32> to vector<16x32xf32>
    %218 = arith.subf %210, %217 : vector<16x32xf32>
    %219 = arith.mulf %218, %218 : vector<16x32xf32>
    %cst_74 = arith.constant dense<0.000000e+00> : vector<16xf32>
    %220 = vector.multi_reduction <add>, %219, %cst_74 [1] : vector<16x32xf32> to vector<16xf32>
    %221 = vector.shape_cast %220 : vector<16xf32> to vector<16x1xf32>
    %cst_75 = arith.constant 3.100000e+01 : f32
    %222 = vector.broadcast %cst_75 : f32 to vector<16x1xf32>
    %223 = arith.divf %221, %222 : vector<16x1xf32>
    %224 = vector.broadcast %211 : vector<1x32xf32> to vector<16x32xf32>
    %225 = arith.mulf %224, %218 : vector<16x32xf32>
    %226 = math.sqrt %223 : vector<16x1xf32>
    %cst_76 = arith.constant 9.99999997E-7 : f32
    %227 = vector.broadcast %cst_76 : f32 to vector<16x1xf32>
    %228 = arith.addf %226, %227 : vector<16x1xf32>
    %229 = vector.broadcast %228 : vector<16x1xf32> to vector<16x32xf32>
    %230 = arith.divf %225, %229 : vector<16x32xf32>
    %231 = vector.broadcast %212 : vector<1x32xf32> to vector<16x32xf32>
    %232 = arith.addf %230, %231 : vector<16x32xf32>
    %c224 = arith.constant 224 : index
    %c0_77 = arith.constant 0 : index
    %233 = vector.load %arg4[%c224, %c0_77] : memref<800x128xbf16, #tpu.memory_space<vmem>>, vector<32x64xbf16>
    %c112 = arith.constant 112 : index
    %c0_78 = arith.constant 0 : index
    %234 = vector.load %arg5[%c112, %c0_78] : memref<360x128xf32, #tpu.memory_space<vmem>>, vector<1x64xf32>
    %c256 = arith.constant 256 : index
    %c0_79 = arith.constant 0 : index
    %235 = vector.load %arg4[%c256, %c0_79] : memref<800x128xbf16, #tpu.memory_space<vmem>>, vector<64x32xbf16>
    %c120 = arith.constant 120 : index
    %c0_80 = arith.constant 0 : index
    %236 = vector.load %arg5[%c120, %c0_80] : memref<360x128xf32, #tpu.memory_space<vmem>>, vector<1x32xf32>
    %237 = arith.truncf %232 : vector<16x32xf32> to vector<16x32xbf16>
    %cst_81 = arith.constant dense<0.000000e+00> : vector<16x64xf32>
    %238 = tpu.matmul %237, %233, %cst_81 {dimension_numbers = #tpu.dot_dimension_numbers<[1], [0], [0], [1], [0, 0, 1, 1], [], []>} : vector<16x32xbf16>, vector<32x64xbf16>, vector<16x64xf32> -> vector<16x64xf32>
    %239 = vector.broadcast %234 : vector<1x64xf32> to vector<16x64xf32>
    %240 = arith.addf %238, %239 : vector<16x64xf32>
    %cst_82 = arith.constant 0.000000e+00 : f32
    %241 = vector.broadcast %cst_82 : f32 to vector<16x64xf32>
    %242 = arith.maximumf %240, %241 : vector<16x64xf32>
    %243 = arith.truncf %242 : vector<16x64xf32> to vector<16x64xbf16>
    %cst_83 = arith.constant dense<0.000000e+00> : vector<16x32xf32>
    %244 = tpu.matmul %243, %235, %cst_83 {dimension_numbers = #tpu.dot_dimension_numbers<[1], [0], [0], [1], [0, 0, 1, 1], [], []>} : vector<16x64xbf16>, vector<64x32xbf16>, vector<16x32xf32> -> vector<16x32xf32>
    %245 = vector.broadcast %236 : vector<1x32xf32> to vector<16x32xf32>
    %246 = arith.addf %244, %245 : vector<16x32xf32>
    %247 = arith.addf %210, %246 : vector<16x32xf32>
    %c320 = arith.constant 320 : index
    %c0_84 = arith.constant 0 : index
    %248 = vector.load %arg5[%c320, %c0_84] : memref<360x128xf32, #tpu.memory_space<vmem>>, vector<1x32xf32>
    %c328 = arith.constant 328 : index
    %c0_85 = arith.constant 0 : index
    %249 = vector.load %arg5[%c328, %c0_85] : memref<360x128xf32, #tpu.memory_space<vmem>>, vector<1x32xf32>
    %cst_86 = arith.constant dense<0.000000e+00> : vector<16xf32>
    %250 = vector.multi_reduction <add>, %247, %cst_86 [1] : vector<16x32xf32> to vector<16xf32>
    %251 = vector.shape_cast %250 : vector<16xf32> to vector<16x1xf32>
    %cst_87 = arith.constant 3.200000e+01 : f32
    %252 = vector.broadcast %cst_87 : f32 to vector<16x1xf32>
    %253 = arith.divf %251, %252 : vector<16x1xf32>
    %254 = vector.broadcast %253 : vector<16x1xf32> to vector<16x32xf32>
    %255 = arith.subf %247, %254 : vector<16x32xf32>
    %256 = arith.mulf %255, %255 : vector<16x32xf32>
    %cst_88 = arith.constant dense<0.000000e+00> : vector<16xf32>
    %257 = vector.multi_reduction <add>, %256, %cst_88 [1] : vector<16x32xf32> to vector<16xf32>
    %258 = vector.shape_cast %257 : vector<16xf32> to vector<16x1xf32>
    %cst_89 = arith.constant 3.100000e+01 : f32
    %259 = vector.broadcast %cst_89 : f32 to vector<16x1xf32>
    %260 = arith.divf %258, %259 : vector<16x1xf32>
    %261 = vector.broadcast %248 : vector<1x32xf32> to vector<16x32xf32>
    %262 = arith.mulf %261, %255 : vector<16x32xf32>
    %263 = math.sqrt %260 : vector<16x1xf32>
    %cst_90 = arith.constant 9.99999997E-7 : f32
    %264 = vector.broadcast %cst_90 : f32 to vector<16x1xf32>
    %265 = arith.addf %263, %264 : vector<16x1xf32>
    %266 = vector.broadcast %265 : vector<16x1xf32> to vector<16x32xf32>
    %267 = arith.divf %262, %266 : vector<16x32xf32>
    %268 = vector.broadcast %249 : vector<1x32xf32> to vector<16x32xf32>
    %269 = arith.addf %267, %268 : vector<16x32xf32>
    %c128 = arith.constant 128 : index
    %c0_91 = arith.constant 0 : index
    %270 = vector.load %arg5[%c128, %c0_91] : memref<360x128xf32, #tpu.memory_space<vmem>>, vector<1x32xf32>
    %c136 = arith.constant 136 : index
    %c0_92 = arith.constant 0 : index
    %271 = vector.load %arg5[%c136, %c0_92] : memref<360x128xf32, #tpu.memory_space<vmem>>, vector<1x32xf32>
    %cst_93 = arith.constant dense<0.000000e+00> : vector<16xf32>
    %272 = vector.multi_reduction <add>, %3, %cst_93 [1] : vector<16x32xf32> to vector<16xf32>
    %273 = vector.shape_cast %272 : vector<16xf32> to vector<16x1xf32>
    %cst_94 = arith.constant 3.200000e+01 : f32
    %274 = vector.broadcast %cst_94 : f32 to vector<16x1xf32>
    %275 = arith.divf %273, %274 : vector<16x1xf32>
    %276 = vector.broadcast %275 : vector<16x1xf32> to vector<16x32xf32>
    %277 = arith.subf %3, %276 : vector<16x32xf32>
    %278 = arith.mulf %277, %277 : vector<16x32xf32>
    %cst_95 = arith.constant dense<0.000000e+00> : vector<16xf32>
    %279 = vector.multi_reduction <add>, %278, %cst_95 [1] : vector<16x32xf32> to vector<16xf32>
    %280 = vector.shape_cast %279 : vector<16xf32> to vector<16x1xf32>
    %cst_96 = arith.constant 3.100000e+01 : f32
    %281 = vector.broadcast %cst_96 : f32 to vector<16x1xf32>
    %282 = arith.divf %280, %281 : vector<16x1xf32>
    %283 = vector.broadcast %270 : vector<1x32xf32> to vector<16x32xf32>
    %284 = arith.mulf %283, %277 : vector<16x32xf32>
    %285 = math.sqrt %282 : vector<16x1xf32>
    %cst_97 = arith.constant 9.99999997E-7 : f32
    %286 = vector.broadcast %cst_97 : f32 to vector<16x1xf32>
    %287 = arith.addf %285, %286 : vector<16x1xf32>
    %288 = vector.broadcast %287 : vector<16x1xf32> to vector<16x32xf32>
    %289 = arith.divf %284, %288 : vector<16x32xf32>
    %290 = vector.broadcast %271 : vector<1x32xf32> to vector<16x32xf32>
    %291 = arith.addf %289, %290 : vector<16x32xf32>
    %c320_98 = arith.constant 320 : index
    %c0_99 = arith.constant 0 : index
    %292 = vector.load %arg4[%c320_98, %c0_99] : memref<800x128xbf16, #tpu.memory_space<vmem>>, vector<32x96xbf16>
    %c144 = arith.constant 144 : index
    %c0_100 = arith.constant 0 : index
    %293 = vector.load %arg5[%c144, %c0_100] : memref<360x128xf32, #tpu.memory_space<vmem>>, vector<1x96xf32>
    %c352 = arith.constant 352 : index
    %c0_101 = arith.constant 0 : index
    %294 = vector.load %arg4[%c352, %c0_101] : memref<800x128xbf16, #tpu.memory_space<vmem>>, vector<32x32xbf16>
    %c152 = arith.constant 152 : index
    %c0_102 = arith.constant 0 : index
    %295 = vector.load %arg5[%c152, %c0_102] : memref<360x128xf32, #tpu.memory_space<vmem>>, vector<1x32xf32>
    %296 = arith.truncf %291 : vector<16x32xf32> to vector<16x32xbf16>
    %cst_103 = arith.constant dense<0.000000e+00> : vector<16x96xf32>
    %297 = tpu.matmul %296, %292, %cst_103 {dimension_numbers = #tpu.dot_dimension_numbers<[1], [0], [0], [1], [0, 0, 1, 1], [], []>} : vector<16x32xbf16>, vector<32x96xbf16>, vector<16x96xf32> -> vector<16x96xf32>
    %298 = vector.broadcast %293 : vector<1x96xf32> to vector<16x96xf32>
    %299 = arith.addf %297, %298 : vector<16x96xf32>
    %300 = vector.shape_cast %299 : vector<16x96xf32> to vector<2x8x96xf32>
    %301 = vector.extract_strided_slice %300 {offsets = [0, 0, 0], sizes = [2, 8, 8], strides = [1, 1, 1]} : vector<2x8x96xf32> to vector<2x8x8xf32>
    %302 = vector.extract_strided_slice %300 {offsets = [0, 0, 8], sizes = [2, 8, 8], strides = [1, 1, 1]} : vector<2x8x96xf32> to vector<2x8x8xf32>
    %303 = vector.extract_strided_slice %300 {offsets = [0, 0, 16], sizes = [2, 8, 8], strides = [1, 1, 1]} : vector<2x8x96xf32> to vector<2x8x8xf32>
    %304 = vector.extract_strided_slice %300 {offsets = [0, 0, 24], sizes = [2, 8, 8], strides = [1, 1, 1]} : vector<2x8x96xf32> to vector<2x8x8xf32>
    %305 = tpu.concatenate %301, %302, %303, %304 in 0 : vector<2x8x8xf32>, vector<2x8x8xf32>, vector<2x8x8xf32>, vector<2x8x8xf32> -> vector<8x8x8xf32>
    %306 = vector.extract_strided_slice %300 {offsets = [0, 0, 32], sizes = [2, 8, 8], strides = [1, 1, 1]} : vector<2x8x96xf32> to vector<2x8x8xf32>
    %307 = vector.extract_strided_slice %300 {offsets = [0, 0, 40], sizes = [2, 8, 8], strides = [1, 1, 1]} : vector<2x8x96xf32> to vector<2x8x8xf32>
    %308 = vector.extract_strided_slice %300 {offsets = [0, 0, 48], sizes = [2, 8, 8], strides = [1, 1, 1]} : vector<2x8x96xf32> to vector<2x8x8xf32>
    %309 = vector.extract_strided_slice %300 {offsets = [0, 0, 56], sizes = [2, 8, 8], strides = [1, 1, 1]} : vector<2x8x96xf32> to vector<2x8x8xf32>
    %310 = tpu.concatenate %306, %307, %308, %309 in 0 : vector<2x8x8xf32>, vector<2x8x8xf32>, vector<2x8x8xf32>, vector<2x8x8xf32> -> vector<8x8x8xf32>
    %311 = vector.extract_strided_slice %300 {offsets = [0, 0, 64], sizes = [2, 8, 8], strides = [1, 1, 1]} : vector<2x8x96xf32> to vector<2x8x8xf32>
    %312 = vector.extract_strided_slice %300 {offsets = [0, 0, 72], sizes = [2, 8, 8], strides = [1, 1, 1]} : vector<2x8x96xf32> to vector<2x8x8xf32>
    %313 = vector.extract_strided_slice %300 {offsets = [0, 0, 80], sizes = [2, 8, 8], strides = [1, 1, 1]} : vector<2x8x96xf32> to vector<2x8x8xf32>
    %314 = vector.extract_strided_slice %300 {offsets = [0, 0, 88], sizes = [2, 8, 8], strides = [1, 1, 1]} : vector<2x8x96xf32> to vector<2x8x8xf32>
    %315 = tpu.concatenate %311, %312, %313, %314 in 0 : vector<2x8x8xf32>, vector<2x8x8xf32>, vector<2x8x8xf32>, vector<2x8x8xf32> -> vector<8x8x8xf32>
    "tpu.trace_start"() <{level = 10 : i32, message = "zqe,zke->zqk"}> : () -> ()
    %cst_104 = arith.constant dense<0.000000e+00> : vector<8x8x8xf32>
    %316 = tpu.matmul %305, %310, %cst_104 {dimension_numbers = #tpu.dot_dimension_numbers<[2], [2], [1], [1], [0, 0, 0, 1, 1, 1], [0], [0]>} : vector<8x8x8xf32>, vector<8x8x8xf32>, vector<8x8x8xf32> -> vector<8x8x8xf32>
    "tpu.trace_stop"() : () -> ()
    %cst_105 = arith.constant 0.353553385 : f32
    %317 = vector.broadcast %cst_105 : f32 to vector<8x8x8xf32>
    %318 = arith.mulf %316, %317 : vector<8x8x8xf32>
    %319 = vector.shape_cast %318 : vector<8x8x8xf32> to vector<4x2x8x8xf32>
    %320 = vector.shape_cast %15 : vector<2x8x8xf32> to vector<1x2x8x8xf32>
    %321 = vector.broadcast %320 : vector<1x2x8x8xf32> to vector<4x2x8x8xf32>
    %322 = arith.addf %319, %321 : vector<4x2x8x8xf32>
    %323 = vector.shape_cast %322 : vector<4x2x8x8xf32> to vector<8x8x8xf32>
    %cst_106 = arith.constant dense<0xFF800000> : vector<8x8xf32>
    %324 = vector.multi_reduction <maximumf>, %323, %cst_106 [2] : vector<8x8x8xf32> to vector<8x8xf32>
    %325 = vector.shape_cast %324 : vector<8x8xf32> to vector<8x8x1xf32>
    %326 = vector.broadcast %325 : vector<8x8x1xf32> to vector<8x8x8xf32>
    %327 = arith.subf %323, %326 : vector<8x8x8xf32>
    %328 = math.exp %327 : vector<8x8x8xf32>
    %cst_107 = arith.constant dense<0.000000e+00> : vector<8x8xf32>
    %329 = vector.multi_reduction <add>, %328, %cst_107 [2] : vector<8x8x8xf32> to vector<8x8xf32>
    %330 = vector.shape_cast %329 : vector<8x8xf32> to vector<8x8x1xf32>
    %331 = tpu.reciprocal %330 {approx = true} : vector<8x8x1xf32> -> vector<8x8x1xf32>
    %332 = vector.broadcast %331 : vector<8x8x1xf32> to vector<8x8x8xf32>
    %333 = arith.mulf %328, %332 : vector<8x8x8xf32>
    "tpu.trace_start"() <{level = 10 : i32, message = "zqk,zke->zqe"}> : () -> ()
    %cst_108 = arith.constant dense<0.000000e+00> : vector<8x8x8xf32>
    %334 = tpu.matmul %333, %315, %cst_108 {dimension_numbers = #tpu.dot_dimension_numbers<[2], [1], [1], [2], [0, 0, 0, 1, 1, 2], [0], [0]>} : vector<8x8x8xf32>, vector<8x8x8xf32>, vector<8x8x8xf32> -> vector<8x8x8xf32>
    "tpu.trace_stop"() : () -> ()
    %335 = vector.extract_strided_slice %334 {offsets = [0, 0, 0], sizes = [2, 8, 8], strides = [1, 1, 1]} : vector<8x8x8xf32> to vector<2x8x8xf32>
    %336 = vector.shape_cast %335 : vector<2x8x8xf32> to vector<16x8xf32>
    %337 = vector.extract_strided_slice %334 {offsets = [2, 0, 0], sizes = [2, 8, 8], strides = [1, 1, 1]} : vector<8x8x8xf32> to vector<2x8x8xf32>
    %338 = vector.shape_cast %337 : vector<2x8x8xf32> to vector<16x8xf32>
    %339 = vector.extract_strided_slice %334 {offsets = [4, 0, 0], sizes = [2, 8, 8], strides = [1, 1, 1]} : vector<8x8x8xf32> to vector<2x8x8xf32>
    %340 = vector.shape_cast %339 : vector<2x8x8xf32> to vector<16x8xf32>
    %341 = vector.extract_strided_slice %334 {offsets = [6, 0, 0], sizes = [2, 8, 8], strides = [1, 1, 1]} : vector<8x8x8xf32> to vector<2x8x8xf32>
    %342 = vector.shape_cast %341 : vector<2x8x8xf32> to vector<16x8xf32>
    %343 = tpu.concatenate %336, %338, %340, %342 in 1 : vector<16x8xf32>, vector<16x8xf32>, vector<16x8xf32>, vector<16x8xf32> -> vector<16x32xf32>
    %344 = arith.truncf %343 : vector<16x32xf32> to vector<16x32xbf16>
    %cst_109 = arith.constant dense<0.000000e+00> : vector<16x32xf32>
    %345 = tpu.matmul %344, %294, %cst_109 {dimension_numbers = #tpu.dot_dimension_numbers<[1], [0], [0], [1], [0, 0, 1, 1], [], []>} : vector<16x32xbf16>, vector<32x32xbf16>, vector<16x32xf32> -> vector<16x32xf32>
    %346 = vector.broadcast %295 : vector<1x32xf32> to vector<16x32xf32>
    %347 = arith.addf %345, %346 : vector<16x32xf32>
    %348 = arith.addf %3, %347 : vector<16x32xf32>
    %c160_110 = arith.constant 160 : index
    %c0_111 = arith.constant 0 : index
    %349 = vector.load %arg5[%c160_110, %c0_111] : memref<360x128xf32, #tpu.memory_space<vmem>>, vector<1x32xf32>
    %c168 = arith.constant 168 : index
    %c0_112 = arith.constant 0 : index
    %350 = vector.load %arg5[%c168, %c0_112] : memref<360x128xf32, #tpu.memory_space<vmem>>, vector<1x32xf32>
    %cst_113 = arith.constant dense<0.000000e+00> : vector<16xf32>
    %351 = vector.multi_reduction <add>, %348, %cst_113 [1] : vector<16x32xf32> to vector<16xf32>
    %352 = vector.shape_cast %351 : vector<16xf32> to vector<16x1xf32>
    %cst_114 = arith.constant 3.200000e+01 : f32
    %353 = vector.broadcast %cst_114 : f32 to vector<16x1xf32>
    %354 = arith.divf %352, %353 : vector<16x1xf32>
    %355 = vector.broadcast %354 : vector<16x1xf32> to vector<16x32xf32>
    %356 = arith.subf %348, %355 : vector<16x32xf32>
    %357 = arith.mulf %356, %356 : vector<16x32xf32>
    %cst_115 = arith.constant dense<0.000000e+00> : vector<16xf32>
    %358 = vector.multi_reduction <add>, %357, %cst_115 [1] : vector<16x32xf32> to vector<16xf32>
    %359 = vector.shape_cast %358 : vector<16xf32> to vector<16x1xf32>
    %cst_116 = arith.constant 3.100000e+01 : f32
    %360 = vector.broadcast %cst_116 : f32 to vector<16x1xf32>
    %361 = arith.divf %359, %360 : vector<16x1xf32>
    %362 = vector.broadcast %349 : vector<1x32xf32> to vector<16x32xf32>
    %363 = arith.mulf %362, %356 : vector<16x32xf32>
    %364 = math.sqrt %361 : vector<16x1xf32>
    %cst_117 = arith.constant 9.99999997E-7 : f32
    %365 = vector.broadcast %cst_117 : f32 to vector<16x1xf32>
    %366 = arith.addf %364, %365 : vector<16x1xf32>
    %367 = vector.broadcast %366 : vector<16x1xf32> to vector<16x32xf32>
    %368 = arith.divf %363, %367 : vector<16x32xf32>
    %369 = vector.broadcast %350 : vector<1x32xf32> to vector<16x32xf32>
    %370 = arith.addf %368, %369 : vector<16x32xf32>
    %c384 = arith.constant 384 : index
    %c0_118 = arith.constant 0 : index
    %371 = vector.load %arg4[%c384, %c0_118] : memref<800x128xbf16, #tpu.memory_space<vmem>>, vector<32x96xbf16>
    %c176 = arith.constant 176 : index
    %c0_119 = arith.constant 0 : index
    %372 = vector.load %arg5[%c176, %c0_119] : memref<360x128xf32, #tpu.memory_space<vmem>>, vector<1x96xf32>
    %c416 = arith.constant 416 : index
    %c0_120 = arith.constant 0 : index
    %373 = vector.load %arg4[%c416, %c0_120] : memref<800x128xbf16, #tpu.memory_space<vmem>>, vector<32x32xbf16>
    %c184 = arith.constant 184 : index
    %c0_121 = arith.constant 0 : index
    %374 = vector.load %arg5[%c184, %c0_121] : memref<360x128xf32, #tpu.memory_space<vmem>>, vector<1x32xf32>
    %375 = arith.truncf %370 : vector<16x32xf32> to vector<16x32xbf16>
    %cst_122 = arith.constant dense<0.000000e+00> : vector<16x96xf32>
    %376 = tpu.matmul %375, %371, %cst_122 {dimension_numbers = #tpu.dot_dimension_numbers<[1], [0], [0], [1], [0, 0, 1, 1], [], []>} : vector<16x32xbf16>, vector<32x96xbf16>, vector<16x96xf32> -> vector<16x96xf32>
    %377 = vector.broadcast %372 : vector<1x96xf32> to vector<16x96xf32>
    %378 = arith.addf %376, %377 : vector<16x96xf32>
    %379 = arith.truncf %269 : vector<16x32xf32> to vector<16x32xbf16>
    %cst_123 = arith.constant dense<0.000000e+00> : vector<16x96xf32>
    %380 = tpu.matmul %379, %371, %cst_123 {dimension_numbers = #tpu.dot_dimension_numbers<[1], [0], [0], [1], [0, 0, 1, 1], [], []>} : vector<16x32xbf16>, vector<32x96xbf16>, vector<16x96xf32> -> vector<16x96xf32>
    %381 = vector.broadcast %372 : vector<1x96xf32> to vector<16x96xf32>
    %382 = arith.addf %380, %381 : vector<16x96xf32>
    %383 = vector.shape_cast %378 : vector<16x96xf32> to vector<2x8x96xf32>
    %384 = vector.shape_cast %382 : vector<16x96xf32> to vector<2x8x96xf32>
    %385 = vector.extract_strided_slice %383 {offsets = [0, 0, 0], sizes = [2, 8, 8], strides = [1, 1, 1]} : vector<2x8x96xf32> to vector<2x8x8xf32>
    %386 = vector.extract_strided_slice %383 {offsets = [0, 0, 8], sizes = [2, 8, 8], strides = [1, 1, 1]} : vector<2x8x96xf32> to vector<2x8x8xf32>
    %387 = vector.extract_strided_slice %383 {offsets = [0, 0, 16], sizes = [2, 8, 8], strides = [1, 1, 1]} : vector<2x8x96xf32> to vector<2x8x8xf32>
    %388 = vector.extract_strided_slice %383 {offsets = [0, 0, 24], sizes = [2, 8, 8], strides = [1, 1, 1]} : vector<2x8x96xf32> to vector<2x8x8xf32>
    %389 = tpu.concatenate %385, %386, %387, %388 in 0 : vector<2x8x8xf32>, vector<2x8x8xf32>, vector<2x8x8xf32>, vector<2x8x8xf32> -> vector<8x8x8xf32>
    %390 = vector.extract_strided_slice %384 {offsets = [0, 0, 32], sizes = [2, 8, 8], strides = [1, 1, 1]} : vector<2x8x96xf32> to vector<2x8x8xf32>
    %391 = vector.extract_strided_slice %384 {offsets = [0, 0, 40], sizes = [2, 8, 8], strides = [1, 1, 1]} : vector<2x8x96xf32> to vector<2x8x8xf32>
    %392 = vector.extract_strided_slice %384 {offsets = [0, 0, 48], sizes = [2, 8, 8], strides = [1, 1, 1]} : vector<2x8x96xf32> to vector<2x8x8xf32>
    %393 = vector.extract_strided_slice %384 {offsets = [0, 0, 56], sizes = [2, 8, 8], strides = [1, 1, 1]} : vector<2x8x96xf32> to vector<2x8x8xf32>
    %394 = tpu.concatenate %390, %391, %392, %393 in 0 : vector<2x8x8xf32>, vector<2x8x8xf32>, vector<2x8x8xf32>, vector<2x8x8xf32> -> vector<8x8x8xf32>
    %395 = vector.extract_strided_slice %384 {offsets = [0, 0, 64], sizes = [2, 8, 8], strides = [1, 1, 1]} : vector<2x8x96xf32> to vector<2x8x8xf32>
    %396 = vector.extract_strided_slice %384 {offsets = [0, 0, 72], sizes = [2, 8, 8], strides = [1, 1, 1]} : vector<2x8x96xf32> to vector<2x8x8xf32>
    %397 = vector.extract_strided_slice %384 {offsets = [0, 0, 80], sizes = [2, 8, 8], strides = [1, 1, 1]} : vector<2x8x96xf32> to vector<2x8x8xf32>
    %398 = vector.extract_strided_slice %384 {offsets = [0, 0, 88], sizes = [2, 8, 8], strides = [1, 1, 1]} : vector<2x8x96xf32> to vector<2x8x8xf32>
    %399 = tpu.concatenate %395, %396, %397, %398 in 0 : vector<2x8x8xf32>, vector<2x8x8xf32>, vector<2x8x8xf32>, vector<2x8x8xf32> -> vector<8x8x8xf32>
    "tpu.trace_start"() <{level = 10 : i32, message = "zqe,zke->zqk"}> : () -> ()
    %cst_124 = arith.constant dense<0.000000e+00> : vector<8x8x8xf32>
    %400 = tpu.matmul %389, %394, %cst_124 {dimension_numbers = #tpu.dot_dimension_numbers<[2], [2], [1], [1], [0, 0, 0, 1, 1, 1], [0], [0]>} : vector<8x8x8xf32>, vector<8x8x8xf32>, vector<8x8x8xf32> -> vector<8x8x8xf32>
    "tpu.trace_stop"() : () -> ()
    %cst_125 = arith.constant 0.353553385 : f32
    %401 = vector.broadcast %cst_125 : f32 to vector<8x8x8xf32>
    %402 = arith.mulf %400, %401 : vector<8x8x8xf32>
    %403 = vector.shape_cast %402 : vector<8x8x8xf32> to vector<4x2x8x8xf32>
    %404 = vector.shape_cast %9 : vector<2x1x8xf32> to vector<1x2x1x8xf32>
    %405 = vector.broadcast %404 : vector<1x2x1x8xf32> to vector<4x2x8x8xf32>
    %406 = arith.addf %403, %405 : vector<4x2x8x8xf32>
    %407 = vector.shape_cast %406 : vector<4x2x8x8xf32> to vector<8x8x8xf32>
    %cst_126 = arith.constant dense<0xFF800000> : vector<8x8xf32>
    %408 = vector.multi_reduction <maximumf>, %407, %cst_126 [2] : vector<8x8x8xf32> to vector<8x8xf32>
    %409 = vector.shape_cast %408 : vector<8x8xf32> to vector<8x8x1xf32>
    %410 = vector.broadcast %409 : vector<8x8x1xf32> to vector<8x8x8xf32>
    %411 = arith.subf %407, %410 : vector<8x8x8xf32>
    %412 = math.exp %411 : vector<8x8x8xf32>
    %cst_127 = arith.constant dense<0.000000e+00> : vector<8x8xf32>
    %413 = vector.multi_reduction <add>, %412, %cst_127 [2] : vector<8x8x8xf32> to vector<8x8xf32>
    %414 = vector.shape_cast %413 : vector<8x8xf32> to vector<8x8x1xf32>
    %415 = tpu.reciprocal %414 {approx = true} : vector<8x8x1xf32> -> vector<8x8x1xf32>
    %416 = vector.broadcast %415 : vector<8x8x1xf32> to vector<8x8x8xf32>
    %417 = arith.mulf %412, %416 : vector<8x8x8xf32>
    "tpu.trace_start"() <{level = 10 : i32, message = "zqk,zke->zqe"}> : () -> ()
    %cst_128 = arith.constant dense<0.000000e+00> : vector<8x8x8xf32>
    %418 = tpu.matmul %417, %399, %cst_128 {dimension_numbers = #tpu.dot_dimension_numbers<[2], [1], [1], [2], [0, 0, 0, 1, 1, 2], [0], [0]>} : vector<8x8x8xf32>, vector<8x8x8xf32>, vector<8x8x8xf32> -> vector<8x8x8xf32>
    "tpu.trace_stop"() : () -> ()
    %419 = vector.extract_strided_slice %418 {offsets = [0, 0, 0], sizes = [2, 8, 8], strides = [1, 1, 1]} : vector<8x8x8xf32> to vector<2x8x8xf32>
    %420 = vector.shape_cast %419 : vector<2x8x8xf32> to vector<16x8xf32>
    %421 = vector.extract_strided_slice %418 {offsets = [2, 0, 0], sizes = [2, 8, 8], strides = [1, 1, 1]} : vector<8x8x8xf32> to vector<2x8x8xf32>
    %422 = vector.shape_cast %421 : vector<2x8x8xf32> to vector<16x8xf32>
    %423 = vector.extract_strided_slice %418 {offsets = [4, 0, 0], sizes = [2, 8, 8], strides = [1, 1, 1]} : vector<8x8x8xf32> to vector<2x8x8xf32>
    %424 = vector.shape_cast %423 : vector<2x8x8xf32> to vector<16x8xf32>
    %425 = vector.extract_strided_slice %418 {offsets = [6, 0, 0], sizes = [2, 8, 8], strides = [1, 1, 1]} : vector<8x8x8xf32> to vector<2x8x8xf32>
    %426 = vector.shape_cast %425 : vector<2x8x8xf32> to vector<16x8xf32>
    %427 = tpu.concatenate %420, %422, %424, %426 in 1 : vector<16x8xf32>, vector<16x8xf32>, vector<16x8xf32>, vector<16x8xf32> -> vector<16x32xf32>
    %428 = arith.truncf %427 : vector<16x32xf32> to vector<16x32xbf16>
    %cst_129 = arith.constant dense<0.000000e+00> : vector<16x32xf32>
    %429 = tpu.matmul %428, %373, %cst_129 {dimension_numbers = #tpu.dot_dimension_numbers<[1], [0], [0], [1], [0, 0, 1, 1], [], []>} : vector<16x32xbf16>, vector<32x32xbf16>, vector<16x32xf32> -> vector<16x32xf32>
    %430 = vector.broadcast %374 : vector<1x32xf32> to vector<16x32xf32>
    %431 = arith.addf %429, %430 : vector<16x32xf32>
    %432 = arith.addf %348, %431 : vector<16x32xf32>
    %c192_130 = arith.constant 192 : index
    %c0_131 = arith.constant 0 : index
    %433 = vector.load %arg5[%c192_130, %c0_131] : memref<360x128xf32, #tpu.memory_space<vmem>>, vector<1x32xf32>
    %c200 = arith.constant 200 : index
    %c0_132 = arith.constant 0 : index
    %434 = vector.load %arg5[%c200, %c0_132] : memref<360x128xf32, #tpu.memory_space<vmem>>, vector<1x32xf32>
    %cst_133 = arith.constant dense<0.000000e+00> : vector<16xf32>
    %435 = vector.multi_reduction <add>, %432, %cst_133 [1] : vector<16x32xf32> to vector<16xf32>
    %436 = vector.shape_cast %435 : vector<16xf32> to vector<16x1xf32>
    %cst_134 = arith.constant 3.200000e+01 : f32
    %437 = vector.broadcast %cst_134 : f32 to vector<16x1xf32>
    %438 = arith.divf %436, %437 : vector<16x1xf32>
    %439 = vector.broadcast %438 : vector<16x1xf32> to vector<16x32xf32>
    %440 = arith.subf %432, %439 : vector<16x32xf32>
    %441 = arith.mulf %440, %440 : vector<16x32xf32>
    %cst_135 = arith.constant dense<0.000000e+00> : vector<16xf32>
    %442 = vector.multi_reduction <add>, %441, %cst_135 [1] : vector<16x32xf32> to vector<16xf32>
    %443 = vector.shape_cast %442 : vector<16xf32> to vector<16x1xf32>
    %cst_136 = arith.constant 3.100000e+01 : f32
    %444 = vector.broadcast %cst_136 : f32 to vector<16x1xf32>
    %445 = arith.divf %443, %444 : vector<16x1xf32>
    %446 = vector.broadcast %433 : vector<1x32xf32> to vector<16x32xf32>
    %447 = arith.mulf %446, %440 : vector<16x32xf32>
    %448 = math.sqrt %445 : vector<16x1xf32>
    %cst_137 = arith.constant 9.99999997E-7 : f32
    %449 = vector.broadcast %cst_137 : f32 to vector<16x1xf32>
    %450 = arith.addf %448, %449 : vector<16x1xf32>
    %451 = vector.broadcast %450 : vector<16x1xf32> to vector<16x32xf32>
    %452 = arith.divf %447, %451 : vector<16x32xf32>
    %453 = vector.broadcast %434 : vector<1x32xf32> to vector<16x32xf32>
    %454 = arith.addf %452, %453 : vector<16x32xf32>
    %c448 = arith.constant 448 : index
    %c0_138 = arith.constant 0 : index
    %455 = vector.load %arg4[%c448, %c0_138] : memref<800x128xbf16, #tpu.memory_space<vmem>>, vector<32x64xbf16>
    %c208 = arith.constant 208 : index
    %c0_139 = arith.constant 0 : index
    %456 = vector.load %arg5[%c208, %c0_139] : memref<360x128xf32, #tpu.memory_space<vmem>>, vector<1x64xf32>
    %c480 = arith.constant 480 : index
    %c0_140 = arith.constant 0 : index
    %457 = vector.load %arg4[%c480, %c0_140] : memref<800x128xbf16, #tpu.memory_space<vmem>>, vector<64x32xbf16>
    %c216 = arith.constant 216 : index
    %c0_141 = arith.constant 0 : index
    %458 = vector.load %arg5[%c216, %c0_141] : memref<360x128xf32, #tpu.memory_space<vmem>>, vector<1x32xf32>
    %459 = arith.truncf %454 : vector<16x32xf32> to vector<16x32xbf16>
    %cst_142 = arith.constant dense<0.000000e+00> : vector<16x64xf32>
    %460 = tpu.matmul %459, %455, %cst_142 {dimension_numbers = #tpu.dot_dimension_numbers<[1], [0], [0], [1], [0, 0, 1, 1], [], []>} : vector<16x32xbf16>, vector<32x64xbf16>, vector<16x64xf32> -> vector<16x64xf32>
    %461 = vector.broadcast %456 : vector<1x64xf32> to vector<16x64xf32>
    %462 = arith.addf %460, %461 : vector<16x64xf32>
    %cst_143 = arith.constant 0.000000e+00 : f32
    %463 = vector.broadcast %cst_143 : f32 to vector<16x64xf32>
    %464 = arith.maximumf %462, %463 : vector<16x64xf32>
    %465 = arith.truncf %464 : vector<16x64xf32> to vector<16x64xbf16>
    %cst_144 = arith.constant dense<0.000000e+00> : vector<16x32xf32>
    %466 = tpu.matmul %465, %457, %cst_144 {dimension_numbers = #tpu.dot_dimension_numbers<[1], [0], [0], [1], [0, 0, 1, 1], [], []>} : vector<16x64xbf16>, vector<64x32xbf16>, vector<16x32xf32> -> vector<16x32xf32>
    %467 = vector.broadcast %458 : vector<1x32xf32> to vector<16x32xf32>
    %468 = arith.addf %466, %467 : vector<16x32xf32>
    %469 = arith.addf %432, %468 : vector<16x32xf32>
    %c224_145 = arith.constant 224 : index
    %c0_146 = arith.constant 0 : index
    %470 = vector.load %arg5[%c224_145, %c0_146] : memref<360x128xf32, #tpu.memory_space<vmem>>, vector<1x32xf32>
    %c232 = arith.constant 232 : index
    %c0_147 = arith.constant 0 : index
    %471 = vector.load %arg5[%c232, %c0_147] : memref<360x128xf32, #tpu.memory_space<vmem>>, vector<1x32xf32>
    %cst_148 = arith.constant dense<0.000000e+00> : vector<16xf32>
    %472 = vector.multi_reduction <add>, %469, %cst_148 [1] : vector<16x32xf32> to vector<16xf32>
    %473 = vector.shape_cast %472 : vector<16xf32> to vector<16x1xf32>
    %cst_149 = arith.constant 3.200000e+01 : f32
    %474 = vector.broadcast %cst_149 : f32 to vector<16x1xf32>
    %475 = arith.divf %473, %474 : vector<16x1xf32>
    %476 = vector.broadcast %475 : vector<16x1xf32> to vector<16x32xf32>
    %477 = arith.subf %469, %476 : vector<16x32xf32>
    %478 = arith.mulf %477, %477 : vector<16x32xf32>
    %cst_150 = arith.constant dense<0.000000e+00> : vector<16xf32>
    %479 = vector.multi_reduction <add>, %478, %cst_150 [1] : vector<16x32xf32> to vector<16xf32>
    %480 = vector.shape_cast %479 : vector<16xf32> to vector<16x1xf32>
    %cst_151 = arith.constant 3.100000e+01 : f32
    %481 = vector.broadcast %cst_151 : f32 to vector<16x1xf32>
    %482 = arith.divf %480, %481 : vector<16x1xf32>
    %483 = vector.broadcast %470 : vector<1x32xf32> to vector<16x32xf32>
    %484 = arith.mulf %483, %477 : vector<16x32xf32>
    %485 = math.sqrt %482 : vector<16x1xf32>
    %cst_152 = arith.constant 9.99999997E-7 : f32
    %486 = vector.broadcast %cst_152 : f32 to vector<16x1xf32>
    %487 = arith.addf %485, %486 : vector<16x1xf32>
    %488 = vector.broadcast %487 : vector<16x1xf32> to vector<16x32xf32>
    %489 = arith.divf %484, %488 : vector<16x32xf32>
    %490 = vector.broadcast %471 : vector<1x32xf32> to vector<16x32xf32>
    %491 = arith.addf %489, %490 : vector<16x32xf32>
    %c544 = arith.constant 544 : index
    %c0_153 = arith.constant 0 : index
    %492 = vector.load %arg4[%c544, %c0_153] : memref<800x128xbf16, #tpu.memory_space<vmem>>, vector<32x96xbf16>
    %c240 = arith.constant 240 : index
    %c0_154 = arith.constant 0 : index
    %493 = vector.load %arg5[%c240, %c0_154] : memref<360x128xf32, #tpu.memory_space<vmem>>, vector<1x96xf32>
    %c576 = arith.constant 576 : index
    %c0_155 = arith.constant 0 : index
    %494 = vector.load %arg4[%c576, %c0_155] : memref<800x128xbf16, #tpu.memory_space<vmem>>, vector<32x32xbf16>
    %c248 = arith.constant 248 : index
    %c0_156 = arith.constant 0 : index
    %495 = vector.load %arg5[%c248, %c0_156] : memref<360x128xf32, #tpu.memory_space<vmem>>, vector<1x32xf32>
    %496 = arith.truncf %491 : vector<16x32xf32> to vector<16x32xbf16>
    %cst_157 = arith.constant dense<0.000000e+00> : vector<16x96xf32>
    %497 = tpu.matmul %496, %492, %cst_157 {dimension_numbers = #tpu.dot_dimension_numbers<[1], [0], [0], [1], [0, 0, 1, 1], [], []>} : vector<16x32xbf16>, vector<32x96xbf16>, vector<16x96xf32> -> vector<16x96xf32>
    %498 = vector.broadcast %493 : vector<1x96xf32> to vector<16x96xf32>
    %499 = arith.addf %497, %498 : vector<16x96xf32>
    %500 = vector.shape_cast %499 : vector<16x96xf32> to vector<2x8x96xf32>
    %501 = vector.extract_strided_slice %500 {offsets = [0, 0, 0], sizes = [2, 8, 8], strides = [1, 1, 1]} : vector<2x8x96xf32> to vector<2x8x8xf32>
    %502 = vector.extract_strided_slice %500 {offsets = [0, 0, 8], sizes = [2, 8, 8], strides = [1, 1, 1]} : vector<2x8x96xf32> to vector<2x8x8xf32>
    %503 = vector.extract_strided_slice %500 {offsets = [0, 0, 16], sizes = [2, 8, 8], strides = [1, 1, 1]} : vector<2x8x96xf32> to vector<2x8x8xf32>
    %504 = vector.extract_strided_slice %500 {offsets = [0, 0, 24], sizes = [2, 8, 8], strides = [1, 1, 1]} : vector<2x8x96xf32> to vector<2x8x8xf32>
    %505 = tpu.concatenate %501, %502, %503, %504 in 0 : vector<2x8x8xf32>, vector<2x8x8xf32>, vector<2x8x8xf32>, vector<2x8x8xf32> -> vector<8x8x8xf32>
    %506 = vector.extract_strided_slice %500 {offsets = [0, 0, 32], sizes = [2, 8, 8], strides = [1, 1, 1]} : vector<2x8x96xf32> to vector<2x8x8xf32>
    %507 = vector.extract_strided_slice %500 {offsets = [0, 0, 40], sizes = [2, 8, 8], strides = [1, 1, 1]} : vector<2x8x96xf32> to vector<2x8x8xf32>
    %508 = vector.extract_strided_slice %500 {offsets = [0, 0, 48], sizes = [2, 8, 8], strides = [1, 1, 1]} : vector<2x8x96xf32> to vector<2x8x8xf32>
    %509 = vector.extract_strided_slice %500 {offsets = [0, 0, 56], sizes = [2, 8, 8], strides = [1, 1, 1]} : vector<2x8x96xf32> to vector<2x8x8xf32>
    %510 = tpu.concatenate %506, %507, %508, %509 in 0 : vector<2x8x8xf32>, vector<2x8x8xf32>, vector<2x8x8xf32>, vector<2x8x8xf32> -> vector<8x8x8xf32>
    %511 = vector.extract_strided_slice %500 {offsets = [0, 0, 64], sizes = [2, 8, 8], strides = [1, 1, 1]} : vector<2x8x96xf32> to vector<2x8x8xf32>
    %512 = vector.extract_strided_slice %500 {offsets = [0, 0, 72], sizes = [2, 8, 8], strides = [1, 1, 1]} : vector<2x8x96xf32> to vector<2x8x8xf32>
    %513 = vector.extract_strided_slice %500 {offsets = [0, 0, 80], sizes = [2, 8, 8], strides = [1, 1, 1]} : vector<2x8x96xf32> to vector<2x8x8xf32>
    %514 = vector.extract_strided_slice %500 {offsets = [0, 0, 88], sizes = [2, 8, 8], strides = [1, 1, 1]} : vector<2x8x96xf32> to vector<2x8x8xf32>
    %515 = tpu.concatenate %511, %512, %513, %514 in 0 : vector<2x8x8xf32>, vector<2x8x8xf32>, vector<2x8x8xf32>, vector<2x8x8xf32> -> vector<8x8x8xf32>
    "tpu.trace_start"() <{level = 10 : i32, message = "zqe,zke->zqk"}> : () -> ()
    %cst_158 = arith.constant dense<0.000000e+00> : vector<8x8x8xf32>
    %516 = tpu.matmul %505, %510, %cst_158 {dimension_numbers = #tpu.dot_dimension_numbers<[2], [2], [1], [1], [0, 0, 0, 1, 1, 1], [0], [0]>} : vector<8x8x8xf32>, vector<8x8x8xf32>, vector<8x8x8xf32> -> vector<8x8x8xf32>
    "tpu.trace_stop"() : () -> ()
    %cst_159 = arith.constant 0.353553385 : f32
    %517 = vector.broadcast %cst_159 : f32 to vector<8x8x8xf32>
    %518 = arith.mulf %516, %517 : vector<8x8x8xf32>
    %519 = vector.shape_cast %518 : vector<8x8x8xf32> to vector<4x2x8x8xf32>
    %520 = vector.shape_cast %15 : vector<2x8x8xf32> to vector<1x2x8x8xf32>
    %521 = vector.broadcast %520 : vector<1x2x8x8xf32> to vector<4x2x8x8xf32>
    %522 = arith.addf %519, %521 : vector<4x2x8x8xf32>
    %523 = vector.shape_cast %522 : vector<4x2x8x8xf32> to vector<8x8x8xf32>
    %cst_160 = arith.constant dense<0xFF800000> : vector<8x8xf32>
    %524 = vector.multi_reduction <maximumf>, %523, %cst_160 [2] : vector<8x8x8xf32> to vector<8x8xf32>
    %525 = vector.shape_cast %524 : vector<8x8xf32> to vector<8x8x1xf32>
    %526 = vector.broadcast %525 : vector<8x8x1xf32> to vector<8x8x8xf32>
    %527 = arith.subf %523, %526 : vector<8x8x8xf32>
    %528 = math.exp %527 : vector<8x8x8xf32>
    %cst_161 = arith.constant dense<0.000000e+00> : vector<8x8xf32>
    %529 = vector.multi_reduction <add>, %528, %cst_161 [2] : vector<8x8x8xf32> to vector<8x8xf32>
    %530 = vector.shape_cast %529 : vector<8x8xf32> to vector<8x8x1xf32>
    %531 = tpu.reciprocal %530 {approx = true} : vector<8x8x1xf32> -> vector<8x8x1xf32>
    %532 = vector.broadcast %531 : vector<8x8x1xf32> to vector<8x8x8xf32>
    %533 = arith.mulf %528, %532 : vector<8x8x8xf32>
    "tpu.trace_start"() <{level = 10 : i32, message = "zqk,zke->zqe"}> : () -> ()
    %cst_162 = arith.constant dense<0.000000e+00> : vector<8x8x8xf32>
    %534 = tpu.matmul %533, %515, %cst_162 {dimension_numbers = #tpu.dot_dimension_numbers<[2], [1], [1], [2], [0, 0, 0, 1, 1, 2], [0], [0]>} : vector<8x8x8xf32>, vector<8x8x8xf32>, vector<8x8x8xf32> -> vector<8x8x8xf32>
    "tpu.trace_stop"() : () -> ()
    %535 = vector.extract_strided_slice %534 {offsets = [0, 0, 0], sizes = [2, 8, 8], strides = [1, 1, 1]} : vector<8x8x8xf32> to vector<2x8x8xf32>
    %536 = vector.shape_cast %535 : vector<2x8x8xf32> to vector<16x8xf32>
    %537 = vector.extract_strided_slice %534 {offsets = [2, 0, 0], sizes = [2, 8, 8], strides = [1, 1, 1]} : vector<8x8x8xf32> to vector<2x8x8xf32>
    %538 = vector.shape_cast %537 : vector<2x8x8xf32> to vector<16x8xf32>
    %539 = vector.extract_strided_slice %534 {offsets = [4, 0, 0], sizes = [2, 8, 8], strides = [1, 1, 1]} : vector<8x8x8xf32> to vector<2x8x8xf32>
    %540 = vector.shape_cast %539 : vector<2x8x8xf32> to vector<16x8xf32>
    %541 = vector.extract_strided_slice %534 {offsets = [6, 0, 0], sizes = [2, 8, 8], strides = [1, 1, 1]} : vector<8x8x8xf32> to vector<2x8x8xf32>
    %542 = vector.shape_cast %541 : vector<2x8x8xf32> to vector<16x8xf32>
    %543 = tpu.concatenate %536, %538, %540, %542 in 1 : vector<16x8xf32>, vector<16x8xf32>, vector<16x8xf32>, vector<16x8xf32> -> vector<16x32xf32>
    %544 = arith.truncf %543 : vector<16x32xf32> to vector<16x32xbf16>
    %cst_163 = arith.constant dense<0.000000e+00> : vector<16x32xf32>
    %545 = tpu.matmul %544, %494, %cst_163 {dimension_numbers = #tpu.dot_dimension_numbers<[1], [0], [0], [1], [0, 0, 1, 1], [], []>} : vector<16x32xbf16>, vector<32x32xbf16>, vector<16x32xf32> -> vector<16x32xf32>
    %546 = vector.broadcast %495 : vector<1x32xf32> to vector<16x32xf32>
    %547 = arith.addf %545, %546 : vector<16x32xf32>
    %548 = arith.addf %469, %547 : vector<16x32xf32>
    %c256_164 = arith.constant 256 : index
    %c0_165 = arith.constant 0 : index
    %549 = vector.load %arg5[%c256_164, %c0_165] : memref<360x128xf32, #tpu.memory_space<vmem>>, vector<1x32xf32>
    %c264 = arith.constant 264 : index
    %c0_166 = arith.constant 0 : index
    %550 = vector.load %arg5[%c264, %c0_166] : memref<360x128xf32, #tpu.memory_space<vmem>>, vector<1x32xf32>
    %cst_167 = arith.constant dense<0.000000e+00> : vector<16xf32>
    %551 = vector.multi_reduction <add>, %548, %cst_167 [1] : vector<16x32xf32> to vector<16xf32>
    %552 = vector.shape_cast %551 : vector<16xf32> to vector<16x1xf32>
    %cst_168 = arith.constant 3.200000e+01 : f32
    %553 = vector.broadcast %cst_168 : f32 to vector<16x1xf32>
    %554 = arith.divf %552, %553 : vector<16x1xf32>
    %555 = vector.broadcast %554 : vector<16x1xf32> to vector<16x32xf32>
    %556 = arith.subf %548, %555 : vector<16x32xf32>
    %557 = arith.mulf %556, %556 : vector<16x32xf32>
    %cst_169 = arith.constant dense<0.000000e+00> : vector<16xf32>
    %558 = vector.multi_reduction <add>, %557, %cst_169 [1] : vector<16x32xf32> to vector<16xf32>
    %559 = vector.shape_cast %558 : vector<16xf32> to vector<16x1xf32>
    %cst_170 = arith.constant 3.100000e+01 : f32
    %560 = vector.broadcast %cst_170 : f32 to vector<16x1xf32>
    %561 = arith.divf %559, %560 : vector<16x1xf32>
    %562 = vector.broadcast %549 : vector<1x32xf32> to vector<16x32xf32>
    %563 = arith.mulf %562, %556 : vector<16x32xf32>
    %564 = math.sqrt %561 : vector<16x1xf32>
    %cst_171 = arith.constant 9.99999997E-7 : f32
    %565 = vector.broadcast %cst_171 : f32 to vector<16x1xf32>
    %566 = arith.addf %564, %565 : vector<16x1xf32>
    %567 = vector.broadcast %566 : vector<16x1xf32> to vector<16x32xf32>
    %568 = arith.divf %563, %567 : vector<16x32xf32>
    %569 = vector.broadcast %550 : vector<1x32xf32> to vector<16x32xf32>
    %570 = arith.addf %568, %569 : vector<16x32xf32>
    %c608 = arith.constant 608 : index
    %c0_172 = arith.constant 0 : index
    %571 = vector.load %arg4[%c608, %c0_172] : memref<800x128xbf16, #tpu.memory_space<vmem>>, vector<32x96xbf16>
    %c272 = arith.constant 272 : index
    %c0_173 = arith.constant 0 : index
    %572 = vector.load %arg5[%c272, %c0_173] : memref<360x128xf32, #tpu.memory_space<vmem>>, vector<1x96xf32>
    %c640 = arith.constant 640 : index
    %c0_174 = arith.constant 0 : index
    %573 = vector.load %arg4[%c640, %c0_174] : memref<800x128xbf16, #tpu.memory_space<vmem>>, vector<32x32xbf16>
    %c280 = arith.constant 280 : index
    %c0_175 = arith.constant 0 : index
    %574 = vector.load %arg5[%c280, %c0_175] : memref<360x128xf32, #tpu.memory_space<vmem>>, vector<1x32xf32>
    %575 = arith.truncf %570 : vector<16x32xf32> to vector<16x32xbf16>
    %cst_176 = arith.constant dense<0.000000e+00> : vector<16x96xf32>
    %576 = tpu.matmul %575, %571, %cst_176 {dimension_numbers = #tpu.dot_dimension_numbers<[1], [0], [0], [1], [0, 0, 1, 1], [], []>} : vector<16x32xbf16>, vector<32x96xbf16>, vector<16x96xf32> -> vector<16x96xf32>
    %577 = vector.broadcast %572 : vector<1x96xf32> to vector<16x96xf32>
    %578 = arith.addf %576, %577 : vector<16x96xf32>
    %579 = arith.truncf %269 : vector<16x32xf32> to vector<16x32xbf16>
    %cst_177 = arith.constant dense<0.000000e+00> : vector<16x96xf32>
    %580 = tpu.matmul %579, %571, %cst_177 {dimension_numbers = #tpu.dot_dimension_numbers<[1], [0], [0], [1], [0, 0, 1, 1], [], []>} : vector<16x32xbf16>, vector<32x96xbf16>, vector<16x96xf32> -> vector<16x96xf32>
    %581 = vector.broadcast %572 : vector<1x96xf32> to vector<16x96xf32>
    %582 = arith.addf %580, %581 : vector<16x96xf32>
    %583 = vector.shape_cast %578 : vector<16x96xf32> to vector<2x8x96xf32>
    %584 = vector.shape_cast %582 : vector<16x96xf32> to vector<2x8x96xf32>
    %585 = vector.extract_strided_slice %583 {offsets = [0, 0, 0], sizes = [2, 8, 8], strides = [1, 1, 1]} : vector<2x8x96xf32> to vector<2x8x8xf32>
    %586 = vector.extract_strided_slice %583 {offsets = [0, 0, 8], sizes = [2, 8, 8], strides = [1, 1, 1]} : vector<2x8x96xf32> to vector<2x8x8xf32>
    %587 = vector.extract_strided_slice %583 {offsets = [0, 0, 16], sizes = [2, 8, 8], strides = [1, 1, 1]} : vector<2x8x96xf32> to vector<2x8x8xf32>
    %588 = vector.extract_strided_slice %583 {offsets = [0, 0, 24], sizes = [2, 8, 8], strides = [1, 1, 1]} : vector<2x8x96xf32> to vector<2x8x8xf32>
    %589 = tpu.concatenate %585, %586, %587, %588 in 0 : vector<2x8x8xf32>, vector<2x8x8xf32>, vector<2x8x8xf32>, vector<2x8x8xf32> -> vector<8x8x8xf32>
    %590 = vector.extract_strided_slice %584 {offsets = [0, 0, 32], sizes = [2, 8, 8], strides = [1, 1, 1]} : vector<2x8x96xf32> to vector<2x8x8xf32>
    %591 = vector.extract_strided_slice %584 {offsets = [0, 0, 40], sizes = [2, 8, 8], strides = [1, 1, 1]} : vector<2x8x96xf32> to vector<2x8x8xf32>
    %592 = vector.extract_strided_slice %584 {offsets = [0, 0, 48], sizes = [2, 8, 8], strides = [1, 1, 1]} : vector<2x8x96xf32> to vector<2x8x8xf32>
    %593 = vector.extract_strided_slice %584 {offsets = [0, 0, 56], sizes = [2, 8, 8], strides = [1, 1, 1]} : vector<2x8x96xf32> to vector<2x8x8xf32>
    %594 = tpu.concatenate %590, %591, %592, %593 in 0 : vector<2x8x8xf32>, vector<2x8x8xf32>, vector<2x8x8xf32>, vector<2x8x8xf32> -> vector<8x8x8xf32>
    %595 = vector.extract_strided_slice %584 {offsets = [0, 0, 64], sizes = [2, 8, 8], strides = [1, 1, 1]} : vector<2x8x96xf32> to vector<2x8x8xf32>
    %596 = vector.extract_strided_slice %584 {offsets = [0, 0, 72], sizes = [2, 8, 8], strides = [1, 1, 1]} : vector<2x8x96xf32> to vector<2x8x8xf32>
    %597 = vector.extract_strided_slice %584 {offsets = [0, 0, 80], sizes = [2, 8, 8], strides = [1, 1, 1]} : vector<2x8x96xf32> to vector<2x8x8xf32>
    %598 = vector.extract_strided_slice %584 {offsets = [0, 0, 88], sizes = [2, 8, 8], strides = [1, 1, 1]} : vector<2x8x96xf32> to vector<2x8x8xf32>
    %599 = tpu.concatenate %595, %596, %597, %598 in 0 : vector<2x8x8xf32>, vector<2x8x8xf32>, vector<2x8x8xf32>, vector<2x8x8xf32> -> vector<8x8x8xf32>
    "tpu.trace_start"() <{level = 10 : i32, message = "zqe,zke->zqk"}> : () -> ()
    %cst_178 = arith.constant dense<0.000000e+00> : vector<8x8x8xf32>
    %600 = tpu.matmul %589, %594, %cst_178 {dimension_numbers = #tpu.dot_dimension_numbers<[2], [2], [1], [1], [0, 0, 0, 1, 1, 1], [0], [0]>} : vector<8x8x8xf32>, vector<8x8x8xf32>, vector<8x8x8xf32> -> vector<8x8x8xf32>
    "tpu.trace_stop"() : () -> ()
    %cst_179 = arith.constant 0.353553385 : f32
    %601 = vector.broadcast %cst_179 : f32 to vector<8x8x8xf32>
    %602 = arith.mulf %600, %601 : vector<8x8x8xf32>
    %603 = vector.shape_cast %602 : vector<8x8x8xf32> to vector<4x2x8x8xf32>
    %604 = vector.shape_cast %9 : vector<2x1x8xf32> to vector<1x2x1x8xf32>
    %605 = vector.broadcast %604 : vector<1x2x1x8xf32> to vector<4x2x8x8xf32>
    %606 = arith.addf %603, %605 : vector<4x2x8x8xf32>
    %607 = vector.shape_cast %606 : vector<4x2x8x8xf32> to vector<8x8x8xf32>
    %cst_180 = arith.constant dense<0xFF800000> : vector<8x8xf32>
    %608 = vector.multi_reduction <maximumf>, %607, %cst_180 [2] : vector<8x8x8xf32> to vector<8x8xf32>
    %609 = vector.shape_cast %608 : vector<8x8xf32> to vector<8x8x1xf32>
    %610 = vector.broadcast %609 : vector<8x8x1xf32> to vector<8x8x8xf32>
    %611 = arith.subf %607, %610 : vector<8x8x8xf32>
    %612 = math.exp %611 : vector<8x8x8xf32>
    %cst_181 = arith.constant dense<0.000000e+00> : vector<8x8xf32>
    %613 = vector.multi_reduction <add>, %612, %cst_181 [2] : vector<8x8x8xf32> to vector<8x8xf32>
    %614 = vector.shape_cast %613 : vector<8x8xf32> to vector<8x8x1xf32>
    %615 = tpu.reciprocal %614 {approx = true} : vector<8x8x1xf32> -> vector<8x8x1xf32>
    %616 = vector.broadcast %615 : vector<8x8x1xf32> to vector<8x8x8xf32>
    %617 = arith.mulf %612, %616 : vector<8x8x8xf32>
    "tpu.trace_start"() <{level = 10 : i32, message = "zqk,zke->zqe"}> : () -> ()
    %cst_182 = arith.constant dense<0.000000e+00> : vector<8x8x8xf32>
    %618 = tpu.matmul %617, %599, %cst_182 {dimension_numbers = #tpu.dot_dimension_numbers<[2], [1], [1], [2], [0, 0, 0, 1, 1, 2], [0], [0]>} : vector<8x8x8xf32>, vector<8x8x8xf32>, vector<8x8x8xf32> -> vector<8x8x8xf32>
    "tpu.trace_stop"() : () -> ()
    %619 = vector.extract_strided_slice %618 {offsets = [0, 0, 0], sizes = [2, 8, 8], strides = [1, 1, 1]} : vector<8x8x8xf32> to vector<2x8x8xf32>
    %620 = vector.shape_cast %619 : vector<2x8x8xf32> to vector<16x8xf32>
    %621 = vector.extract_strided_slice %618 {offsets = [2, 0, 0], sizes = [2, 8, 8], strides = [1, 1, 1]} : vector<8x8x8xf32> to vector<2x8x8xf32>
    %622 = vector.shape_cast %621 : vector<2x8x8xf32> to vector<16x8xf32>
    %623 = vector.extract_strided_slice %618 {offsets = [4, 0, 0], sizes = [2, 8, 8], strides = [1, 1, 1]} : vector<8x8x8xf32> to vector<2x8x8xf32>
    %624 = vector.shape_cast %623 : vector<2x8x8xf32> to vector<16x8xf32>
    %625 = vector.extract_strided_slice %618 {offsets = [6, 0, 0], sizes = [2, 8, 8], strides = [1, 1, 1]} : vector<8x8x8xf32> to vector<2x8x8xf32>
    %626 = vector.shape_cast %625 : vector<2x8x8xf32> to vector<16x8xf32>
    %627 = tpu.concatenate %620, %622, %624, %626 in 1 : vector<16x8xf32>, vector<16x8xf32>, vector<16x8xf32>, vector<16x8xf32> -> vector<16x32xf32>
    %628 = arith.truncf %627 : vector<16x32xf32> to vector<16x32xbf16>
    %cst_183 = arith.constant dense<0.000000e+00> : vector<16x32xf32>
    %629 = tpu.matmul %628, %573, %cst_183 {dimension_numbers = #tpu.dot_dimension_numbers<[1], [0], [0], [1], [0, 0, 1, 1], [], []>} : vector<16x32xbf16>, vector<32x32xbf16>, vector<16x32xf32> -> vector<16x32xf32>
    %630 = vector.broadcast %574 : vector<1x32xf32> to vector<16x32xf32>
    %631 = arith.addf %629, %630 : vector<16x32xf32>
    %632 = arith.addf %548, %631 : vector<16x32xf32>
    %c288 = arith.constant 288 : index
    %c0_184 = arith.constant 0 : index
    %633 = vector.load %arg5[%c288, %c0_184] : memref<360x128xf32, #tpu.memory_space<vmem>>, vector<1x32xf32>
    %c296 = arith.constant 296 : index
    %c0_185 = arith.constant 0 : index
    %634 = vector.load %arg5[%c296, %c0_185] : memref<360x128xf32, #tpu.memory_space<vmem>>, vector<1x32xf32>
    %cst_186 = arith.constant dense<0.000000e+00> : vector<16xf32>
    %635 = vector.multi_reduction <add>, %632, %cst_186 [1] : vector<16x32xf32> to vector<16xf32>
    %636 = vector.shape_cast %635 : vector<16xf32> to vector<16x1xf32>
    %cst_187 = arith.constant 3.200000e+01 : f32
    %637 = vector.broadcast %cst_187 : f32 to vector<16x1xf32>
    %638 = arith.divf %636, %637 : vector<16x1xf32>
    %639 = vector.broadcast %638 : vector<16x1xf32> to vector<16x32xf32>
    %640 = arith.subf %632, %639 : vector<16x32xf32>
    %641 = arith.mulf %640, %640 : vector<16x32xf32>
    %cst_188 = arith.constant dense<0.000000e+00> : vector<16xf32>
    %642 = vector.multi_reduction <add>, %641, %cst_188 [1] : vector<16x32xf32> to vector<16xf32>
    %643 = vector.shape_cast %642 : vector<16xf32> to vector<16x1xf32>
    %cst_189 = arith.constant 3.100000e+01 : f32
    %644 = vector.broadcast %cst_189 : f32 to vector<16x1xf32>
    %645 = arith.divf %643, %644 : vector<16x1xf32>
    %646 = vector.broadcast %633 : vector<1x32xf32> to vector<16x32xf32>
    %647 = arith.mulf %646, %640 : vector<16x32xf32>
    %648 = math.sqrt %645 : vector<16x1xf32>
    %cst_190 = arith.constant 9.99999997E-7 : f32
    %649 = vector.broadcast %cst_190 : f32 to vector<16x1xf32>
    %650 = arith.addf %648, %649 : vector<16x1xf32>
    %651 = vector.broadcast %650 : vector<16x1xf32> to vector<16x32xf32>
    %652 = arith.divf %647, %651 : vector<16x32xf32>
    %653 = vector.broadcast %634 : vector<1x32xf32> to vector<16x32xf32>
    %654 = arith.addf %652, %653 : vector<16x32xf32>
    %c672 = arith.constant 672 : index
    %c0_191 = arith.constant 0 : index
    %655 = vector.load %arg4[%c672, %c0_191] : memref<800x128xbf16, #tpu.memory_space<vmem>>, vector<32x64xbf16>
    %c304 = arith.constant 304 : index
    %c0_192 = arith.constant 0 : index
    %656 = vector.load %arg5[%c304, %c0_192] : memref<360x128xf32, #tpu.memory_space<vmem>>, vector<1x64xf32>
    %c704 = arith.constant 704 : index
    %c0_193 = arith.constant 0 : index
    %657 = vector.load %arg4[%c704, %c0_193] : memref<800x128xbf16, #tpu.memory_space<vmem>>, vector<64x32xbf16>
    %c312 = arith.constant 312 : index
    %c0_194 = arith.constant 0 : index
    %658 = vector.load %arg5[%c312, %c0_194] : memref<360x128xf32, #tpu.memory_space<vmem>>, vector<1x32xf32>
    %659 = arith.truncf %654 : vector<16x32xf32> to vector<16x32xbf16>
    %cst_195 = arith.constant dense<0.000000e+00> : vector<16x64xf32>
    %660 = tpu.matmul %659, %655, %cst_195 {dimension_numbers = #tpu.dot_dimension_numbers<[1], [0], [0], [1], [0, 0, 1, 1], [], []>} : vector<16x32xbf16>, vector<32x64xbf16>, vector<16x64xf32> -> vector<16x64xf32>
    %661 = vector.broadcast %656 : vector<1x64xf32> to vector<16x64xf32>
    %662 = arith.addf %660, %661 : vector<16x64xf32>
    %cst_196 = arith.constant 0.000000e+00 : f32
    %663 = vector.broadcast %cst_196 : f32 to vector<16x64xf32>
    %664 = arith.maximumf %662, %663 : vector<16x64xf32>
    %665 = arith.truncf %664 : vector<16x64xf32> to vector<16x64xbf16>
    %cst_197 = arith.constant dense<0.000000e+00> : vector<16x32xf32>
    %666 = tpu.matmul %665, %657, %cst_197 {dimension_numbers = #tpu.dot_dimension_numbers<[1], [0], [0], [1], [0, 0, 1, 1], [], []>} : vector<16x64xbf16>, vector<64x32xbf16>, vector<16x32xf32> -> vector<16x32xf32>
    %667 = vector.broadcast %658 : vector<1x32xf32> to vector<16x32xf32>
    %668 = arith.addf %666, %667 : vector<16x32xf32>
    %669 = arith.addf %632, %668 : vector<16x32xf32>
    %c336 = arith.constant 336 : index
    %c0_198 = arith.constant 0 : index
    %670 = vector.load %arg5[%c336, %c0_198] : memref<360x128xf32, #tpu.memory_space<vmem>>, vector<1x32xf32>
    %c344 = arith.constant 344 : index
    %c0_199 = arith.constant 0 : index
    %671 = vector.load %arg5[%c344, %c0_199] : memref<360x128xf32, #tpu.memory_space<vmem>>, vector<1x32xf32>
    %cst_200 = arith.constant dense<0.000000e+00> : vector<16xf32>
    %672 = vector.multi_reduction <add>, %669, %cst_200 [1] : vector<16x32xf32> to vector<16xf32>
    %673 = vector.shape_cast %672 : vector<16xf32> to vector<16x1xf32>
    %cst_201 = arith.constant 3.200000e+01 : f32
    %674 = vector.broadcast %cst_201 : f32 to vector<16x1xf32>
    %675 = arith.divf %673, %674 : vector<16x1xf32>
    %676 = vector.broadcast %675 : vector<16x1xf32> to vector<16x32xf32>
    %677 = arith.subf %669, %676 : vector<16x32xf32>
    %678 = arith.mulf %677, %677 : vector<16x32xf32>
    %cst_202 = arith.constant dense<0.000000e+00> : vector<16xf32>
    %679 = vector.multi_reduction <add>, %678, %cst_202 [1] : vector<16x32xf32> to vector<16xf32>
    %680 = vector.shape_cast %679 : vector<16xf32> to vector<16x1xf32>
    %cst_203 = arith.constant 3.100000e+01 : f32
    %681 = vector.broadcast %cst_203 : f32 to vector<16x1xf32>
    %682 = arith.divf %680, %681 : vector<16x1xf32>
    %683 = vector.broadcast %670 : vector<1x32xf32> to vector<16x32xf32>
    %684 = arith.mulf %683, %677 : vector<16x32xf32>
    %685 = math.sqrt %682 : vector<16x1xf32>
    %cst_204 = arith.constant 9.99999997E-7 : f32
    %686 = vector.broadcast %cst_204 : f32 to vector<16x1xf32>
    %687 = arith.addf %685, %686 : vector<16x1xf32>
    %688 = vector.broadcast %687 : vector<16x1xf32> to vector<16x32xf32>
    %689 = arith.divf %684, %688 : vector<16x32xf32>
    %690 = vector.broadcast %671 : vector<1x32xf32> to vector<16x32xf32>
    %691 = arith.addf %689, %690 : vector<16x32xf32>
    %692 = arith.truncf %691 : vector<16x32xf32> to vector<16x32xbf16>
    %c768 = arith.constant 768 : index
    %c0_205 = arith.constant 0 : index
    %693 = vector.load %arg4[%c768, %c0_205] : memref<800x128xbf16, #tpu.memory_space<vmem>>, vector<32x128xbf16>
    %cst_206 = arith.constant dense<0.000000e+00> : vector<16x128xf32>
    %694 = tpu.matmul %692, %693, %cst_206 {dimension_numbers = #tpu.dot_dimension_numbers<[1], [0], [0], [1], [0, 0, 1, 1], [], []>} : vector<16x32xbf16>, vector<32x128xbf16>, vector<16x128xf32> -> vector<16x128xf32>
    %c352_207 = arith.constant 352 : index
    %c0_208 = arith.constant 0 : index
    %695 = vector.load %arg5[%c352_207, %c0_208] : memref<360x128xf32, #tpu.memory_space<vmem>>, vector<1x128xf32>
    %696 = vector.broadcast %695 : vector<1x128xf32> to vector<16x128xf32>
    %697 = arith.addf %694, %696 : vector<16x128xf32>
    %cst_209 = arith.constant dense<0xFF800000> : vector<16xf32>
    %698 = vector.multi_reduction <maximumf>, %697, %cst_209 [1] : vector<16x128xf32> to vector<16xf32>
    %699 = vector.shape_cast %698 : vector<16xf32> to vector<16x1xf32>
    %700 = vector.broadcast %699 : vector<16x1xf32> to vector<16x128xf32>
    %701 = arith.subf %697, %700 : vector<16x128xf32>
    %702 = math.exp %701 : vector<16x128xf32>
    %cst_210 = arith.constant dense<0.000000e+00> : vector<16xf32>
    %703 = vector.multi_reduction <add>, %702, %cst_210 [1] : vector<16x128xf32> to vector<16xf32>
    %704 = vector.shape_cast %703 : vector<16xf32> to vector<16x1xf32>
    %705 = math.log %704 : vector<16x1xf32>
    %706 = vector.broadcast %705 : vector<16x1xf32> to vector<16x128xf32>
    %707 = arith.subf %701, %706 : vector<16x128xf32>
    %708 = vector.shape_cast %707 : vector<16x128xf32> to vector<2x8x128xf32>
    %c0_211 = arith.constant 0 : index
    %c0_212 = arith.constant 0 : index
    %c0_213 = arith.constant 0 : index
    %709 = vector.load %arg6[%c0_211, %c0_212, %c0_213] : memref<2x8x128xf32, #tpu.memory_space<vmem>>, vector<2x8x128xf32>
    tpu.vector_store %arg6[%c0_211, %c0_212, %c0_213], %708 {strides = array<i32>} : memref<2x8x128xf32, #tpu.memory_space<vmem>>, vector<2x8x128xf32>,
    return
  }
}

</mosaic_0001>

<bundles_post_ra>
// kernel: encoder_decoder_forward.1
= control target key start
LH: loop header
LB: loop body
LE: loop exit
PB: predicated region body
PF: predicated region fallthrough
CT: control target
= control target key end

     0   :  { %11 = vsyncpa [#allocation3], 0  ;;  %s13864_s0 = inlined_call_operand.vmem [shape: f32[2,8,32], index: 0, kind: input, shape index: {}]   ;;  %s13865_s1 = inlined_call_operand.vmem [shape: f32[2,8,32], index: 1, kind: input, shape index: {}]   ;;  %s13866_s2 = inlined_call_operand.vmem [shape: s32[2,1,8], index: 2, kind: input, shape index: {}]   ;;  %s13867_s3 = inlined_call_operand.vmem [shape: s32[2,8,8], index: 3, kind: input, shape index: {}]   ;;  %s13868_s4 = inlined_call_operand.hbm [shape: bf16[800,128], index: 4, kind: input, shape index: {}]   ;;  %s13869_s5 = inlined_call_operand.hbm [shape: f32[360,128], index: 5, kind: input, shape index: {}]   ;;  %s13870_s6 = inlined_call_operand.hbm [shape: f32[2,8,128], index: 6, kind: output, shape index: {}]  }
   0x1   :  { %12 = vsyncpa [#allocation6], 0 }
   0x2   :  { %13 = vsyncpa [#allocation4], 0  ;;  %s12286_s21 = smov [#allocation2]   ;;  %s12214_s25 = scalar_lea.hbm %s13868_s4, 6400 }
   0x3   :  { %s27_s22 = sshll.u32 %s12286_s21, 4  ;;  %p12215_p0 = scmp.ne.s32.totalorder %s13868_s4, %s12214_s25  ;;  %s28_s22 = int_to_ptr.vmem [resolvable:$true] %s27_s22 }
   0x4   :  { %p12218_p1 = scmp.lt.u32.totalorder %s12214_s25, %s13868_s4 }
   0x6   :  { %p12220_p2 = pnand %p12218_p1, %p12215_p0 }
   0x8   :  { %12223 = shalt.err (!%p12220_p2)
}
   0x9   :  { %s12224_s30 = scalar_lea.vmem %s28_s22, 6400  ;;  %p12229_p4 = scmp.lt.s32.totalorder %s28_s22, %s28_s22 }
   0xa   :  { %p12225_p3 = scmp.ne.s32.totalorder %s28_s22, %s12224_s30  ;;  %p12230_p5 = scmp.lt.s32.totalorder %s12224_s30, %s12224_s30 }
   0xc   :  { %p12231_p6 = por %p12230_p5, %p12229_p4 }
   0xe   :  { %p12232_p7 = pnand %p12231_p6, %p12225_p3 }
  0x10   :  { %12235 = shalt.err (!%p12232_p7)
}
  0x11   :  { %s12287_s7 = smov 64   ;;  %s12288_s8 = smov 4  }
  0x12   :  { %33 = dma.hbm_to_vmem [thread:$0]  %s13868_s4, 6400, %s28_s22, [#allocation3], %s12287_s7, %s12287_s7, %s12288_s8  }
  0x13   :  { %s12289_s11 = smov [#allocation5]   ;;  %s12236_s15 = scalar_lea.hbm %s13869_s5, 5760 }
  0x14   :  { %s39_s12 = sshll.u32 %s12289_s11, 4  ;;  %p12237_p8 = scmp.ne.s32.totalorder %s13869_s5, %s12236_s15  ;;  %s40_s12 = int_to_ptr.vmem [resolvable:$true] %s39_s12 }
  0x15   :  { %p12240_p9 = scmp.lt.u32.totalorder %s12236_s15, %s13869_s5 }
  0x17   :  { %p12242_p10 = pnand %p12240_p9, %p12237_p8 }
  0x19   :  { %12245 = shalt.err (!%p12242_p10)
}
  0x1a   :  { %s12246_s20 = scalar_lea.vmem %s40_s12, 5760  ;;  %p12251_p12 = scmp.lt.s32.totalorder %s40_s12, %s40_s12 }
  0x1b   :  { %p12247_p11 = scmp.ne.s32.totalorder %s40_s12, %s12246_s20  ;;  %p12252_p13 = scmp.lt.s32.totalorder %s12246_s20, %s12246_s20 }
  0x1d   :  { %p12253_p0 = por %p12252_p13, %p12251_p12 }
  0x1f   :  { %p12254_p1 = pnand %p12253_p0, %p12247_p11 }
  0x21   :  { %12257 = shalt.err (!%p12254_p1)
}
  0x22   :  { %s12290_s4 = smov 128   ;;  %s12291_s21 = smov 8  }
  0x23   :  { %45 = dma.hbm_to_vmem [thread:$0]  %s13869_s5, 5760, %s40_s12, [#allocation6], %s12290_s4, %s12290_s4, %s12291_s21  }
  0x24   :  { %12280 = dma.done.wait [#allocation3], 6400  }
  0x25   :  { %12281 = vsyncadd [#allocation3], 4294960896 }
  0x26   :  { %12282 = dma.done.wait [#allocation6], 5760  }
  0x27   :  { %12283 = vsyncadd [#allocation6], 4294961536  ;;  %vm71_vm0 = vcmask 261120   ;;  %v12368_v0 = vld [vmem:[%s13864_s0] sm:$0xff]  ;;  %v12373_v1 = vld [vmem:[%s13864_s0 + $0x8] sm:$0xff]  ;;  %v12292_v15 = vmov 0.0  }
  0x28   :  { %v72_v2 = vsel %vm71_vm0, %v12368_v0, 0.0  ;;  %v75_v3 = vsel %vm71_vm0, %v12373_v1, 0.0  ;;  %v11868_v14 = vld [vmem:[#allocation2] sm:$0xff]   ;;  %11083 = vmatprep.subr.bf16.mxu0 %v12292_v15  ;;  %vm12293_vm1 = vmmov 0   ;;  %v11869_v16 = vld [vmem:[#allocation2 + $0x8] sm:$0xff]   ;;  %11091 = vmatprep.subr.mxu1 %v12292_v15  ;;  %s12294_s0 = smov 112  }
  0x29   :  { %73 = vadd.xlane.f32.xlu0 %v72_v2  ;;  %11087 = vmatprep.mubr.msk.bf16.mxu0 %vm12293_vm1, %v12292_v15  ;;  %v10552_v33 = vld [vmem:[#allocation5] ss:$0 sm:$0xff]  ;;  %v10553_v39 = vld [vmem:[#allocation5 + $0x8] ss:$0 sm:$0xff]  ;;  %v10554_v44 = vld [vmem:[#allocation5 + $0x10] ss:$0 sm:$0xff] }
  0x2a   :  { %11084 = vmatpush3.bf16.msra.mxu0 %v11868_v14  ;;  %11093 = vmatprep.mubr.msk.f32.mxu1 %vm12293_vm1, %v12292_v15  ;;  %s12295_s5 = smov 120   ;;  %s12296_s28 = smov 104   ;;  %vm213_vm6 = vcmask 64512   ;;  %vm1570_vm9 = vcmask 130048   ;;  %vm1573_vm10 = vcmask 195584   ;;  %vm1799_vm15 = vcmask 523264  }
  0x2b   :  { %11085 = vmatprep.subr.bf16.mxu0 %v12292_v15  ;;  %s12297_s29 = smov 96   ;;  %s12299_s11 = smov 24  }
  0x2d   :  { %76 = vadd.xlane.f32.xlu0 %v75_v3  ;;  %v830_v3 = vlaneseq }
  0x2e   :  { %11086 = vmatpush3.bf16.msra.mxu0 %v11869_v16 }
  0x2f   :  { %11106 = vmatprep.subr.mxu0 %v12292_v15 }
  0xb6   :  { %v74_v4 = vpop.xlane.xlu0 %73 }
  0xb7   :  { %v79_v5 = vmul.f32 0.03125, %v74_v4  ;;  %v57_v4 = vld [vmem:[%s13866_s2] sm:$0x1] }
  0xb8   :  { %vm59_vm7 = vcmp.eq.s32.totalorder %v57_v4, 0 }
  0xb9   :  { %v81_v6 = vsub.f32 %v12368_v0, %v79_v5  ;;  %v831_v5 = vshrl.u32 %v830_v3, 7 }
  0xba   :  { %v77_v7 = vpop.xlane.xlu0 %76 }
  0xbb   :  { %v80_v8 = vmul.f32 0.03125, %v77_v7  ;;  %v83_v9 = vmul.f32 %v81_v6, %v81_v6  ;;  %v98_v35 = vmul.f32 %v10552_v33, %v81_v6  ;;  %v832_v6 = vsub.s32 0, %v831_v5 }
  0xbc   :  { %v61_v7 = vsel %vm59_vm7, -1e+09, %v12292_v15 }
  0xbd   :  { %v82_v10 = vsub.f32 %v12373_v1, %v80_v8  ;;  %v85_v11 = vsel %vm71_vm0, %v83_v9, 0.0  ;;  %v58_v8 = vld [vmem:[%s13866_s2 + $0x1] sm:$0x1]  ;;  %v12493_v9 = vrot.slane %v61_v7, %v832_v6  ;;  %s12298_s2 = smov 16  }
  0xbe   :  { %86 = vadd.xlane.f32.xlu1 %v85_v11  ;;  %vm60_vm8 = vcmp.eq.s32.totalorder %v58_v8, 0 }
  0xbf   :  { %v84_v12 = vmul.f32 %v82_v10, %v82_v10  ;;  %v99_v36 = vmul.f32 %v10552_v33, %v82_v10  ;;  %v62_v14 = vsel %vm60_vm8, -1e+09, %v12292_v15 }
  0xc1   :  { %v88_v13 = vsel %vm71_vm0, %v84_v12, 0.0 }
  0xc2   :  { %89 = vadd.xlane.f32.xlu1 %v88_v13 }
 0x14b   :  { %v87_v17 = vpop.xlane.xlu1 %86 }
 0x14c   :  { %v92_v18 = vmul.f32 0.032258064, %v87_v17  ;;  %v12498_v17 = vrot.slane %v62_v14, %v832_v6 }
 0x14e   :  { %11918 = vrsqrt.f32 %v92_v18  ;;  %vm102_vm2 = vcmp.eq.f32.partialorder %v92_v18, inf  ;;  %v105_v23 = vand.u32 2147483648, %v92_v18  ;;  %vm104_vm3 = vcmp.eq.f32.partialorder %v92_v18, 0.0 }
 0x14f   :  { %v90_v19 = vpop.xlane.xlu1 %89 }
 0x150   :  { %v93_v20 = vmul.f32 0.032258064, %v90_v19 }
 0x152   :  { %11920 = vrsqrt.f32 %v93_v20  ;;  %vm109_vm4 = vcmp.eq.f32.partialorder %v93_v20, inf  ;;  %v112_v29 = vand.u32 2147483648, %v93_v20  ;;  %vm111_vm5 = vcmp.eq.f32.partialorder %v93_v20, 0.0 }
 0x158   :  { %v11919_v21 = vpop.eup %11918 }
 0x159   :  { %v101_v22 = vmul.f32 %v11919_v21, %v92_v18 }
 0x15b   :  { %v103_v24 = vsel %vm102_vm2, %v92_v18, %v101_v22 }
 0x15c   :  { %v11921_v25 = vpop.eup %11920  ;;  %v106_v26 = vsel %vm104_vm3, %v105_v23, %v103_v24 }
 0x15d   :  { %v114_v27 = vadd.f32 1e-06, %v106_v26  ;;  %v108_v28 = vmul.f32 %v11921_v25, %v93_v20 }
 0x15f   :  { %v110_v30 = vsel %vm109_vm4, %v93_v20, %v108_v28  ;;  %11922 = vrcp.f32 %v114_v27 }
 0x160   :  { %v113_v31 = vsel %vm111_vm5, %v112_v29, %v110_v30 }
 0x161   :  { %v115_v32 = vadd.f32 1e-06, %v113_v31 }
 0x163   :  { %11924 = vrcp.f32 %v115_v32 }
 0x169   :  { %v11923_v34 = vpop.eup %11922 }
 0x16a   :  { %v117_v37 = vmul.f32 %v11923_v34, %v98_v35 }
 0x16c   :  { %v124_v41 = vadd.f32 %v10553_v39, %v117_v37 }
 0x16d   :  { %v11925_v38 = vpop.eup %11924 }
 0x16e   :  { %v119_v40 = vmul.f32 %v11925_v38, %v99_v36 }
 0x170   :  { %v125_v42 = vadd.f32 %v10553_v39, %v119_v40 }
 0x172   :  { %v136_v43 = vpack.c.bf16 %v125_v42, %v124_v41 }
 0x174   :  { %11088 = vmatmul.mubr.msk.bf16.vlgmr.msra.gmra.mrb[0].mxu0 %vm71_vm0, %v136_v43 }
 0x175   :  { %11108 = vmatprep.mubr.msk.f32.mxu0 %vm12293_vm1, %v12292_v15 }
 0x247   :  { %v190_v45 = vpop.f32.mrb[0].mxu0 }
 0x248   :  { %v12394_v46 = vadd.f32 %v10554_v44, %v190_v45  ;;  %v11089_v47 = vpop.f32.mrb[1].mxu0 }
 0x249   :  { %v193_v48 = vpop.f32.mrb[2].mxu0 }
 0x24a   :  { %203 = vrot.lane.b32.xlu1 %v12394_v46, %s12294_s0  ;;  %199 = vrot.lane.b32.xlu0 %v12394_v46, %s12295_s5  ;;  %v11090_v49 = vpop.f32.mrb[3].mxu0  ;;  %v12400_v50 = vadd.f32 %v10554_v44, %v193_v48 }
 0x24e   :  { %207 = vrot.lane.b32.xlu0 %v12394_v46, %s12296_s28  ;;  %201 = vrot.lane.b32.xlu1 %v12400_v50, %s12295_s5 }
 0x252   :  { %211 = vrot.lane.b32.xlu0 %v12394_v46, %s12297_s29  ;;  %205 = vrot.lane.b32.xlu1 %v12400_v50, %s12294_s0 }
 0x256   :  { %209 = vrot.lane.b32.xlu1 %v12400_v50, %s12296_s28 }
 0x25a   :  { %288 = vrot.lane.b32.xlu1 %v12400_v50, %s12297_s29 }
 0x2bc   :  { %v12414_v51 = vpop.permute.xlu1 %203  ;;  %v12416_v52 = vpop.permute.xlu0 %199 }
 0x2bd   :  { %364 = vrot.lane.b32.xlu0 %v12416_v52, %s12297_s29 }
 0x2c0   :  { %v12420_v53 = vpop.permute.xlu0 %207  ;;  %v12422_v54 = vpop.permute.xlu1 %201 }
 0x2c1   :  { %516 = vrot.lane.b32.xlu0 %v12414_v51, %s12297_s29  ;;  %440 = vrot.lane.b32.xlu1 %v12422_v54, %s12297_s29 }
 0x2c4   :  { %v212_v55 = vpop.permute.xlu0 %211  ;;  %v12428_v56 = vpop.permute.xlu1 %205 }
 0x2c5   :  { %668 = vrot.lane.b32.xlu0 %v12420_v53, %s12297_s29  ;;  %11092 = vmatpush3.xpose.msk.msra.mxu1 %vm213_vm6, %v212_v55 }
 0x2c6   :  { %592 = vrot.lane.b32.xlu1 %v12428_v56, %s12297_s29  ;;  %11096 = vmatprep.subr.mxu1 %v12292_v15 }
 0x2c8   :  { %11094 = vmatmul.mubr.msk.f32.vlgmr.msra.gmra.mrb[0].mxu1 %vm213_vm6, %v12394_v46  ;;  %v12438_v57 = vpop.permute.xlu1 %209 }
 0x2c9   :  { %11098 = vmatprep.mubr.msk.f32.mxu1 %vm12293_vm1, %v12292_v15 }
 0x2ca   :  { %744 = vrot.lane.b32.xlu1 %v12438_v57, %s12297_s29 }
 0x2cc   :  { %v289_v58 = vpop.permute.xlu1 %288 }
 0x2cd   :  { %11097 = vmatpush3.xpose.msk.msra.mxu1 %vm213_vm6, %v289_v58 }
 0x2ce   :  { %11101 = vmatprep.subr.mxu1 %v12292_v15 }
 0x2d0   :  { %11099 = vmatmul.mubr.msk.f32.vlgmr.msra.gmra.mrb[2].mxu1 %vm213_vm6, %v12400_v50 }
 0x2d1   :  { %11103 = vmatprep.mubr.msk.f32.mxu1 %vm12293_vm1, %v12292_v15 }
 0x32f   :  { %v365_v59 = vpop.permute.xlu0 %364 }
 0x330   :  { %11102 = vmatpush3.xpose.msk.msra.mxu1 %vm213_vm6, %v365_v59 }
 0x331   :  { %11111 = vmatprep.subr.mxu1 %v12292_v15 }
 0x333   :  { %v517_v60 = vpop.permute.xlu0 %516  ;;  %11104 = vmatmul.mubr.msk.f32.vlgmr.msra.gmra.mrb[4].mxu1 %vm213_vm6, %v12416_v52  ;;  %v441_v61 = vpop.permute.xlu1 %440 }
 0x334   :  { %11107 = vmatpush3.xpose.msk.msra.mxu0 %vm213_vm6, %v441_v61  ;;  %11112 = vmatpush3.xpose.msk.msra.mxu1 %vm213_vm6, %v517_v60 }
 0x335   :  { %11113 = vmatprep.mubr.msk.f32.mxu1 %vm12293_vm1, %v12292_v15  ;;  %11116 = vmatprep.subr.mxu0 %v12292_v15 }
 0x336   :  { %11121 = vmatprep.subr.mxu1 %v12292_v15 }
 0x337   :  { %v669_v62 = vpop.permute.xlu0 %668  ;;  %11109 = vmatmul.mubr.msk.f32.vlgmr.msra.gmra.mrb[4].mxu0 %vm213_vm6, %v12422_v54  ;;  %11114 = vmatmul.mubr.msk.f32.vlgmr.msra.gmra.mrb[6].mxu1 %vm213_vm6, %v12414_v51 }
 0x338   :  { %v593_v63 = vpop.permute.xlu1 %592  ;;  %11122 = vmatpush3.xpose.msk.msra.mxu1 %vm213_vm6, %v669_v62  ;;  %11118 = vmatprep.mubr.msk.f32.mxu0 %vm12293_vm1, %v12292_v15 }
 0x339   :  { %11117 = vmatpush3.xpose.msk.msra.mxu0 %vm213_vm6, %v593_v63  ;;  %11123 = vmatprep.mubr.msk.f32.mxu1 %vm12293_vm1, %v12292_v15 }
 0x33a   :  { %11126 = vmatprep.subr.mxu0 %v12292_v15  ;;  %11131 = vmatprep.subr.mxu1 %v12292_v15 }
 0x33b   :  { %11124 = vmatmul.mubr.msk.f32.vlgmr.msra.gmra.mrb[8].mxu1 %vm213_vm6, %v12420_v53 }
 0x33c   :  { %11119 = vmatmul.mubr.msk.f32.vlgmr.msra.gmra.mrb[6].mxu0 %vm213_vm6, %v12428_v56  ;;  %v745_v2 = vpop.permute.xlu1 %744  ;;  %11133 = vmatprep.mubr.msk.f32.mxu1 %vm12293_vm1, %v12292_v15 }
 0x33d   :  { %11127 = vmatpush3.xpose.msk.msra.mxu0 %vm213_vm6, %v745_v2  ;;  %11128 = vmatprep.mubr.msk.f32.mxu0 %vm12293_vm1, %v12292_v15 }
 0x33e   :  { %11136 = vmatprep.subr.mxu0 %v12292_v15 }
 0x340   :  { %11129 = vmatmul.mubr.msk.f32.vlgmr.msra.gmra.mrb[8].mxu0 %vm213_vm6, %v12438_v57 }
 0x341   :  { %11138 = vmatprep.mubr.msk.f32.mxu0 %vm12293_vm1, %v12292_v15 }
 0x39b   :  { %v284_v10 = vpop.f32.mrb[0].mxu1 }
 0x39c   :  { %v820_v11 = vmul.f32 0.35355338, %v284_v10  ;;  %v11095_v12 = vpop.f32.mrb[1].mxu1 }
 0x39e   :  { %v840_v13 = vadd.f32 %v12493_v9, %v820_v11 }
 0x3a0   :  { %v848_v16 = vsel %vm213_vm6, %v840_v13, -inf }
 0x3a1   :  { %849 = vmax.xlane.f32.xlu0 %v848_v16 }
 0x3a3   :  { %v360_v18 = vpop.f32.mrb[2].mxu1 }
 0x3a4   :  { %v821_v19 = vmul.f32 0.35355338, %v360_v18  ;;  %v11100_v20 = vpop.f32.mrb[3].mxu1 }
 0x3a6   :  { %v841_v21 = vadd.f32 %v12498_v17, %v821_v19 }
 0x3a8   :  { %v851_v22 = vsel %vm213_vm6, %v841_v21, -inf }
 0x3a9   :  { %852 = vmax.xlane.f32.xlu1 %v851_v22 }
 0x406   :  { %v436_v23 = vpop.f32.mrb[4].mxu1 }
 0x407   :  { %v822_v24 = vmul.f32 0.35355338, %v436_v23  ;;  %v11105_v25 = vpop.f32.mrb[5].mxu1 }
 0x409   :  { %v842_v26 = vadd.f32 %v12493_v9, %v822_v24 }
 0x40a   :  { %v512_v27 = vpop.f32.mrb[4].mxu0  ;;  %v588_v28 = vpop.f32.mrb[6].mxu1 }
 0x40b   :  { %v823_v29 = vmul.f32 0.35355338, %v512_v27  ;;  %v11110_v30 = vpop.f32.mrb[5].mxu0  ;;  %v11115_v31 = vpop.f32.mrb[7].mxu1  ;;  %v824_v32 = vmul.f32 0.35355338, %v588_v28 }
 0x40c   :  { %v854_v33 = vsel %vm213_vm6, %v842_v26, -inf }
 0x40d   :  { %855 = vmax.xlane.f32.xlu0 %v854_v33  ;;  %v843_v34 = vadd.f32 %v12498_v17, %v823_v29  ;;  %v844_v42 = vadd.f32 %v12493_v9, %v824_v32 }
 0x40e   :  { %v740_v35 = vpop.f32.mrb[8].mxu1 }
 0x40f   :  { %v664_v36 = vpop.f32.mrb[6].mxu0  ;;  %v11125_v37 = vpop.f32.mrb[9].mxu1  ;;  %v857_v38 = vsel %vm213_vm6, %v843_v34, -inf  ;;  %v826_v40 = vmul.f32 0.35355338, %v740_v35  ;;  %v860_v48 = vsel %vm213_vm6, %v844_v42, -inf }
 0x410   :  { %v825_v39 = vmul.f32 0.35355338, %v664_v36  ;;  %v11120_v41 = vpop.f32.mrb[7].mxu0 }
 0x411   :  { %858 = vmax.xlane.f32.xlu0 %v857_v38  ;;  %v846_v55 = vadd.f32 %v12493_v9, %v826_v40 }
 0x412   :  { %v845_v43 = vadd.f32 %v12498_v17, %v825_v39 }
 0x413   :  { %v816_v44 = vpop.f32.mrb[8].mxu0  ;;  %v866_v59 = vsel %vm213_vm6, %v846_v55, -inf }
 0x414   :  { %v827_v45 = vmul.f32 0.35355338, %v816_v44  ;;  %v11130_v47 = vpop.f32.mrb[9].mxu0  ;;  %v863_v49 = vsel %vm213_vm6, %v845_v43, -inf }
 0x415   :  { %861 = vmax.xlane.f32.xlu0 %v860_v48  ;;  %864 = vmax.xlane.f32.xlu1 %v863_v49 }
 0x416   :  { %v847_v58 = vadd.f32 %v12498_v17, %v827_v45 }
 0x418   :  { %v869_v60 = vsel %vm213_vm6, %v847_v58, -inf }
 0x419   :  { %867 = vmax.xlane.f32.xlu0 %v866_v59  ;;  %870 = vmax.xlane.f32.xlu1 %v869_v60 }
 0x42a   :  { %1012 = vrot.lane.b32.xlu1 %v12400_v50, %s12287_s7 }
 0x42e   :  { %1088 = vrot.lane.b32.xlu1 %v12416_v52, %s12287_s7  ;;  %v850_v61 = vpop.xlane.xlu0 %849 }
 0x42f   :  { %936 = vrot.lane.b32.xlu0 %v12394_v46, %s12287_s7  ;;  %v872_v62 = vsub.f32 %v840_v13, %v850_v61 }
 0x431   :  { %v880_v63 = vmul.f32 1.442695, %v872_v62 }
 0x432   :  { %1164 = vrot.lane.b32.xlu1 %v12422_v54, %s12287_s7 }
 0x433   :  { %1240 = vrot.lane.b32.xlu0 %v12414_v51, %s12287_s7  ;;  %11926 = vpow2.f32 %v880_v63 }
 0x436   :  { %1316 = vrot.lane.b32.xlu1 %v12428_v56, %s12287_s7  ;;  %v853_v2 = vpop.xlane.xlu1 %852 }
 0x437   :  { %v873_v50 = vsub.f32 %v841_v21, %v853_v2 }
 0x439   :  { %v882_v3 = vmul.f32 1.442695, %v873_v50 }
 0x43b   :  { %11928 = vpow2.f32 %v882_v3 }
 0x43d   :  { %v12526_v52 = vpop.eup %11926 }
 0x43e   :  { %v896_v46 = vsel %vm213_vm6, %v12526_v52, 0.0 }
 0x445   :  { %v12530_v54 = vpop.eup %11928 }
 0x446   :  { %v899_v51 = vsel %vm213_vm6, %v12530_v54, 0.0 }
 0x452   :  { %897 = vadd.xlane.f32.xlu0 %v896_v46 }
 0x45a   :  { %900 = vadd.xlane.f32.xlu1 %v899_v51 }
 0x49a   :  { %v856_v56 = vpop.xlane.xlu0 %855 }
 0x49b   :  { %v874_v4 = vsub.f32 %v842_v26, %v856_v56 }
 0x49d   :  { %v884_v5 = vmul.f32 1.442695, %v874_v4 }
 0x49e   :  { %v859_v6 = vpop.xlane.xlu0 %858 }
 0x49f   :  { %11930 = vpow2.f32 %v884_v5  ;;  %v875_v7 = vsub.f32 %v843_v34, %v859_v6 }
 0x4a1   :  { %v886_v8 = vmul.f32 1.442695, %v875_v7 }
 0x4a2   :  { %v862_v10 = vpop.xlane.xlu0 %861  ;;  %v865_v11 = vpop.xlane.xlu1 %864 }
 0x4a3   :  { %11932 = vpow2.f32 %v886_v8  ;;  %v876_v12 = vsub.f32 %v844_v42, %v862_v10  ;;  %v877_v13 = vsub.f32 %v845_v43, %v865_v11 }
 0x4a5   :  { %v888_v14 = vmul.f32 1.442695, %v876_v12  ;;  %v890_v16 = vmul.f32 1.442695, %v877_v13  ;;  %v11870_v12 = vld [vmem:[#allocation2 + $0x10] sm:$0xff]  }
 0x4a6   :  { %v868_v18 = vpop.xlane.xlu0 %867  ;;  %v871_v19 = vpop.xlane.xlu1 %870 }
 0x4a7   :  { %11934 = vpow2.f32 %v888_v14  ;;  %v878_v20 = vsub.f32 %v846_v55, %v868_v18  ;;  %v879_v21 = vsub.f32 %v847_v58, %v871_v19 }
 0x4a8   :  { %11936 = vpow2.f32 %v890_v16  ;;  %v11871_v16 = vld [vmem:[#allocation2 + $0x18] sm:$0xff]  }
 0x4a9   :  { %v11931_v22 = vpop.eup %11930  ;;  %v892_v23 = vmul.f32 1.442695, %v878_v20  ;;  %v894_v24 = vmul.f32 1.442695, %v879_v21 }
 0x4aa   :  { %v937_v25 = vpop.permute.xlu0 %936  ;;  %v1013_v26 = vpop.permute.xlu1 %1012  ;;  %v902_v27 = vsel %vm213_vm6, %v11931_v22, 0.0 }
 0x4ab   :  { %11938 = vpow2.f32 %v892_v23  ;;  %903 = vadd.xlane.f32.xlu0 %v902_v27  ;;  %11132 = vmatpush3.msra.mxu1 %v937_v25 }
 0x4ac   :  { %11940 = vpow2.f32 %v894_v24  ;;  %11137 = vmatpush3.msra.mxu0 %v1013_v26  ;;  %11141 = vmatprep.subr.mxu1 %v12292_v15 }
 0x4ad   :  { %v11933_v28 = vpop.eup %11932  ;;  %11146 = vmatprep.subr.mxu0 %v12292_v15 }
 0x4ae   :  { %v905_v29 = vsel %vm213_vm6, %v11933_v28, 0.0  ;;  %v1089_v38 = vpop.permute.xlu1 %1088  ;;  %v1241_v39 = vpop.permute.xlu0 %1240 }
 0x4af   :  { %906 = vadd.xlane.f32.xlu1 %v905_v29 }
 0x4b1   :  { %v11935_v30 = vpop.eup %11934 }
 0x4b2   :  { %v11937_v31 = vpop.eup %11936  ;;  %v908_v32 = vsel %vm213_vm6, %v11935_v30, 0.0  ;;  %v1165_v40 = vpop.permute.xlu1 %1164 }
 0x4b3   :  { %909 = vadd.xlane.f32.xlu0 %v908_v32  ;;  %v911_v33 = vsel %vm213_vm6, %v11937_v31, 0.0 }
 0x4b4   :  { %912 = vadd.xlane.f32.xlu1 %v911_v33 }
 0x4b5   :  { %v12540_v34 = vpop.eup %11938 }
 0x4b6   :  { %v12542_v35 = vpop.eup %11940  ;;  %v914_v36 = vsel %vm213_vm6, %v12540_v34, 0.0  ;;  %v1317_v42 = vpop.permute.xlu1 %1316 }
 0x4b7   :  { %915 = vadd.xlane.f32.xlu0 %v914_v36  ;;  %v917_v37 = vsel %vm213_vm6, %v12542_v35, 0.0 }
 0x4b8   :  { %918 = vadd.xlane.f32.xlu1 %v917_v37 }
 0x4c9   :  { %1468 = vrot.lane.b32.xlu1 %v12438_v57, %s12287_s7 }
 0x4cd   :  { %1392 = vrot.lane.b32.xlu0 %v12420_v53, %s12287_s7 }
 0x4df   :  { %v898_v41 = vpop.xlane.xlu0 %897 }
 0x4e0   :  { %11942 = vrcp.f32 %v898_v41 }
 0x4e7   :  { %v901_v43 = vpop.xlane.xlu1 %900 }
 0x4e8   :  { %11944 = vrcp.f32 %v901_v43 }
 0x4ea   :  { %v11943_v44 = vpop.eup %11942 }
 0x4eb   :  { %v928_v45 = vmul.f32 %v11943_v44, %v12526_v52 }
 0x4ed   :  { %11134 = vmatmul.mubr.msk.f32.vlgmr.msra.gmra.mrb[10].mxu1 %vm213_vm6, %v928_v45 }
 0x4ee   :  { %11142 = vmatpush3.msra.mxu1 %v1089_v38  ;;  %11143 = vmatprep.mubr.msk.f32.mxu1 %vm12293_vm1, %v12292_v15 }
 0x4ef   :  { %11151 = vmatprep.subr.mxu1 %v12292_v15 }
 0x4f2   :  { %v11945_v53 = vpop.eup %11944 }
 0x4f3   :  { %v929_v57 = vmul.f32 %v11945_v53, %v12530_v54  ;;  %v10582_v53 = vld [vmem:[#allocation5 + $0x18] ss:$0 sm:$0xff] }
 0x4f5   :  { %11139 = vmatmul.mubr.msk.f32.vlgmr.msra.gmra.mrb[10].mxu0 %vm213_vm6, %v929_v57 }
 0x4f6   :  { %11147 = vmatpush3.msra.mxu0 %v1165_v40  ;;  %11148 = vmatprep.mubr.msk.f32.mxu0 %vm12293_vm1, %v12292_v15 }
 0x4f7   :  { %11156 = vmatprep.subr.mxu0 %v12292_v15 }
 0x538   :  { %v904_v47 = vpop.xlane.xlu0 %903 }
 0x539   :  { %11946 = vrcp.f32 %v904_v47 }
 0x53c   :  { %v907_v48 = vpop.xlane.xlu1 %906 }
 0x53d   :  { %11948 = vrcp.f32 %v907_v48 }
 0x540   :  { %v910_v49 = vpop.xlane.xlu0 %909 }
 0x541   :  { %11950 = vrcp.f32 %v910_v49  ;;  %v913_v55 = vpop.xlane.xlu1 %912 }
 0x542   :  { %11952 = vrcp.f32 %v913_v55 }
 0x543   :  { %v11947_v58 = vpop.eup %11946 }
 0x544   :  { %v916_v59 = vpop.xlane.xlu0 %915  ;;  %v930_v60 = vmul.f32 %v11947_v58, %v11931_v22 }
 0x545   :  { %11954 = vrcp.f32 %v916_v59  ;;  %v919_v61 = vpop.xlane.xlu1 %918 }
 0x546   :  { %11956 = vrcp.f32 %v919_v61  ;;  %11144 = vmatmul.mubr.msk.f32.vlgmr.msra.gmra.mrb[12].mxu1 %vm213_vm6, %v930_v60 }
 0x547   :  { %v11949_v62 = vpop.eup %11948  ;;  %11152 = vmatpush3.msra.mxu1 %v1241_v39  ;;  %11153 = vmatprep.mubr.msk.f32.mxu1 %vm12293_vm1, %v12292_v15 }
 0x548   :  { %v931_v63 = vmul.f32 %v11949_v62, %v11933_v28  ;;  %11161 = vmatprep.subr.mxu1 %v12292_v15  ;;  %v1393_v46 = vpop.permute.xlu0 %1392 }
 0x549   :  { %v1469_v51 = vpop.permute.xlu1 %1468 }
 0x54a   :  { %11149 = vmatmul.mubr.msk.f32.vlgmr.msra.gmra.mrb[12].mxu0 %vm213_vm6, %v931_v63 }
 0x54b   :  { %v11951_v2 = vpop.eup %11950  ;;  %11157 = vmatpush3.msra.mxu0 %v1317_v42  ;;  %11158 = vmatprep.mubr.msk.f32.mxu0 %vm12293_vm1, %v12292_v15 }
 0x54c   :  { %v11953_v50 = vpop.eup %11952  ;;  %11166 = vmatprep.subr.mxu0 %v12292_v15  ;;  %v932_v3 = vmul.f32 %v11951_v2, %v11935_v30 }
 0x54d   :  { %v933_v52 = vmul.f32 %v11953_v50, %v11937_v31 }
 0x54e   :  { %11154 = vmatmul.mubr.msk.f32.vlgmr.msra.gmra.mrb[14].mxu1 %vm213_vm6, %v932_v3 }
 0x54f   :  { %v11955_v54 = vpop.eup %11954  ;;  %11159 = vmatmul.mubr.msk.f32.vlgmr.msra.gmra.mrb[14].mxu0 %vm213_vm6, %v933_v52  ;;  %11162 = vmatpush3.msra.mxu1 %v1393_v46 }
 0x550   :  { %v11957_v56 = vpop.eup %11956  ;;  %11167 = vmatpush3.msra.mxu0 %v1469_v51  ;;  %11163 = vmatprep.mubr.msk.f32.mxu1 %vm12293_vm1, %v12292_v15  ;;  %v934_v4 = vmul.f32 %v11955_v54, %v12540_v34 }
 0x551   :  { %11168 = vmatprep.mubr.msk.f32.mxu0 %vm12293_vm1, %v12292_v15  ;;  %v935_v5 = vmul.f32 %v11957_v56, %v12542_v35  ;;  %11171 = vmatprep.subr.bf16.mxu1 %v12292_v15  ;;  %v11872_v56 = vld [vmem:[#allocation2 + $0x20] sm:$0xff]  }
 0x552   :  { %11164 = vmatmul.mubr.msk.f32.vlgmr.msra.gmra.mrb[16].mxu1 %vm213_vm6, %v934_v4  ;;  %11179 = vmatprep.subr.bf16.mxu0 %v12292_v15  ;;  %v11873_v4 = vld [vmem:[#allocation2 + $0x28] sm:$0xff]  }
 0x553   :  { %11169 = vmatmul.mubr.msk.f32.vlgmr.msra.gmra.mrb[16].mxu0 %vm213_vm6, %v935_v5  ;;  %11175 = vmatprep.mubr.msk.bf16.mxu1 %vm12293_vm1, %v12292_v15  ;;  %v11874_v5 = vld [vmem:[#allocation2 + $0x30] sm:$0xff]  }
 0x554   :  { %11183 = vmatprep.mubr.msk.bf16.mxu0 %vm12293_vm1, %v12292_v15  ;;  %11172 = vmatpush3.bf16.msra.mxu1 %v11870_v12 }
 0x555   :  { %11173 = vmatprep.subr.bf16.mxu1 %v12292_v15  ;;  %11180 = vmatpush3.bf16.msra.mxu0 %v11872_v56 }
 0x556   :  { %11181 = vmatprep.subr.bf16.mxu0 %v12292_v15 }
 0x558   :  { %11174 = vmatpush3.bf16.msra.mxu1 %v11871_v16 }
 0x559   :  { %11187 = vmatprep.subr.bf16.mxu1 %v12292_v15  ;;  %11182 = vmatpush3.bf16.msra.mxu0 %v11873_v4 }
 0x55a   :  { %11199 = vmatprep.subr.bf16.mxu0 %v12292_v15 }
 0x5c0   :  { %v1008_v6 = vpop.f32.mrb[10].mxu1 }
 0x5c1   :  { %v11135_v7 = vpop.f32.mrb[11].mxu1 }
 0x5c8   :  { %v1084_v8 = vpop.f32.mrb[10].mxu0 }
 0x5c9   :  { %v11140_v10 = vpop.f32.mrb[11].mxu0 }
 0x619   :  { %v1160_v11 = vpop.f32.mrb[12].mxu1 }
 0x61a   :  { %v11145_v13 = vpop.f32.mrb[13].mxu1 }
 0x61d   :  { %v1236_v14 = vpop.f32.mrb[12].mxu0 }
 0x61e   :  { %v11778_v18 = vpack.i.bf16 %v1236_v14, %v1160_v11  ;;  %v11150_v19 = vpop.f32.mrb[13].mxu0 }
 0x620   :  { %11779 = vrot.lane.b32.xlu0 %v11778_v18, %s12291_s21 }
 0x621   :  { %v1312_v20 = vpop.f32.mrb[14].mxu1 }
 0x622   :  { %v1388_v21 = vpop.f32.mrb[14].mxu0  ;;  %v11155_v22 = vpop.f32.mrb[15].mxu1 }
 0x623   :  { %v11783_v23 = vpack.i.bf16 %v1388_v21, %v1312_v20  ;;  %v11160_v24 = vpop.f32.mrb[15].mxu0 }
 0x625   :  { %11784 = vrot.lane.b32.xlu1 %v11783_v23, %s12298_s2  ;;  %v1464_v25 = vpop.f32.mrb[16].mxu1 }
 0x626   :  { %v1540_v26 = vpop.f32.mrb[16].mxu0  ;;  %v11165_v27 = vpop.f32.mrb[17].mxu1 }
 0x627   :  { %v11788_v28 = vpack.i.bf16 %v1540_v26, %v1464_v25  ;;  %v11170_v29 = vpop.f32.mrb[17].mxu0  ;;  %v10586_v26 = vld [vmem:[#allocation5 + $0x20] ss:$0 sm:$0xff] }
 0x629   :  { %11789 = vrot.lane.b32.xlu0 %v11788_v28, %s12299_s11 }
 0x692   :  { %v11780_v30 = vpop.permute.xlu0 %11779 }
 0x693   :  { %v11782_v32 = vunpack.i.h.bf16 %v11780_v30  ;;  %v11781_v33 = vunpack.i.l.bf16 %v11780_v30 }
 0x695   :  { %v1569_v37 = vsel %vm213_vm6, %v1084_v8, %v11782_v32  ;;  %v1568_v38 = vsel %vm213_vm6, %v1008_v6, %v11781_v33  ;;  %v11875_v6 = vld [vmem:[#allocation2 + $0x38] sm:$0xff]  }
 0x696   :  { %v10587_v32 = vld [vmem:[#allocation5 + $0x28] ss:$0 sm:$0xff] }
 0x697   :  { %v11785_v31 = vpop.permute.xlu1 %11784 }
 0x698   :  { %v11787_v34 = vunpack.i.h.bf16 %v11785_v31  ;;  %v11786_v35 = vunpack.i.l.bf16 %v11785_v31 }
 0x69a   :  { %v1572_v41 = vsel %vm1570_vm9, %v1569_v37, %v11787_v34  ;;  %v1571_v42 = vsel %vm1570_vm9, %v1568_v38, %v11786_v35  ;;  %v11876_v37 = vld [vmem:[#allocation2 + $0x40] sm:$0xff]   ;;  %v11877_v38 = vld [vmem:[#allocation2 + $0x48] sm:$0xff]  }
 0x69b   :  { %v11790_v36 = vpop.permute.xlu0 %11789 }
 0x69c   :  { %v11792_v39 = vunpack.i.h.bf16 %v11790_v36  ;;  %v11791_v40 = vunpack.i.l.bf16 %v11790_v36 }
 0x69e   :  { %v1575_v43 = vsel %vm1573_vm10, %v1572_v41, %v11792_v39  ;;  %v1574_v44 = vsel %vm1573_vm10, %v1571_v42, %v11791_v40  ;;  %v10588_v39 = vld [vmem:[#allocation5 + $0x30] ss:$0 sm:$0xff] }
 0x69f   :  { %v1576_v45 = vpack.c.bf16 %v1575_v43, %v1574_v44 }
 0x6a1   :  { %11176 = vmatmul.mubr.msk.bf16.vlgmr.msra.gmra.mrb[20].mxu1 %vm71_vm0, %v1576_v45 }
 0x6a2   :  { %11195 = vmatprep.mubr.msk.bf16.mxu1 %vm12293_vm1, %v12292_v15  ;;  %11188 = vmatpush3.bf16.msra.mxu1 %v11874_v5 }
 0x6a3   :  { %11189 = vmatprep.subr.bf16.mxu1 %v12292_v15 }
 0x6a6   :  { %11190 = vmatpush3.bf16.msra.mxu1 %v11875_v6  ;;  %v11878_v6 = vld [vmem:[#allocation2 + $0x50] sm:$0xff]  }
 0x6a7   :  { %11191 = vmatprep.subr.bf16.mxu1 %v12292_v15 }
 0x6aa   :  { %11192 = vmatpush3.bf16.msra.mxu1 %v11876_v37 }
 0x6ab   :  { %11193 = vmatprep.subr.bf16.mxu1 %v12292_v15 }
 0x6ae   :  { %11194 = vmatpush3.bf16.msra.mxu1 %v11877_v38  ;;  %v10600_v38 = vld [vmem:[#allocation5 + $0x50] ss:$0 sm:$0xff] }
 0x6af   :  { %11217 = vmatprep.subr.mxu1 %v12292_v15 }
 0x774   :  { %v1630_v57 = vpop.f32.mrb[20].mxu1 }
 0x775   :  { %v1631_v47 = vadd.f32 %v10582_v53, %v1630_v57  ;;  %v11177_v48 = vpop.f32.mrb[21].mxu1 }
 0x776   :  { %v1633_v49 = vpop.f32.mrb[22].mxu1  ;;  %v10592_v48 = vld [vmem:[#allocation5 + $0x38] ss:$0 sm:$0xff] }
 0x777   :  { %v12601_v55 = vadd.f32 %v1631_v47, %v12368_v0  ;;  %v1634_v58 = vadd.f32 %v10582_v53, %v1633_v49  ;;  %v11178_v59 = vpop.f32.mrb[23].mxu1 }
 0x779   :  { %v12604_v60 = vadd.f32 %v1634_v58, %v12373_v1  ;;  %v1641_v61 = vsel %vm71_vm0, %v12601_v55, 0.0 }
 0x77a   :  { %1642 = vadd.xlane.f32.xlu1 %v1641_v61 }
 0x77b   :  { %v1644_v62 = vsel %vm71_vm0, %v12604_v60, 0.0 }
 0x77c   :  { %1645 = vadd.xlane.f32.xlu0 %v1644_v62 }
 0x807   :  { %v1643_v63 = vpop.xlane.xlu1 %1642 }
 0x808   :  { %v1647_v2 = vmul.f32 0.03125, %v1643_v63 }
 0x809   :  { %v1646_v50 = vpop.xlane.xlu0 %1645 }
 0x80a   :  { %v1649_v3 = vsub.f32 %v12601_v55, %v1647_v2  ;;  %v1648_v0 = vmul.f32 0.03125, %v1646_v50 }
 0x80c   :  { %v1650_v52 = vsub.f32 %v12604_v60, %v1648_v0  ;;  %v1651_v46 = vmul.f32 %v1649_v3, %v1649_v3  ;;  %v1665_v28 = vmul.f32 %v10586_v26, %v1649_v3 }
 0x80e   :  { %v1653_v1 = vsel %vm71_vm0, %v1651_v46, 0.0  ;;  %v1652_v54 = vmul.f32 %v1650_v52, %v1650_v52  ;;  %v1666_v29 = vmul.f32 %v10586_v26, %v1650_v52 }
 0x80f   :  { %1654 = vadd.xlane.f32.xlu0 %v1653_v1 }
 0x810   :  { %v1656_v51 = vsel %vm71_vm0, %v1652_v54, 0.0 }
 0x813   :  { %1657 = vadd.xlane.f32.xlu0 %v1656_v51 }
 0x89c   :  { %v1655_v7 = vpop.xlane.xlu0 %1654 }
 0x89d   :  { %v1659_v8 = vmul.f32 0.032258064, %v1655_v7  ;;  %v11879_v7 = vld [vmem:[#allocation2 + $0x58] sm:$0xff]  }
 0x89f   :  { %11958 = vrsqrt.f32 %v1659_v8  ;;  %vm1669_vm11 = vcmp.eq.f32.partialorder %v1659_v8, inf  ;;  %v1672_v14 = vand.u32 2147483648, %v1659_v8  ;;  %vm1671_vm12 = vcmp.eq.f32.partialorder %v1659_v8, 0.0 }
 0x8a0   :  { %v1658_v10 = vpop.xlane.xlu0 %1657 }
 0x8a1   :  { %v1660_v11 = vmul.f32 0.032258064, %v1658_v10 }
 0x8a3   :  { %11960 = vrsqrt.f32 %v1660_v11  ;;  %vm1676_vm13 = vcmp.eq.f32.partialorder %v1660_v11, inf  ;;  %v1679_v22 = vand.u32 2147483648, %v1660_v11  ;;  %vm1678_vm14 = vcmp.eq.f32.partialorder %v1660_v11, 0.0 }
 0x8a9   :  { %v11959_v12 = vpop.eup %11958 }
 0x8aa   :  { %v1668_v13 = vmul.f32 %v11959_v12, %v1659_v8 }
 0x8ac   :  { %v1670_v16 = vsel %vm1669_vm11, %v1659_v8, %v1668_v13 }
 0x8ad   :  { %v11961_v18 = vpop.eup %11960  ;;  %v1673_v19 = vsel %vm1671_vm12, %v1672_v14, %v1670_v16 }
 0x8ae   :  { %v1681_v20 = vadd.f32 1e-06, %v1673_v19  ;;  %v1675_v21 = vmul.f32 %v11961_v18, %v1660_v11 }
 0x8b0   :  { %11962 = vrcp.f32 %v1681_v20  ;;  %v1677_v23 = vsel %vm1676_vm13, %v1660_v11, %v1675_v21 }
 0x8b1   :  { %v1680_v24 = vsel %vm1678_vm14, %v1679_v22, %v1677_v23 }
 0x8b2   :  { %v1682_v25 = vadd.f32 1e-06, %v1680_v24 }
 0x8b4   :  { %11964 = vrcp.f32 %v1682_v25 }
 0x8ba   :  { %v11963_v27 = vpop.eup %11962 }
 0x8bb   :  { %v1684_v30 = vmul.f32 %v11963_v27, %v1665_v28  ;;  %v10598_v27 = vld [vmem:[#allocation5 + $0x40] ss:$0 sm:$0xff] }
 0x8bd   :  { %v1691_v34 = vadd.f32 %v10587_v32, %v1684_v30 }
 0x8be   :  { %v11965_v31 = vpop.eup %11964 }
 0x8bf   :  { %v1686_v33 = vmul.f32 %v11965_v31, %v1666_v29 }
 0x8c1   :  { %v1692_v35 = vadd.f32 %v10587_v32, %v1686_v33  ;;  %v10599_v33 = vld [vmem:[#allocation5 + $0x48] ss:$0 sm:$0xff] }
 0x8c3   :  { %v1707_v36 = vpack.c.bf16 %v1692_v35, %v1691_v34 }
 0x8c5   :  { %11184 = vmatmul.mubr.msk.bf16.vlgmr.msra.gmra.mrb[20].mxu0 %vm71_vm0, %v1707_v36 }
 0x8c6   :  { %11203 = vmatprep.mubr.msk.bf16.mxu0 %vm12293_vm1, %v12292_v15  ;;  %11200 = vmatpush3.bf16.msra.mxu0 %v11878_v6 }
 0x8c7   :  { %11201 = vmatprep.subr.bf16.mxu0 %v12292_v15 }
 0x8ca   :  { %11202 = vmatpush3.bf16.msra.mxu0 %v11879_v7 }
 0x8cb   :  { %11207 = vmatprep.subr.mxu0 %v12292_v15 }
 0x998   :  { %v1761_v40 = vpop.f32.mrb[20].mxu0 }
 0x999   :  { %v1762_v41 = vadd.f32 %v10588_v39, %v1761_v40  ;;  %v11185_v42 = vpop.f32.mrb[21].mxu0 }
 0x99a   :  { %v1764_v43 = vpop.f32.mrb[22].mxu0 }
 0x99b   :  { %v1765_v44 = vadd.f32 %v10588_v39, %v1764_v43  ;;  %v11186_v45 = vpop.f32.mrb[23].mxu0  ;;  %v1768_v53 = vmax.f32 %v1762_v41, 0.0 }
 0x99d   :  { %v1769_v57 = vmax.f32 %v1765_v44, 0.0 }
 0x99f   :  { %v1770_v47 = vpack.c.bf16 %v1769_v57, %v1768_v53 }
 0x9a1   :  { %11196 = vmatmul.mubr.msk.bf16.vlgmr.msra.gmra.mrb[24].mxu1 %vm1799_vm15, %v1770_v47 }
 0x9a2   :  { %11219 = vmatprep.mubr.msk.f32.mxu1 %vm12293_vm1, %v12292_v15 }
 0xa74   :  { %v1837_v49 = vpop.f32.mrb[24].mxu1 }
 0xa75   :  { %v1838_v58 = vadd.f32 %v10592_v48, %v1837_v49  ;;  %v11197_v59 = vpop.f32.mrb[25].mxu1 }
 0xa76   :  { %v1840_v61 = vpop.f32.mrb[26].mxu1 }
 0xa77   :  { %v12627_v62 = vadd.f32 %v1838_v58, %v12601_v55  ;;  %v1841_v63 = vadd.f32 %v10592_v48, %v1840_v61  ;;  %v11198_v2 = vpop.f32.mrb[27].mxu1 }
 0xa79   :  { %v12630_v50 = vadd.f32 %v1841_v63, %v12604_v60  ;;  %v1848_v3 = vsel %vm71_vm0, %v12627_v62, 0.0 }
 0xa7a   :  { %1849 = vadd.xlane.f32.xlu1 %v1848_v3 }
 0xa7b   :  { %v1851_v0 = vsel %vm71_vm0, %v12630_v50, 0.0 }
 0xa7c   :  { %1852 = vadd.xlane.f32.xlu0 %v1851_v0 }
 0xb07   :  { %v1850_v52 = vpop.xlane.xlu1 %1849 }
 0xb08   :  { %v1854_v46 = vmul.f32 0.03125, %v1850_v52 }
 0xb09   :  { %v1853_v1 = vpop.xlane.xlu0 %1852 }
 0xb0a   :  { %v1856_v54 = vsub.f32 %v12627_v62, %v1854_v46  ;;  %v1855_v55 = vmul.f32 0.03125, %v1853_v1 }
 0xb0c   :  { %v1857_v51 = vsub.f32 %v12630_v50, %v1855_v55  ;;  %v1858_v56 = vmul.f32 %v1856_v54, %v1856_v54  ;;  %v1872_v29 = vmul.f32 %v10598_v27, %v1856_v54 }
 0xb0e   :  { %v1860_v60 = vsel %vm71_vm0, %v1858_v56, 0.0  ;;  %v1859_v4 = vmul.f32 %v1857_v51, %v1857_v51  ;;  %v1873_v30 = vmul.f32 %v10598_v27, %v1857_v51 }
 0xb0f   :  { %1861 = vadd.xlane.f32.xlu1 %v1860_v60 }
 0xb10   :  { %v1863_v5 = vsel %vm71_vm0, %v1859_v4, 0.0 }
 0xb11   :  { %1864 = vadd.xlane.f32.xlu0 %v1863_v5 }
 0xb9c   :  { %v1862_v8 = vpop.xlane.xlu1 %1861 }
 0xb9d   :  { %v1866_v10 = vmul.f32 0.032258064, %v1862_v8 }
 0xb9e   :  { %v1865_v11 = vpop.xlane.xlu0 %1864 }
 0xb9f   :  { %11966 = vrsqrt.f32 %v1866_v10  ;;  %v1867_v12 = vmul.f32 0.032258064, %v1865_v11  ;;  %vm1876_vm2 = vcmp.eq.f32.partialorder %v1866_v10, inf  ;;  %v1879_v16 = vand.u32 2147483648, %v1866_v10 }
 0xba0   :  { %vm1878_vm3 = vcmp.eq.f32.partialorder %v1866_v10, 0.0 }
 0xba1   :  { %11968 = vrsqrt.f32 %v1867_v12  ;;  %vm1883_vm4 = vcmp.eq.f32.partialorder %v1867_v12, inf  ;;  %v1886_v23 = vand.u32 2147483648, %v1867_v12  ;;  %vm1885_vm5 = vcmp.eq.f32.partialorder %v1867_v12, 0.0 }
 0xba9   :  { %v11967_v13 = vpop.eup %11966 }
 0xbaa   :  { %v1875_v14 = vmul.f32 %v11967_v13, %v1866_v10 }
 0xbab   :  { %v11969_v18 = vpop.eup %11968 }
 0xbac   :  { %v1877_v19 = vsel %vm1876_vm2, %v1866_v10, %v1875_v14  ;;  %v1882_v21 = vmul.f32 %v11969_v18, %v1867_v12 }
 0xbad   :  { %v1880_v20 = vsel %vm1878_vm3, %v1879_v16, %v1877_v19 }
 0xbae   :  { %v1888_v22 = vadd.f32 1e-06, %v1880_v20  ;;  %v1884_v24 = vsel %vm1883_vm4, %v1867_v12, %v1882_v21 }
 0xbaf   :  { %v1887_v25 = vsel %vm1885_vm5, %v1886_v23, %v1884_v24 }
 0xbb0   :  { %11970 = vrcp.f32 %v1888_v22  ;;  %v1889_v26 = vadd.f32 1e-06, %v1887_v25 }
 0xbb2   :  { %11972 = vrcp.f32 %v1889_v26 }
 0xbba   :  { %v11971_v28 = vpop.eup %11970 }
 0xbbb   :  { %v1891_v31 = vmul.f32 %v11971_v28, %v1872_v29 }
 0xbbc   :  { %v11973_v32 = vpop.eup %11972 }
 0xbbd   :  { %v1893_v34 = vmul.f32 %v11973_v32, %v1873_v30  ;;  %v1898_v35 = vadd.f32 %v10599_v33, %v1891_v31 }
 0xbbf   :  { %v1899_v36 = vadd.f32 %v10599_v33, %v1893_v34 }
 0xbc1   :  { %v1910_v37 = vpack.c.bf16 %v1899_v36, %v1898_v35 }
 0xbc3   :  { %11204 = vmatmul.mubr.msk.bf16.vlgmr.msra.gmra.mrb[24].mxu0 %vm71_vm0, %v1910_v37 }
 0xbc4   :  { %11209 = vmatprep.mubr.msk.f32.mxu0 %vm12293_vm1, %v12292_v15 }
 0xc96   :  { %v1964_v39 = vpop.f32.mrb[24].mxu0 }
 0xc97   :  { %v12645_v40 = vadd.f32 %v10600_v38, %v1964_v39  ;;  %v11205_v41 = vpop.f32.mrb[25].mxu0 }
 0xc98   :  { %v1967_v42 = vpop.f32.mrb[26].mxu0 }
 0xc99   :  { %v12647_v43 = vadd.f32 %v10600_v38, %v1967_v42  ;;  %1973 = vrot.lane.b32.xlu1 %v12645_v40, %s12295_s5  ;;  %v11206_v44 = vpop.f32.mrb[27].mxu0 }
 0xc9b   :  { %1975 = vrot.lane.b32.xlu0 %v12647_v43, %s12295_s5 }
 0xc9d   :  { %1977 = vrot.lane.b32.xlu1 %v12645_v40, %s12294_s0 }
 0xc9f   :  { %1983 = vrot.lane.b32.xlu0 %v12647_v43, %s12296_s28 }
 0xca1   :  { %1979 = vrot.lane.b32.xlu1 %v12647_v43, %s12294_s0 }
 0xca3   :  { %2061 = vrot.lane.b32.xlu0 %v12647_v43, %s12297_s29 }
 0xca5   :  { %1981 = vrot.lane.b32.xlu1 %v12645_v40, %s12296_s28 }
 0xca9   :  { %1985 = vrot.lane.b32.xlu1 %v12645_v40, %s12297_s29 }
 0xd0b   :  { %v12665_v45 = vpop.permute.xlu1 %1973 }
 0xd0c   :  { %2137 = vrot.lane.b32.xlu1 %v12665_v45, %s12297_s29 }
 0xd0d   :  { %v12669_v53 = vpop.permute.xlu0 %1975 }
 0xd0e   :  { %2213 = vrot.lane.b32.xlu0 %v12669_v53, %s12297_s29 }
 0xd0f   :  { %v12673_v57 = vpop.permute.xlu1 %1977 }
 0xd10   :  { %2289 = vrot.lane.b32.xlu1 %v12673_v57, %s12297_s29 }
 0xd11   :  { %v12681_v48 = vpop.permute.xlu0 %1983 }
 0xd13   :  { %v12677_v47 = vpop.permute.xlu1 %1979 }
 0xd14   :  { %2365 = vrot.lane.b32.xlu0 %v12677_v47, %s12297_s29 }
 0xd15   :  { %v2062_v59 = vpop.permute.xlu0 %2061 }
 0xd17   :  { %v12683_v49 = vpop.permute.xlu1 %1981 }
 0xd18   :  { %2441 = vrot.lane.b32.xlu1 %v12683_v49, %s12297_s29  ;;  %2517 = vrot.lane.b32.xlu0 %v12681_v48, %s12297_s29 }
 0xd1b   :  { %v1986_v58 = vpop.permute.xlu1 %1985 }
 0xd1c   :  { %11208 = vmatpush3.xpose.msk.msra.mxu0 %vm213_vm6, %v1986_v58 }
 0xd1d   :  { %11212 = vmatprep.subr.mxu0 %v12292_v15 }
 0xd1f   :  { %11210 = vmatmul.mubr.msk.f32.vlgmr.msra.gmra.mrb[18].mxu0 %vm213_vm6, %v12645_v40 }
 0xd20   :  { %11213 = vmatpush3.xpose.msk.msra.mxu0 %vm213_vm6, %v2062_v59  ;;  %11214 = vmatprep.mubr.msk.f32.mxu0 %vm12293_vm1, %v12292_v15 }
 0xd21   :  { %11222 = vmatprep.subr.mxu0 %v12292_v15 }
 0xd23   :  { %11215 = vmatmul.mubr.msk.f32.vlgmr.msra.gmra.mrb[28].mxu0 %vm213_vm6, %v12647_v43 }
 0xd24   :  { %11224 = vmatprep.mubr.msk.f32.mxu0 %vm12293_vm1, %v12292_v15 }
 0xd7e   :  { %v2138_v61 = vpop.permute.xlu1 %2137 }
 0xd7f   :  { %11218 = vmatpush3.xpose.msk.msra.mxu1 %vm213_vm6, %v2138_v61 }
 0xd80   :  { %v2214_v63 = vpop.permute.xlu0 %2213  ;;  %11227 = vmatprep.subr.mxu1 %v12292_v15 }
 0xd81   :  { %11223 = vmatpush3.xpose.msk.msra.mxu0 %vm213_vm6, %v2214_v63 }
 0xd82   :  { %11220 = vmatmul.mubr.msk.f32.vlgmr.msra.gmra.mrb[18].mxu1 %vm213_vm6, %v12665_v45  ;;  %v2290_v2 = vpop.permute.xlu1 %2289  ;;  %11232 = vmatprep.subr.mxu0 %v12292_v15 }
 0xd83   :  { %11228 = vmatpush3.xpose.msk.msra.mxu1 %vm213_vm6, %v2290_v2  ;;  %11229 = vmatprep.mubr.msk.f32.mxu1 %vm12293_vm1, %v12292_v15 }
 0xd84   :  { %11225 = vmatmul.mubr.msk.f32.vlgmr.msra.gmra.mrb[30].mxu0 %vm213_vm6, %v12669_v53  ;;  %11237 = vmatprep.subr.mxu1 %v12292_v15 }
 0xd85   :  { %11234 = vmatprep.mubr.msk.f32.mxu0 %vm12293_vm1, %v12292_v15 }
 0xd86   :  { %11230 = vmatmul.mubr.msk.f32.vlgmr.msra.gmra.mrb[28].mxu1 %vm213_vm6, %v12673_v57  ;;  %v2366_v3 = vpop.permute.xlu0 %2365 }
 0xd87   :  { %11233 = vmatpush3.xpose.msk.msra.mxu0 %vm213_vm6, %v2366_v3  ;;  %11239 = vmatprep.mubr.msk.f32.mxu1 %vm12293_vm1, %v12292_v15 }
 0xd88   :  { %11242 = vmatprep.subr.mxu0 %v12292_v15 }
 0xd8a   :  { %v2442_v0 = vpop.permute.xlu1 %2441  ;;  %11235 = vmatmul.mubr.msk.f32.vlgmr.msra.gmra.mrb[32].mxu0 %vm213_vm6, %v12677_v47  ;;  %v2518_v52 = vpop.permute.xlu0 %2517 }
 0xd8b   :  { %11238 = vmatpush3.xpose.msk.msra.mxu1 %vm213_vm6, %v2442_v0  ;;  %11243 = vmatpush3.xpose.msk.msra.mxu0 %vm213_vm6, %v2518_v52 }
 0xd8c   :  { %11244 = vmatprep.mubr.msk.f32.mxu0 %vm12293_vm1, %v12292_v15  ;;  %11247 = vmatprep.subr.mxu1 %v12292_v15 }
 0xd8d   :  { %11252 = vmatprep.subr.mxu0 %v12292_v15 }
 0xd8e   :  { %11240 = vmatmul.mubr.msk.f32.vlgmr.msra.gmra.mrb[30].mxu1 %vm213_vm6, %v12683_v49  ;;  %11245 = vmatmul.mubr.msk.f32.vlgmr.msra.gmra.mrb[34].mxu0 %vm213_vm6, %v12681_v48 }
 0xd8f   :  { %11254 = vmatprep.mubr.msk.f32.mxu0 %vm12293_vm1, %v12292_v15  ;;  %11249 = vmatprep.mubr.msk.f32.mxu1 %vm12293_vm1, %v12292_v15 }
 0xdf2   :  { %v2057_v46 = vpop.f32.mrb[18].mxu0 }
 0xdf3   :  { %v2593_v1 = vmul.f32 0.35355338, %v2057_v46  ;;  %v11211_v54 = vpop.f32.mrb[19].mxu0 }
 0xdf5   :  { %v2601_v55 = vadd.f32 %v2593_v1, %v12493_v9 }
 0xdf6   :  { %v2133_v51 = vpop.f32.mrb[28].mxu0 }
 0xdf7   :  { %v2594_v56 = vmul.f32 0.35355338, %v2133_v51  ;;  %v11216_v60 = vpop.f32.mrb[29].mxu0  ;;  %v2609_v4 = vsel %vm213_vm6, %v2601_v55, -inf }
 0xdf8   :  { %2610 = vmax.xlane.f32.xlu1 %v2609_v4 }
 0xdf9   :  { %v2602_v5 = vadd.f32 %v2594_v56, %v12498_v17 }
 0xdfb   :  { %v2612_v6 = vsel %vm213_vm6, %v2602_v5, -inf }
 0xdfc   :  { %2613 = vmax.xlane.f32.xlu0 %v2612_v6 }
 0xe55   :  { %v2209_v7 = vpop.f32.mrb[18].mxu1 }
 0xe56   :  { %v2595_v8 = vmul.f32 0.35355338, %v2209_v7  ;;  %v11221_v10 = vpop.f32.mrb[19].mxu1 }
 0xe57   :  { %v2285_v11 = vpop.f32.mrb[30].mxu0 }
 0xe58   :  { %v2596_v12 = vmul.f32 0.35355338, %v2285_v11  ;;  %v11226_v13 = vpop.f32.mrb[31].mxu0  ;;  %v2603_v14 = vadd.f32 %v2595_v8, %v12493_v9 }
 0xe59   :  { %v2361_v16 = vpop.f32.mrb[28].mxu1 }
 0xe5a   :  { %v2597_v18 = vmul.f32 0.35355338, %v2361_v16  ;;  %v11231_v19 = vpop.f32.mrb[29].mxu1  ;;  %v2615_v20 = vsel %vm213_vm6, %v2603_v14, -inf  ;;  %v2604_v21 = vadd.f32 %v2596_v12, %v12498_v17 }
 0xe5b   :  { %2616 = vmax.xlane.f32.xlu0 %v2615_v20 }
 0xe5c   :  { %v2605_v22 = vadd.f32 %v2597_v18, %v12493_v9  ;;  %v2618_v27 = vsel %vm213_vm6, %v2604_v21, -inf }
 0xe5d   :  { %v2437_v23 = vpop.f32.mrb[32].mxu0 }
 0xe5e   :  { %v2598_v24 = vmul.f32 0.35355338, %v2437_v23  ;;  %v11236_v25 = vpop.f32.mrb[33].mxu0  ;;  %v2621_v26 = vsel %vm213_vm6, %v2605_v22, -inf }
 0xe5f   :  { %2622 = vmax.xlane.f32.xlu1 %v2621_v26  ;;  %2619 = vmax.xlane.f32.xlu0 %v2618_v27 }
 0xe60   :  { %v2606_v28 = vadd.f32 %v2598_v24, %v12498_v17 }
 0xe61   :  { %v2513_v29 = vpop.f32.mrb[30].mxu1  ;;  %v2589_v30 = vpop.f32.mrb[34].mxu0 }
 0xe62   :  { %v2599_v31 = vmul.f32 0.35355338, %v2513_v29  ;;  %v2600_v32 = vmul.f32 0.35355338, %v2589_v30  ;;  %v11241_v33 = vpop.f32.mrb[31].mxu1  ;;  %v11246_v34 = vpop.f32.mrb[35].mxu0 }
 0xe63   :  { %v2624_v35 = vsel %vm213_vm6, %v2606_v28, -inf }
 0xe64   :  { %2625 = vmax.xlane.f32.xlu0 %v2624_v35  ;;  %v2607_v36 = vadd.f32 %v2599_v31, %v12493_v9  ;;  %v2608_v37 = vadd.f32 %v2600_v32, %v12498_v17 }
 0xe66   :  { %v2627_v38 = vsel %vm213_vm6, %v2607_v36, -inf  ;;  %v2630_v39 = vsel %vm213_vm6, %v2608_v37, -inf }
 0xe67   :  { %2628 = vmax.xlane.f32.xlu1 %v2627_v38 }
 0xe68   :  { %2631 = vmax.xlane.f32.xlu0 %v2630_v39 }
 0xe78   :  { %2697 = vrot.lane.b32.xlu1 %v12645_v40, %s12287_s7 }
 0xe7c   :  { %2849 = vrot.lane.b32.xlu1 %v12665_v45, %s12287_s7 }
 0xe7e   :  { %2773 = vrot.lane.b32.xlu0 %v12647_v43, %s12287_s7 }
 0xe80   :  { %2925 = vrot.lane.b32.xlu1 %v12669_v53, %s12287_s7 }
 0xe82   :  { %3077 = vrot.lane.b32.xlu0 %v12677_v47, %s12287_s7 }
 0xe84   :  { %3001 = vrot.lane.b32.xlu1 %v12673_v57, %s12287_s7 }
 0xe85   :  { %v2611_v44 = vpop.xlane.xlu1 %2610 }
 0xe86   :  { %v2633_v40 = vsub.f32 %v2601_v55, %v2611_v44 }
 0xe88   :  { %v2641_v59 = vmul.f32 1.442695, %v2633_v40 }
 0xe89   :  { %v2614_v41 = vpop.xlane.xlu0 %2613 }
 0xe8a   :  { %v2634_v42 = vsub.f32 %v2602_v5, %v2614_v41 }
 0xe8c   :  { %v2643_v58 = vmul.f32 1.442695, %v2634_v42 }
 0xe8e   :  { %11974 = vpow2.f32 %v2643_v58 }
 0xe8f   :  { %11976 = vpow2.f32 %v2641_v59 }
 0xe98   :  { %v12765_v45 = vpop.eup %11974 }
 0xe99   :  { %v2660_v43 = vsel %vm213_vm6, %v12765_v45, 0.0  ;;  %v12769_v53 = vpop.eup %11976 }
 0xe9a   :  { %v2657_v47 = vsel %vm213_vm6, %v12769_v53, 0.0 }
 0xea1   :  { %2661 = vadd.xlane.f32.xlu0 %v2660_v43 }
 0xea8   :  { %2658 = vadd.xlane.f32.xlu1 %v2657_v47 }
 0xee8   :  { %v2617_v57 = vpop.xlane.xlu0 %2616 }
 0xee9   :  { %v2635_v61 = vsub.f32 %v2603_v14, %v2617_v57 }
 0xeeb   :  { %v2645_v63 = vmul.f32 1.442695, %v2635_v61 }
 0xeec   :  { %v2623_v2 = vpop.xlane.xlu1 %2622  ;;  %v2620_v3 = vpop.xlane.xlu0 %2619 }
 0xeed   :  { %11978 = vpow2.f32 %v2645_v63  ;;  %v2637_v0 = vsub.f32 %v2605_v22, %v2623_v2  ;;  %v2636_v52 = vsub.f32 %v2604_v21, %v2620_v3 }
 0xeef   :  { %v2649_v46 = vmul.f32 1.442695, %v2637_v0  ;;  %v2647_v1 = vmul.f32 1.442695, %v2636_v52 }
 0xef1   :  { %11980 = vpow2.f32 %v2649_v46  ;;  %v2626_v54 = vpop.xlane.xlu0 %2625 }
 0xef2   :  { %11982 = vpow2.f32 %v2647_v1  ;;  %v2638_v55 = vsub.f32 %v2606_v28, %v2626_v54  ;;  %v11880_v1 = vld [vmem:[#allocation2 + $0x60] sm:$0xff]  }
 0xef4   :  { %v2651_v51 = vmul.f32 1.442695, %v2638_v55  ;;  %v2629_v56 = vpop.xlane.xlu1 %2628 }
 0xef5   :  { %v2639_v60 = vsub.f32 %v2607_v36, %v2629_v56  ;;  %v2632_v4 = vpop.xlane.xlu0 %2631 }
 0xef6   :  { %11984 = vpow2.f32 %v2651_v51  ;;  %v2640_v5 = vsub.f32 %v2608_v37, %v2632_v4  ;;  %v11881_v51 = vld [vmem:[#allocation2 + $0x68] sm:$0xff]  }
 0xef7   :  { %v11979_v6 = vpop.eup %11978  ;;  %v2653_v7 = vmul.f32 1.442695, %v2639_v60 }
 0xef8   :  { %v2655_v8 = vmul.f32 1.442695, %v2640_v5  ;;  %v2698_v10 = vpop.permute.xlu1 %2697  ;;  %v2663_v11 = vsel %vm213_vm6, %v11979_v6, 0.0 }
 0xef9   :  { %11986 = vpow2.f32 %v2653_v7  ;;  %v2774_v12 = vpop.permute.xlu0 %2773  ;;  %11248 = vmatpush3.msra.mxu1 %v2698_v10  ;;  %2664 = vadd.xlane.f32.xlu1 %v2663_v11 }
 0xefa   :  { %11988 = vpow2.f32 %v2655_v8  ;;  %11253 = vmatpush3.msra.mxu0 %v2774_v12  ;;  %11257 = vmatprep.subr.mxu1 %v12292_v15 }
 0xefb   :  { %v11981_v13 = vpop.eup %11980  ;;  %11262 = vmatprep.subr.mxu0 %v12292_v15 }
 0xefc   :  { %v11983_v14 = vpop.eup %11982  ;;  %v2669_v16 = vsel %vm213_vm6, %v11981_v13, 0.0  ;;  %v2850_v25 = vpop.permute.xlu1 %2849 }
 0xefd   :  { %2670 = vadd.xlane.f32.xlu1 %v2669_v16  ;;  %v2666_v18 = vsel %vm213_vm6, %v11983_v14, 0.0  ;;  %v3078_v26 = vpop.permute.xlu0 %3077 }
 0xefe   :  { %2667 = vadd.xlane.f32.xlu0 %v2666_v18 }
 0xf00   :  { %v11985_v19 = vpop.eup %11984  ;;  %v2926_v27 = vpop.permute.xlu1 %2925 }
 0xf01   :  { %v2672_v20 = vsel %vm213_vm6, %v11985_v19, 0.0 }
 0xf02   :  { %2673 = vadd.xlane.f32.xlu0 %v2672_v20 }
 0xf03   :  { %v12779_v21 = vpop.eup %11986 }
 0xf04   :  { %v12781_v22 = vpop.eup %11988  ;;  %v2675_v23 = vsel %vm213_vm6, %v12779_v21, 0.0  ;;  %v3002_v29 = vpop.permute.xlu1 %3001 }
 0xf05   :  { %2676 = vadd.xlane.f32.xlu1 %v2675_v23  ;;  %v2678_v24 = vsel %vm213_vm6, %v12781_v22, 0.0 }
 0xf06   :  { %2679 = vadd.xlane.f32.xlu0 %v2678_v24 }
 0xf16   :  { %3153 = vrot.lane.b32.xlu1 %v12683_v49, %s12287_s7 }
 0xf1c   :  { %3229 = vrot.lane.b32.xlu0 %v12681_v48, %s12287_s7 }
 0xf2e   :  { %v2662_v28 = vpop.xlane.xlu0 %2661 }
 0xf2f   :  { %11990 = vrcp.f32 %v2662_v28 }
 0xf35   :  { %v2659_v30 = vpop.xlane.xlu1 %2658 }
 0xf36   :  { %11992 = vrcp.f32 %v2659_v30 }
 0xf39   :  { %v11991_v31 = vpop.eup %11990 }
 0xf3a   :  { %v2690_v32 = vmul.f32 %v11991_v31, %v12765_v45 }
 0xf3c   :  { %11255 = vmatmul.mubr.msk.f32.vlgmr.msra.gmra.mrb[36].mxu0 %vm213_vm6, %v2690_v32 }
 0xf3d   :  { %11263 = vmatpush3.msra.mxu0 %v2926_v27  ;;  %11264 = vmatprep.mubr.msk.f32.mxu0 %vm12293_vm1, %v12292_v15 }
 0xf3e   :  { %11272 = vmatprep.subr.mxu0 %v12292_v15 }
 0xf40   :  { %v11993_v48 = vpop.eup %11992 }
 0xf41   :  { %v2689_v49 = vmul.f32 %v11993_v48, %v12769_v53  ;;  %v10628_v48 = vld [vmem:[#allocation5 + $0x58] ss:$0 sm:$0xff] }
 0xf43   :  { %11250 = vmatmul.mubr.msk.f32.vlgmr.msra.gmra.mrb[32].mxu1 %vm213_vm6, %v2689_v49 }
 0xf44   :  { %11258 = vmatpush3.msra.mxu1 %v2850_v25  ;;  %11259 = vmatprep.mubr.msk.f32.mxu1 %vm12293_vm1, %v12292_v15 }
 0xf45   :  { %11267 = vmatprep.subr.mxu1 %v12292_v15 }
 0xf86   :  { %v2665_v33 = vpop.xlane.xlu1 %2664 }
 0xf87   :  { %11994 = vrcp.f32 %v2665_v33 }
 0xf8a   :  { %v2671_v34 = vpop.xlane.xlu1 %2670 }
 0xf8b   :  { %11996 = vrcp.f32 %v2671_v34  ;;  %v2668_v35 = vpop.xlane.xlu0 %2667 }
 0xf8c   :  { %11998 = vrcp.f32 %v2668_v35 }
 0xf8f   :  { %v2674_v36 = vpop.xlane.xlu0 %2673 }
 0xf90   :  { %12000 = vrcp.f32 %v2674_v36 }
 0xf91   :  { %v11995_v37 = vpop.eup %11994 }
 0xf92   :  { %v2677_v38 = vpop.xlane.xlu1 %2676  ;;  %v2691_v39 = vmul.f32 %v11995_v37, %v11979_v6 }
 0xf93   :  { %12002 = vrcp.f32 %v2677_v38  ;;  %v2680_v41 = vpop.xlane.xlu0 %2679 }
 0xf94   :  { %12004 = vrcp.f32 %v2680_v41  ;;  %11260 = vmatmul.mubr.msk.f32.vlgmr.msra.gmra.mrb[34].mxu1 %vm213_vm6, %v2691_v39  ;;  %v12845_v39 = vld [vmem:[%s13865_s1] sm:$0xff] }
 0xf95   :  { %v11997_v42 = vpop.eup %11996  ;;  %11268 = vmatpush3.msra.mxu1 %v3002_v29  ;;  %11269 = vmatprep.mubr.msk.f32.mxu1 %vm12293_vm1, %v12292_v15 }
 0xf96   :  { %v11999_v44 = vpop.eup %11998  ;;  %v3154_v58 = vpop.permute.xlu1 %3153  ;;  %11277 = vmatprep.subr.mxu1 %v12292_v15  ;;  %v2693_v40 = vmul.f32 %v11997_v42, %v11981_v13 }
 0xf97   :  { %v2692_v59 = vmul.f32 %v11999_v44, %v11983_v14  ;;  %v3230_v47 = vpop.permute.xlu0 %3229 }
 0xf98   :  { %11270 = vmatmul.mubr.msk.f32.vlgmr.msra.gmra.mrb[36].mxu1 %vm213_vm6, %v2693_v40 }
 0xf99   :  { %11265 = vmatmul.mubr.msk.f32.vlgmr.msra.gmra.mrb[38].mxu0 %vm213_vm6, %v2692_v59  ;;  %11278 = vmatpush3.msra.mxu1 %v3154_v58  ;;  %v12859_v58 = vld [vmem:[%s13865_s1 + $0x8] sm:$0xff] }
 0xf9a   :  { %v12001_v45 = vpop.eup %12000  ;;  %11273 = vmatpush3.msra.mxu0 %v3078_v26  ;;  %11274 = vmatprep.mubr.msk.f32.mxu0 %vm12293_vm1, %v12292_v15 }
 0xf9b   :  { %11282 = vmatprep.subr.mxu0 %v12292_v15  ;;  %v2694_v43 = vmul.f32 %v12001_v45, %v11985_v19  ;;  %11279 = vmatprep.mubr.msk.f32.mxu1 %vm12293_vm1, %v12292_v15 }
 0xf9c   :  { %11287 = vmatprep.subr.bf16.mxu1 %v12292_v15 }
 0xf9d   :  { %v12003_v53 = vpop.eup %12002  ;;  %11275 = vmatmul.mubr.msk.f32.vlgmr.msra.gmra.mrb[40].mxu0 %vm213_vm6, %v2694_v43 }
 0xf9e   :  { %v12005_v57 = vpop.eup %12004  ;;  %11283 = vmatpush3.msra.mxu0 %v3230_v47  ;;  %11284 = vmatprep.mubr.msk.f32.mxu0 %vm12293_vm1, %v12292_v15  ;;  %v2695_v61 = vmul.f32 %v12003_v53, %v12779_v21 }
 0xf9f   :  { %v2696_v63 = vmul.f32 %v12005_v57, %v12781_v22  ;;  %11295 = vmatprep.subr.bf16.mxu0 %v12292_v15 }
 0xfa0   :  { %11280 = vmatmul.mubr.msk.f32.vlgmr.msra.gmra.mrb[38].mxu1 %vm213_vm6, %v2695_v61 }
 0xfa1   :  { %11285 = vmatmul.mubr.msk.f32.vlgmr.msra.gmra.mrb[42].mxu0 %vm213_vm6, %v2696_v63  ;;  %11291 = vmatprep.mubr.msk.bf16.mxu1 %vm12293_vm1, %v12292_v15 }
 0xfa2   :  { %11299 = vmatprep.mubr.msk.bf16.mxu0 %vm12293_vm1, %v12292_v15  ;;  %11288 = vmatpush3.bf16.msra.mxu1 %v11880_v1 }
 0xfa3   :  { %11289 = vmatprep.subr.bf16.mxu1 %v12292_v15 }
 0xfa6   :  { %11290 = vmatpush3.bf16.msra.mxu1 %v11881_v51 }
 0xfa7   :  { %11303 = vmatprep.subr.bf16.mxu1 %v12292_v15 }
0x100f   :  { %v2845_v2 = vpop.f32.mrb[36].mxu0 }
0x1010   :  { %v11256_v3 = vpop.f32.mrb[37].mxu0 }
0x1016   :  { %v2769_v0 = vpop.f32.mrb[32].mxu1 }
0x1017   :  { %v11251_v52 = vpop.f32.mrb[33].mxu1 }
0x1067   :  { %v2921_v46 = vpop.f32.mrb[34].mxu1 }
0x1068   :  { %v11261_v54 = vpop.f32.mrb[35].mxu1 }
0x106b   :  { %v3073_v55 = vpop.f32.mrb[36].mxu1 }
0x106c   :  { %v2997_v56 = vpop.f32.mrb[38].mxu0  ;;  %v11271_v60 = vpop.f32.mrb[37].mxu1 }
0x106d   :  { %v11793_v4 = vpack.i.bf16 %v2997_v56, %v2921_v46  ;;  %v11266_v5 = vpop.f32.mrb[39].mxu0 }
0x106e   :  { %v11883_v5 = vld [vmem:[#allocation2 + $0x78] sm:$0xff]  }
0x106f   :  { %11794 = vrot.lane.b32.xlu1 %v11793_v4, %s12291_s21  ;;  %v11882_v4 = vld [vmem:[#allocation2 + $0x70] sm:$0xff]  }
0x1070   :  { %v3149_v6 = vpop.f32.mrb[40].mxu0  ;;  %11296 = vmatpush3.bf16.msra.mxu0 %v11882_v4 }
0x1071   :  { %v11798_v7 = vpack.i.bf16 %v3149_v6, %v3073_v55  ;;  %v11276_v8 = vpop.f32.mrb[41].mxu0  ;;  %11297 = vmatprep.subr.bf16.mxu0 %v12292_v15  ;;  %v11886_v6 = vld [vmem:[#allocation2 + $0x80] sm:$0xff]  }
0x1073   :  { %11799 = vrot.lane.b32.xlu0 %v11798_v7, %s12298_s2  ;;  %v3225_v10 = vpop.f32.mrb[38].mxu1  ;;  %v11887_v7 = vld [vmem:[#allocation2 + $0x88] sm:$0xff]  }
0x1074   :  { %v3301_v11 = vpop.f32.mrb[42].mxu0  ;;  %v11281_v12 = vpop.f32.mrb[39].mxu1  ;;  %11298 = vmatpush3.bf16.msra.mxu0 %v11883_v5  ;;  %v10647_v5 = vld [vmem:[#allocation5 + $0x88] ss:$0 sm:$0xff] }
0x1075   :  { %v11803_v13 = vpack.i.bf16 %v3301_v11, %v3225_v10  ;;  %v11286_v14 = vpop.f32.mrb[43].mxu0  ;;  %11315 = vmatprep.subr.bf16.mxu0 %v12292_v15 }
0x1077   :  { %11804 = vrot.lane.b32.xlu1 %v11803_v13, %s12299_s11 }
0x10e1   :  { %v11795_v16 = vpop.permute.xlu1 %11794 }
0x10e2   :  { %v11797_v19 = vunpack.i.h.bf16 %v11795_v16  ;;  %v11796_v20 = vunpack.i.l.bf16 %v11795_v16 }
0x10e4   :  { %v3330_v24 = vsel %vm213_vm6, %v2845_v2, %v11797_v19  ;;  %v3329_v25 = vsel %vm213_vm6, %v2769_v0, %v11796_v20 }
0x10e5   :  { %v11800_v18 = vpop.permute.xlu0 %11799 }
0x10e6   :  { %v11802_v21 = vunpack.i.h.bf16 %v11800_v18  ;;  %v11801_v22 = vunpack.i.l.bf16 %v11800_v18 }
0x10e8   :  { %v3332_v28 = vsel %vm1570_vm9, %v3330_v24, %v11802_v21  ;;  %v3331_v29 = vsel %vm1570_vm9, %v3329_v25, %v11801_v22 }
0x10e9   :  { %v11805_v23 = vpop.permute.xlu1 %11804 }
0x10ea   :  { %v11807_v26 = vunpack.i.h.bf16 %v11805_v23  ;;  %v11806_v27 = vunpack.i.l.bf16 %v11805_v23 }
0x10ec   :  { %v3334_v30 = vsel %vm1573_vm10, %v3332_v28, %v11807_v26  ;;  %v3333_v31 = vsel %vm1573_vm10, %v3331_v29, %v11806_v27 }
0x10ed   :  { %v3335_v32 = vpack.c.bf16 %v3334_v30, %v3333_v31 }
0x10ef   :  { %11292 = vmatmul.mubr.msk.bf16.vlgmr.msra.gmra.mrb[40].mxu1 %vm71_vm0, %v3335_v32 }
0x10f0   :  { %11311 = vmatprep.mubr.msk.bf16.mxu1 %vm12293_vm1, %v12292_v15  ;;  %11304 = vmatpush3.bf16.msra.mxu1 %v11886_v6 }
0x10f1   :  { %11305 = vmatprep.subr.bf16.mxu1 %v12292_v15 }
0x10f4   :  { %11306 = vmatpush3.bf16.msra.mxu1 %v11887_v7 }
0x10f5   :  { %11307 = vmatprep.subr.bf16.mxu1 %v12292_v15 }
0x11c2   :  { %v3389_v49 = vpop.f32.mrb[40].mxu1 }
0x11c3   :  { %v3390_v33 = vadd.f32 %v10628_v48, %v3389_v49  ;;  %v11293_v34 = vpop.f32.mrb[41].mxu1 }
0x11c4   :  { %v3392_v35 = vpop.f32.mrb[42].mxu1 }
0x11c5   :  { %v12840_v36 = vadd.f32 %v3390_v33, %v12627_v62  ;;  %v3393_v37 = vadd.f32 %v10628_v48, %v3392_v35  ;;  %v11294_v38 = vpop.f32.mrb[43].mxu1  ;;  %v3660_v62 = vsel %vm71_vm0, %v12845_v39, 0.0 }
0x11c7   :  { %v12848_v41 = vadd.f32 %v3393_v37, %v12630_v50  ;;  %v3400_v42 = vsel %vm71_vm0, %v12840_v36, 0.0  ;;  %v3663_v50 = vsel %vm71_vm0, %v12859_v58, 0.0 }
0x11c8   :  { %3401 = vadd.xlane.f32.xlu0 %v3400_v42 }
0x11c9   :  { %v3403_v44 = vsel %vm71_vm0, %v12848_v41, 0.0 }
0x11ca   :  { %3404 = vadd.xlane.f32.xlu1 %v3403_v44 }
0x11cc   :  { %3661 = vadd.xlane.f32.xlu0 %v3660_v62 }
0x11d0   :  { %3664 = vadd.xlane.f32.xlu0 %v3663_v50  ;;  %v10632_v50 = vld [vmem:[#allocation5 + $0x60] ss:$0 sm:$0xff] }
0x1255   :  { %v3402_v40 = vpop.xlane.xlu0 %3401 }
0x1256   :  { %v3406_v59 = vmul.f32 0.03125, %v3402_v40 }
0x1257   :  { %v3405_v45 = vpop.xlane.xlu1 %3404 }
0x1258   :  { %v12864_v43 = vsub.f32 %v12840_v36, %v3406_v59  ;;  %v3407_v53 = vmul.f32 0.03125, %v3405_v45 }
0x1259   :  { %v3662_v47 = vpop.xlane.xlu0 %3661 }
0x125a   :  { %v12867_v57 = vsub.f32 %v12848_v41, %v3407_v53  ;;  %v3666_v61 = vmul.f32 0.03125, %v3662_v47  ;;  %v3410_v63 = vmul.f32 %v12864_v43, %v12864_v43  ;;  %v3424_v59 = vmul.f32 %v10632_v50, %v12864_v43  ;;  %v10646_v53 = vld [vmem:[#allocation5 + $0x80] ss:$0 sm:$0xff] }
0x125c   :  { %v12872_v2 = vsub.f32 %v12845_v39, %v3666_v61  ;;  %v3412_v3 = vsel %vm71_vm0, %v3410_v63, 0.0  ;;  %v3411_v0 = vmul.f32 %v12867_v57, %v12867_v57  ;;  %v3425_v45 = vmul.f32 %v10632_v50, %v12867_v57  ;;  %v10633_v63 = vld [vmem:[#allocation5 + $0x68] ss:$0 sm:$0xff]  ;;  %v11885_v57 = vld [vmem:[#allocation2 + $0xa8] sm:$0xff]  }
0x125d   :  { %3413 = vadd.xlane.f32.xlu0 %v3412_v3  ;;  %v3665_v52 = vpop.xlane.xlu0 %3664 }
0x125e   :  { %v3667_v46 = vmul.f32 0.03125, %v3665_v52  ;;  %v3415_v1 = vsel %vm71_vm0, %v3411_v0, 0.0  ;;  %v3670_v54 = vmul.f32 %v12872_v2, %v12872_v2  ;;  %v3684_v52 = vmul.f32 %v10646_v53, %v12872_v2 }
0x125f   :  { %3416 = vadd.xlane.f32.xlu1 %v3415_v1 }
0x1260   :  { %v12881_v55 = vsub.f32 %v12859_v58, %v3667_v46  ;;  %v3672_v51 = vsel %vm71_vm0, %v3670_v54, 0.0 }
0x1261   :  { %3673 = vadd.xlane.f32.xlu0 %v3672_v51  ;;  %v11884_v51 = vld [vmem:[#allocation2 + $0xa0] sm:$0xff]  }
0x1262   :  { %v3671_v56 = vmul.f32 %v12881_v55, %v12881_v55  ;;  %v3685_v54 = vmul.f32 %v10646_v53, %v12881_v55  ;;  %v11888_v55 = vld [vmem:[#allocation2 + $0x90] sm:$0xff]   ;;  %v63_v53 = vld [vmem:[%s13867_s3] sm:$0xff] }
0x1263   :  { %11308 = vmatpush3.bf16.msra.mxu1 %v11888_v55  ;;  %vm65_vm4 = vcmp.eq.s32.totalorder %v63_v53, 0 }
0x1264   :  { %v3675_v60 = vsel %vm71_vm0, %v3671_v56, 0.0  ;;  %11309 = vmatprep.subr.bf16.mxu1 %v12292_v15 }
0x1265   :  { %3676 = vadd.xlane.f32.xlu1 %v3675_v60 }
0x12ea   :  { %v3414_v8 = vpop.xlane.xlu0 %3413 }
0x12eb   :  { %v3418_v10 = vmul.f32 0.032258064, %v3414_v8  ;;  %v11889_v8 = vld [vmem:[#allocation2 + $0x98] sm:$0xff]  }
0x12ec   :  { %v3417_v11 = vpop.xlane.xlu1 %3416  ;;  %11310 = vmatpush3.bf16.msra.mxu1 %v11889_v8 }
0x12ed   :  { %12006 = vrsqrt.f32 %v3418_v10  ;;  %v3419_v12 = vmul.f32 0.032258064, %v3417_v11  ;;  %vm3428_vm7 = vcmp.eq.f32.partialorder %v3418_v10, inf  ;;  %v3431_v21 = vand.u32 2147483648, %v3418_v10  ;;  %11333 = vmatprep.subr.mxu1 %v12292_v15 }
0x12ee   :  { %v3674_v13 = vpop.xlane.xlu0 %3673  ;;  %vm3430_vm8 = vcmp.eq.f32.partialorder %v3418_v10, 0.0 }
0x12ef   :  { %v3678_v14 = vmul.f32 0.032258064, %v3674_v13  ;;  %12008 = vrsqrt.f32 %v3419_v12  ;;  %vm3435_vm11 = vcmp.eq.f32.partialorder %v3419_v12, inf  ;;  %v3438_v28 = vand.u32 2147483648, %v3419_v12 }
0x12f0   :  { %vm3437_vm12 = vcmp.eq.f32.partialorder %v3419_v12, 0.0 }
0x12f1   :  { %12010 = vrsqrt.f32 %v3678_v14  ;;  %vm3688_vm13 = vcmp.eq.f32.partialorder %v3678_v14, inf  ;;  %v3691_v31 = vand.u32 2147483648, %v3678_v14  ;;  %vm3690_vm14 = vcmp.eq.f32.partialorder %v3678_v14, 0.0 }
0x12f2   :  { %v3677_v16 = vpop.xlane.xlu1 %3676 }
0x12f3   :  { %v3679_v18 = vmul.f32 0.032258064, %v3677_v16 }
0x12f5   :  { %12012 = vrsqrt.f32 %v3679_v18  ;;  %vm3695_vm2 = vcmp.eq.f32.partialorder %v3679_v18, inf  ;;  %v3698_v38 = vand.u32 2147483648, %v3679_v18  ;;  %vm3697_vm3 = vcmp.eq.f32.partialorder %v3679_v18, 0.0 }
0x12f7   :  { %v12007_v19 = vpop.eup %12006 }
0x12f8   :  { %v3427_v20 = vmul.f32 %v12007_v19, %v3418_v10 }
0x12f9   :  { %v12009_v22 = vpop.eup %12008 }
0x12fa   :  { %v3429_v23 = vsel %vm3428_vm7, %v3418_v10, %v3427_v20  ;;  %v3434_v26 = vmul.f32 %v12009_v22, %v3419_v12  ;;  %v10634_v10 = vld [vmem:[#allocation5 + $0x70] ss:$0 sm:$0xff] }
0x12fb   :  { %v12011_v24 = vpop.eup %12010  ;;  %v3432_v25 = vsel %vm3430_vm8, %v3431_v21, %v3429_v23  ;;  %v10648_v21 = vld [vmem:[#allocation5 + $0x90] ss:$0 sm:$0xff] }
0x12fc   :  { %v3440_v27 = vadd.f32 1e-06, %v3432_v25  ;;  %v3687_v29 = vmul.f32 %v12011_v24, %v3678_v14  ;;  %v3436_v30 = vsel %vm3435_vm11, %v3419_v12, %v3434_v26 }
0x12fd   :  { %v3439_v32 = vsel %vm3437_vm12, %v3438_v28, %v3436_v30 }
0x12fe   :  { %12014 = vrcp.f32 %v3440_v27  ;;  %v3689_v48 = vsel %vm3688_vm13, %v3678_v14, %v3687_v29  ;;  %v3441_v33 = vadd.f32 1e-06, %v3439_v32 }
0x12ff   :  { %v12013_v49 = vpop.eup %12012  ;;  %v3692_v34 = vsel %vm3690_vm14, %v3691_v31, %v3689_v48 }
0x1300   :  { %v3700_v35 = vadd.f32 1e-06, %v3692_v34  ;;  %v3694_v37 = vmul.f32 %v12013_v49, %v3679_v18  ;;  %12016 = vrcp.f32 %v3441_v33 }
0x1302   :  { %12018 = vrcp.f32 %v3700_v35  ;;  %v3696_v42 = vsel %vm3695_vm2, %v3679_v18, %v3694_v37 }
0x1303   :  { %v3699_v44 = vsel %vm3697_vm3, %v3698_v38, %v3696_v42 }
0x1304   :  { %v3701_v62 = vadd.f32 1e-06, %v3699_v44 }
0x1306   :  { %12020 = vrcp.f32 %v3701_v62 }
0x1308   :  { %v12015_v40 = vpop.eup %12014 }
0x1309   :  { %v3443_v47 = vmul.f32 %v12015_v40, %v3424_v59 }
0x130a   :  { %v12017_v61 = vpop.eup %12016 }
0x130b   :  { %v3445_v0 = vmul.f32 %v12017_v61, %v3425_v45  ;;  %v3450_v46 = vadd.f32 %v10633_v63, %v3443_v47  ;;  %v13008_v47 = vsel %vm65_vm4, -1e+09, %v12292_v15 }
0x130c   :  { %v12019_v3 = vpop.eup %12018 }
0x130d   :  { %v3451_v1 = vadd.f32 %v10633_v63, %v3445_v0  ;;  %v3703_v56 = vmul.f32 %v12019_v3, %v3684_v52  ;;  %v64_v0 = vld [vmem:[%s13867_s3 + $0x8] sm:$0xff]  ;;  %s12300_s3 = smov [#allocation7]  }
0x130e   :  { %vm66_vm5 = vcmp.eq.s32.totalorder %v64_v0, 0 }
0x130f   :  { %v3466_v4 = vpack.c.bf16 %v3451_v1, %v3450_v46  ;;  %v3710_v6 = vadd.f32 %v10647_v5, %v3703_v56  ;;  %v13016_v1 = vsel %vm66_vm5, -1e+09, %v12292_v15 }
0x1310   :  { %v12021_v60 = vpop.eup %12020 }
0x1311   :  { %v3705_v43 = vmul.f32 %v12021_v60, %v3685_v54  ;;  %11300 = vmatmul.mubr.msk.bf16.vlgmr.msra.gmra.mrb[44].mxu0 %vm71_vm0, %v3466_v4 }
0x1312   :  { %11316 = vmatpush3.bf16.msra.mxu0 %v11884_v51  ;;  %11319 = vmatprep.mubr.msk.bf16.mxu0 %vm12293_vm1, %v12292_v15 }
0x1313   :  { %v3711_v7 = vadd.f32 %v10647_v5, %v3705_v43  ;;  %11317 = vmatprep.subr.bf16.mxu0 %v12292_v15 }
0x1315   :  { %v3722_v2 = vpack.c.bf16 %v3711_v7, %v3710_v6 }
0x1316   :  { %11318 = vmatpush3.bf16.msra.mxu0 %v11885_v57 }
0x1317   :  { %11323 = vmatprep.subr.mxu0 %v12292_v15 }
0x1319   :  { %11320 = vmatmul.mubr.msk.bf16.vlgmr.msra.gmra.mrb[48].mxu0 %vm71_vm0, %v3722_v2 }
0x131a   :  { %11325 = vmatprep.mubr.msk.f32.mxu0 %vm12293_vm1, %v12292_v15 }
0x13e4   :  { %v3520_v11 = vpop.f32.mrb[44].mxu0 }
0x13e5   :  { %v3521_v12 = vadd.f32 %v10634_v10, %v3520_v11  ;;  %v11301_v13 = vpop.f32.mrb[45].mxu0 }
0x13e6   :  { %v3523_v14 = vpop.f32.mrb[46].mxu0 }
0x13e7   :  { %v3524_v16 = vadd.f32 %v10634_v10, %v3523_v14  ;;  %v11302_v18 = vpop.f32.mrb[47].mxu0  ;;  %v3527_v19 = vmax.f32 %v3521_v12, 0.0 }
0x13e9   :  { %v3528_v20 = vmax.f32 %v3524_v16, 0.0 }
0x13eb   :  { %v3529_v22 = vpack.c.bf16 %v3528_v20, %v3527_v19 }
0x13ec   :  { %v3776_v23 = vpop.f32.mrb[48].mxu0 }
0x13ed   :  { %v12905_v24 = vadd.f32 %v10648_v21, %v3776_v23  ;;  %11312 = vmatmul.mubr.msk.bf16.vlgmr.msra.gmra.mrb[44].mxu1 %vm1799_vm15, %v3529_v22  ;;  %v11321_v25 = vpop.f32.mrb[49].mxu0 }
0x13ee   :  { %v3779_v26 = vpop.f32.mrb[50].mxu0  ;;  %11335 = vmatprep.mubr.msk.f32.mxu1 %vm12293_vm1, %v12292_v15 }
0x13ef   :  { %3789 = vrot.lane.b32.xlu1 %v12905_v24, %s12294_s0  ;;  %3785 = vrot.lane.b32.xlu0 %v12905_v24, %s12295_s5  ;;  %v11322_v27 = vpop.f32.mrb[51].mxu0  ;;  %v12914_v28 = vadd.f32 %v10648_v21, %v3779_v26 }
0x13f3   :  { %3793 = vrot.lane.b32.xlu0 %v12905_v24, %s12296_s28  ;;  %3787 = vrot.lane.b32.xlu1 %v12914_v28, %s12295_s5 }
0x13f7   :  { %3797 = vrot.lane.b32.xlu0 %v12905_v24, %s12297_s29  ;;  %3791 = vrot.lane.b32.xlu1 %v12914_v28, %s12294_s0 }
0x13fb   :  { %3795 = vrot.lane.b32.xlu1 %v12914_v28, %s12296_s28 }
0x13ff   :  { %3873 = vrot.lane.b32.xlu1 %v12914_v28, %s12297_s29 }
0x1461   :  { %v12928_v29 = vpop.permute.xlu1 %3789  ;;  %v12930_v30 = vpop.permute.xlu0 %3785 }
0x1462   :  { %3949 = vrot.lane.b32.xlu0 %v12930_v30, %s12297_s29 }
0x1465   :  { %v12934_v31 = vpop.permute.xlu0 %3793  ;;  %v12936_v32 = vpop.permute.xlu1 %3787 }
0x1466   :  { %4101 = vrot.lane.b32.xlu0 %v12928_v29, %s12297_s29  ;;  %4025 = vrot.lane.b32.xlu1 %v12936_v32, %s12297_s29 }
0x1469   :  { %v3798_v48 = vpop.permute.xlu0 %3797  ;;  %v12942_v49 = vpop.permute.xlu1 %3791 }
0x146a   :  { %4253 = vrot.lane.b32.xlu0 %v12934_v31, %s12297_s29  ;;  %11324 = vmatpush3.xpose.msk.msra.mxu0 %vm213_vm6, %v3798_v48 }
0x146b   :  { %4177 = vrot.lane.b32.xlu1 %v12942_v49, %s12297_s29  ;;  %11328 = vmatprep.subr.mxu0 %v12292_v15 }
0x146d   :  { %11326 = vmatmul.mubr.msk.f32.vlgmr.msra.gmra.mrb[52].mxu0 %vm213_vm6, %v12905_v24  ;;  %v12952_v33 = vpop.permute.xlu1 %3795 }
0x146e   :  { %11330 = vmatprep.mubr.msk.f32.mxu0 %vm12293_vm1, %v12292_v15 }
0x146f   :  { %4329 = vrot.lane.b32.xlu1 %v12952_v33, %s12297_s29 }
0x1471   :  { %v3874_v34 = vpop.permute.xlu1 %3873 }
0x1472   :  { %11329 = vmatpush3.xpose.msk.msra.mxu0 %vm213_vm6, %v3874_v34 }
0x1473   :  { %11338 = vmatprep.subr.mxu0 %v12292_v15 }
0x1475   :  { %11331 = vmatmul.mubr.msk.f32.vlgmr.msra.gmra.mrb[54].mxu0 %vm213_vm6, %v12914_v28 }
0x1476   :  { %11340 = vmatprep.mubr.msk.f32.mxu0 %vm12293_vm1, %v12292_v15 }
0x14c0   :  { %v12964_v35 = vpop.f32.mrb[44].mxu1 }
0x14c1   :  { %v11313_v37 = vpop.f32.mrb[45].mxu1 }
0x14c2   :  { %v12966_v38 = vpop.f32.mrb[46].mxu1 }
0x14c3   :  { %v11314_v42 = vpop.f32.mrb[47].mxu1 }
0x14d4   :  { %v3950_v44 = vpop.permute.xlu0 %3949 }
0x14d5   :  { %11334 = vmatpush3.xpose.msk.msra.mxu1 %vm213_vm6, %v3950_v44 }
0x14d6   :  { %11343 = vmatprep.subr.mxu1 %v12292_v15 }
0x14d8   :  { %11336 = vmatmul.mubr.msk.f32.vlgmr.msra.gmra.mrb[48].mxu1 %vm213_vm6, %v12930_v30  ;;  %v4102_v62 = vpop.permute.xlu0 %4101  ;;  %v4026_v50 = vpop.permute.xlu1 %4025 }
0x14d9   :  { %11339 = vmatpush3.xpose.msk.msra.mxu0 %vm213_vm6, %v4026_v50  ;;  %11344 = vmatpush3.xpose.msk.msra.mxu1 %vm213_vm6, %v4102_v62 }
0x14da   :  { %11345 = vmatprep.mubr.msk.f32.mxu1 %vm12293_vm1, %v12292_v15  ;;  %11353 = vmatprep.subr.mxu1 %v12292_v15 }
0x14db   :  { %11348 = vmatprep.subr.mxu0 %v12292_v15 }
0x14dc   :  { %11346 = vmatmul.mubr.msk.f32.vlgmr.msra.gmra.mrb[50].mxu1 %vm213_vm6, %v12928_v29  ;;  %v4254_v40 = vpop.permute.xlu0 %4253  ;;  %11341 = vmatmul.mubr.msk.f32.vlgmr.msra.gmra.mrb[56].mxu0 %vm213_vm6, %v12936_v32 }
0x14dd   :  { %v4178_v59 = vpop.permute.xlu1 %4177  ;;  %11354 = vmatpush3.xpose.msk.msra.mxu1 %vm213_vm6, %v4254_v40  ;;  %11350 = vmatprep.mubr.msk.f32.mxu0 %vm12293_vm1, %v12292_v15 }
0x14de   :  { %11349 = vmatpush3.xpose.msk.msra.mxu0 %vm213_vm6, %v4178_v59  ;;  %11355 = vmatprep.mubr.msk.f32.mxu1 %vm12293_vm1, %v12292_v15 }
0x14df   :  { %11358 = vmatprep.subr.mxu0 %v12292_v15  ;;  %11363 = vmatprep.subr.mxu1 %v12292_v15 }
0x14e0   :  { %11356 = vmatmul.mubr.msk.f32.vlgmr.msra.gmra.mrb[52].mxu1 %vm213_vm6, %v12934_v31 }
0x14e1   :  { %11351 = vmatmul.mubr.msk.f32.vlgmr.msra.gmra.mrb[58].mxu0 %vm213_vm6, %v12942_v49  ;;  %v4330_v45 = vpop.permute.xlu1 %4329  ;;  %11365 = vmatprep.mubr.msk.f32.mxu1 %vm12293_vm1, %v12292_v15 }
0x14e2   :  { %11359 = vmatpush3.xpose.msk.msra.mxu0 %vm213_vm6, %v4330_v45  ;;  %11360 = vmatprep.mubr.msk.f32.mxu0 %vm12293_vm1, %v12292_v15 }
0x14e3   :  { %11368 = vmatprep.subr.mxu0 %v12292_v15 }
0x14e5   :  { %11361 = vmatmul.mubr.msk.f32.vlgmr.msra.gmra.mrb[60].mxu0 %vm213_vm6, %v12952_v33 }
0x14e6   :  { %11370 = vmatprep.mubr.msk.f32.mxu0 %vm12293_vm1, %v12292_v15 }
0x1540   :  { %v3869_v61 = vpop.f32.mrb[52].mxu0 }
0x1541   :  { %v4405_v63 = vmul.f32 0.35355338, %v3869_v61  ;;  %v11327_v3 = vpop.f32.mrb[53].mxu0 }
0x1543   :  { %v4413_v52 = vadd.f32 %v4405_v63, %v13008_v47 }
0x1545   :  { %v4421_v46 = vsel %vm213_vm6, %v4413_v52, -inf }
0x1546   :  { %4422 = vmax.xlane.f32.xlu0 %v4421_v46 }
0x1548   :  { %v3945_v54 = vpop.f32.mrb[54].mxu0 }
0x1549   :  { %v4406_v51 = vmul.f32 0.35355338, %v3945_v54  ;;  %v11332_v56 = vpop.f32.mrb[55].mxu0 }
0x154b   :  { %v4414_v60 = vadd.f32 %v4406_v51, %v13016_v1 }
0x154d   :  { %v4424_v4 = vsel %vm213_vm6, %v4414_v60, -inf }
0x154e   :  { %4425 = vmax.xlane.f32.xlu1 %v4424_v4 }
0x15ab   :  { %v4021_v5 = vpop.f32.mrb[48].mxu1 }
0x15ac   :  { %v4407_v43 = vmul.f32 0.35355338, %v4021_v5  ;;  %v11337_v57 = vpop.f32.mrb[49].mxu1 }
0x15ae   :  { %v4415_v6 = vadd.f32 %v4407_v43, %v13008_v47 }
0x15af   :  { %v4097_v7 = vpop.f32.mrb[56].mxu0  ;;  %v4173_v2 = vpop.f32.mrb[50].mxu1 }
0x15b0   :  { %v4408_v55 = vmul.f32 0.35355338, %v4097_v7  ;;  %v11342_v8 = vpop.f32.mrb[57].mxu0  ;;  %v11347_v10 = vpop.f32.mrb[51].mxu1  ;;  %v4409_v11 = vmul.f32 0.35355338, %v4173_v2 }
0x15b1   :  { %v4427_v12 = vsel %vm213_vm6, %v4415_v6, -inf }
0x15b2   :  { %v4416_v13 = vadd.f32 %v4408_v55, %v13016_v1  ;;  %4428 = vmax.xlane.f32.xlu0 %v4427_v12  ;;  %v4417_v20 = vadd.f32 %v4409_v11, %v13008_v47 }
0x15b3   :  { %v4325_v14 = vpop.f32.mrb[52].mxu1 }
0x15b4   :  { %v4249_v16 = vpop.f32.mrb[58].mxu0  ;;  %v11357_v18 = vpop.f32.mrb[53].mxu1  ;;  %v4430_v19 = vsel %vm213_vm6, %v4416_v13, -inf  ;;  %v4411_v22 = vmul.f32 0.35355338, %v4325_v14  ;;  %v4433_v37 = vsel %vm213_vm6, %v4417_v20, -inf }
0x15b5   :  { %v4410_v21 = vmul.f32 0.35355338, %v4249_v16  ;;  %v11352_v23 = vpop.f32.mrb[59].mxu0 }
0x15b6   :  { %4431 = vmax.xlane.f32.xlu0 %v4430_v19  ;;  %v4419_v27 = vadd.f32 %v4411_v22, %v13008_v47 }
0x15b7   :  { %v4418_v25 = vadd.f32 %v4410_v21, %v13016_v1 }
0x15b8   :  { %v4401_v26 = vpop.f32.mrb[60].mxu0  ;;  %v4439_v62 = vsel %vm213_vm6, %v4419_v27, -inf }
0x15b9   :  { %v4412_v48 = vmul.f32 0.35355338, %v4401_v26  ;;  %v11362_v34 = vpop.f32.mrb[61].mxu0  ;;  %v4436_v42 = vsel %vm213_vm6, %v4418_v25, -inf }
0x15ba   :  { %4434 = vmax.xlane.f32.xlu0 %v4433_v37  ;;  %4437 = vmax.xlane.f32.xlu1 %v4436_v42 }
0x15bb   :  { %v4420_v44 = vadd.f32 %v4412_v48, %v13016_v1 }
0x15bd   :  { %v4442_v50 = vsel %vm213_vm6, %v4420_v44, -inf }
0x15be   :  { %4440 = vmax.xlane.f32.xlu0 %v4439_v62  ;;  %4443 = vmax.xlane.f32.xlu1 %v4442_v50 }
0x15cf   :  { %4585 = vrot.lane.b32.xlu1 %v12914_v28, %s12287_s7 }
0x15d3   :  { %4661 = vrot.lane.b32.xlu1 %v12930_v30, %s12287_s7  ;;  %v4423_v40 = vpop.xlane.xlu0 %4422 }
0x15d4   :  { %4509 = vrot.lane.b32.xlu0 %v12905_v24, %s12287_s7  ;;  %v4445_v59 = vsub.f32 %v4413_v52, %v4423_v40 }
0x15d6   :  { %v4453_v45 = vmul.f32 1.442695, %v4445_v59 }
0x15d7   :  { %4737 = vrot.lane.b32.xlu1 %v12936_v32, %s12287_s7 }
0x15d8   :  { %4813 = vrot.lane.b32.xlu0 %v12928_v29, %s12287_s7  ;;  %12022 = vpow2.f32 %v4453_v45 }
0x15db   :  { %4889 = vrot.lane.b32.xlu1 %v12942_v49, %s12287_s7  ;;  %v4426_v53 = vpop.xlane.xlu1 %4425 }
0x15dc   :  { %v4446_v28 = vsub.f32 %v4414_v60, %v4426_v53 }
0x15de   :  { %v4455_v61 = vmul.f32 1.442695, %v4446_v28 }
0x15e0   :  { %12024 = vpow2.f32 %v4455_v61 }
0x15e2   :  { %v13044_v30 = vpop.eup %12022 }
0x15e3   :  { %v4469_v24 = vsel %vm213_vm6, %v13044_v30, 0.0 }
0x15ea   :  { %v13048_v32 = vpop.eup %12024 }
0x15eb   :  { %v4472_v29 = vsel %vm213_vm6, %v13048_v32, 0.0 }
0x15f7   :  { %4470 = vadd.xlane.f32.xlu0 %v4469_v24 }
0x15ff   :  { %4473 = vadd.xlane.f32.xlu1 %v4472_v29 }
0x163f   :  { %v4429_v49 = vpop.xlane.xlu0 %4428 }
0x1640   :  { %v4447_v63 = vsub.f32 %v4415_v6, %v4429_v49 }
0x1642   :  { %v4457_v3 = vmul.f32 1.442695, %v4447_v63 }
0x1643   :  { %v4432_v0 = vpop.xlane.xlu0 %4431 }
0x1644   :  { %12026 = vpow2.f32 %v4457_v3  ;;  %v4448_v52 = vsub.f32 %v4416_v13, %v4432_v0 }
0x1646   :  { %v4459_v46 = vmul.f32 1.442695, %v4448_v52 }
0x1647   :  { %v4435_v54 = vpop.xlane.xlu0 %4434  ;;  %v4438_v51 = vpop.xlane.xlu1 %4437 }
0x1648   :  { %12028 = vpow2.f32 %v4459_v46  ;;  %v4449_v56 = vsub.f32 %v4417_v20, %v4435_v54  ;;  %v4450_v60 = vsub.f32 %v4418_v25, %v4438_v51 }
0x164a   :  { %v4461_v4 = vmul.f32 1.442695, %v4449_v56  ;;  %v4463_v5 = vmul.f32 1.442695, %v4450_v60 }
0x164b   :  { %v4441_v43 = vpop.xlane.xlu0 %4440  ;;  %v4444_v57 = vpop.xlane.xlu1 %4443 }
0x164c   :  { %12030 = vpow2.f32 %v4461_v4  ;;  %v4451_v7 = vsub.f32 %v4419_v27, %v4441_v43  ;;  %v4452_v2 = vsub.f32 %v4420_v44, %v4444_v57 }
0x164d   :  { %12032 = vpow2.f32 %v4463_v5 }
0x164e   :  { %v12027_v55 = vpop.eup %12026  ;;  %v4465_v6 = vmul.f32 1.442695, %v4451_v7  ;;  %v4467_v8 = vmul.f32 1.442695, %v4452_v2  ;;  %v11890_v7 = vld [vmem:[#allocation2 + $0xb0] sm:$0xff]  }
0x164f   :  { %v4510_v10 = vpop.permute.xlu0 %4509  ;;  %v4586_v11 = vpop.permute.xlu1 %4585  ;;  %v4475_v12 = vsel %vm213_vm6, %v12027_v55, 0.0 }
0x1650   :  { %12034 = vpow2.f32 %v4465_v6  ;;  %4476 = vadd.xlane.f32.xlu0 %v4475_v12  ;;  %11364 = vmatpush3.msra.mxu1 %v4510_v10  ;;  %v11891_v6 = vld [vmem:[#allocation2 + $0xb8] sm:$0xff]  }
0x1651   :  { %12036 = vpow2.f32 %v4467_v8  ;;  %11369 = vmatpush3.msra.mxu0 %v4586_v11  ;;  %11373 = vmatprep.subr.mxu1 %v12292_v15 }
0x1652   :  { %v12029_v13 = vpop.eup %12028  ;;  %11378 = vmatprep.subr.mxu0 %v12292_v15 }
0x1653   :  { %v4478_v14 = vsel %vm213_vm6, %v12029_v13, 0.0  ;;  %v4662_v26 = vpop.permute.xlu1 %4661  ;;  %v4814_v27 = vpop.permute.xlu0 %4813 }
0x1654   :  { %4479 = vadd.xlane.f32.xlu1 %v4478_v14 }
0x1656   :  { %v12031_v16 = vpop.eup %12030 }
0x1657   :  { %v12033_v18 = vpop.eup %12032  ;;  %v4481_v19 = vsel %vm213_vm6, %v12031_v16, 0.0  ;;  %v4738_v48 = vpop.permute.xlu1 %4737 }
0x1658   :  { %4482 = vadd.xlane.f32.xlu0 %v4481_v19  ;;  %v4484_v20 = vsel %vm213_vm6, %v12033_v18, 0.0 }
0x1659   :  { %4485 = vadd.xlane.f32.xlu1 %v4484_v20 }
0x165a   :  { %v13058_v21 = vpop.eup %12034 }
0x165b   :  { %v13060_v22 = vpop.eup %12036  ;;  %v4487_v23 = vsel %vm213_vm6, %v13058_v21, 0.0  ;;  %v4890_v37 = vpop.permute.xlu1 %4889 }
0x165c   :  { %4488 = vadd.xlane.f32.xlu0 %v4487_v23  ;;  %v4490_v25 = vsel %vm213_vm6, %v13060_v22, 0.0  ;;  %v10638_v23 = vld [vmem:[#allocation5 + $0x78] ss:$0 sm:$0xff] }
0x165d   :  { %4491 = vadd.xlane.f32.xlu1 %v4490_v25  ;;  %v3599_v25 = vadd.f32 %v10638_v23, %v12966_v38 }
0x166e   :  { %5041 = vrot.lane.b32.xlu1 %v12952_v33, %s12287_s7 }
0x1672   :  { %4965 = vrot.lane.b32.xlu0 %v12934_v31, %s12287_s7 }
0x1684   :  { %v4471_v34 = vpop.xlane.xlu0 %4470 }
0x1685   :  { %12038 = vrcp.f32 %v4471_v34 }
0x168c   :  { %v4474_v42 = vpop.xlane.xlu1 %4473 }
0x168d   :  { %12040 = vrcp.f32 %v4474_v42 }
0x168f   :  { %v12039_v44 = vpop.eup %12038 }
0x1690   :  { %v4501_v62 = vmul.f32 %v12039_v44, %v13044_v30 }
0x1692   :  { %11366 = vmatmul.mubr.msk.f32.vlgmr.msra.gmra.mrb[54].mxu1 %vm213_vm6, %v4501_v62 }
0x1693   :  { %11374 = vmatpush3.msra.mxu1 %v4662_v26  ;;  %11375 = vmatprep.mubr.msk.f32.mxu1 %vm12293_vm1, %v12292_v15  ;;  %v3596_v26 = vadd.f32 %v10638_v23, %v12964_v35 }
0x1694   :  { %11383 = vmatprep.subr.mxu1 %v12292_v15 }
0x1697   :  { %v12041_v31 = vpop.eup %12040 }
0x1698   :  { %v4502_v33 = vmul.f32 %v12041_v31, %v13048_v32 }
0x169a   :  { %11371 = vmatmul.mubr.msk.f32.vlgmr.msra.gmra.mrb[62].mxu0 %vm213_vm6, %v4502_v33 }
0x169b   :  { %11379 = vmatpush3.msra.mxu0 %v4738_v48  ;;  %11380 = vmatprep.mubr.msk.f32.mxu0 %vm12293_vm1, %v12292_v15  ;;  %v3602_v48 = vadd.f32 %v3596_v26, %v12840_v36 }
0x169c   :  { %11388 = vmatprep.subr.mxu0 %v12292_v15 }
0x16dd   :  { %v4477_v50 = vpop.xlane.xlu0 %4476 }
0x16de   :  { %12042 = vrcp.f32 %v4477_v50 }
0x16e1   :  { %v4480_v40 = vpop.xlane.xlu1 %4479 }
0x16e2   :  { %12044 = vrcp.f32 %v4480_v40 }
0x16e5   :  { %v4483_v59 = vpop.xlane.xlu0 %4482 }
0x16e6   :  { %12046 = vrcp.f32 %v4483_v59  ;;  %v4486_v45 = vpop.xlane.xlu1 %4485 }
0x16e7   :  { %12048 = vrcp.f32 %v4486_v45 }
0x16e8   :  { %v12043_v53 = vpop.eup %12042 }
0x16e9   :  { %v4489_v28 = vpop.xlane.xlu0 %4488  ;;  %v4503_v61 = vmul.f32 %v12043_v53, %v12027_v55 }
0x16ea   :  { %12050 = vrcp.f32 %v4489_v28  ;;  %v4492_v30 = vpop.xlane.xlu1 %4491 }
0x16eb   :  { %12052 = vrcp.f32 %v4492_v30  ;;  %11376 = vmatmul.mubr.msk.f32.vlgmr.msra.gmra.mrb[56].mxu1 %vm213_vm6, %v4503_v61 }
0x16ec   :  { %v12045_v24 = vpop.eup %12044  ;;  %11384 = vmatpush3.msra.mxu1 %v4814_v27  ;;  %11385 = vmatprep.mubr.msk.f32.mxu1 %vm12293_vm1, %v12292_v15  ;;  %v3603_v27 = vadd.f32 %v3599_v25, %v12848_v41 }
0x16ed   :  { %v4504_v32 = vmul.f32 %v12045_v24, %v12029_v13  ;;  %11393 = vmatprep.subr.mxu1 %v12292_v15  ;;  %v4966_v0 = vpop.permute.xlu0 %4965 }
0x16ee   :  { %v5042_v46 = vpop.permute.xlu1 %5041  ;;  %v3609_v34 = vsel %vm71_vm0, %v3603_v27, 0.0 }
0x16ef   :  { %11381 = vmatmul.mubr.msk.f32.vlgmr.msra.gmra.mrb[64].mxu0 %vm213_vm6, %v4504_v32 }
0x16f0   :  { %v12047_v29 = vpop.eup %12046  ;;  %11389 = vmatpush3.msra.mxu0 %v4890_v37  ;;  %11390 = vmatprep.mubr.msk.f32.mxu0 %vm12293_vm1, %v12292_v15  ;;  %v3606_v37 = vsel %vm71_vm0, %v3602_v48, 0.0 }
0x16f1   :  { %v12049_v49 = vpop.eup %12048  ;;  %11398 = vmatprep.subr.mxu0 %v12292_v15  ;;  %v4505_v63 = vmul.f32 %v12047_v29, %v12031_v16 }
0x16f2   :  { %v4506_v3 = vmul.f32 %v12049_v49, %v12033_v18 }
0x16f3   :  { %11386 = vmatmul.mubr.msk.f32.vlgmr.msra.gmra.mrb[58].mxu1 %vm213_vm6, %v4505_v63 }
0x16f4   :  { %v12051_v52 = vpop.eup %12050  ;;  %11391 = vmatmul.mubr.msk.f32.vlgmr.msra.gmra.mrb[66].mxu0 %vm213_vm6, %v4506_v3  ;;  %11394 = vmatpush3.msra.mxu1 %v4966_v0  ;;  %v10676_v3 = vld [vmem:[#allocation5 + $0x98] ss:$0 sm:$0xff] }
0x16f5   :  { %v12053_v54 = vpop.eup %12052  ;;  %11399 = vmatpush3.msra.mxu0 %v5042_v46  ;;  %11395 = vmatprep.mubr.msk.f32.mxu1 %vm12293_vm1, %v12292_v15  ;;  %v4507_v51 = vmul.f32 %v12051_v52, %v13058_v21 }
0x16f6   :  { %11400 = vmatprep.mubr.msk.f32.mxu0 %vm12293_vm1, %v12292_v15  ;;  %v4508_v56 = vmul.f32 %v12053_v54, %v13060_v22  ;;  %11403 = vmatprep.subr.bf16.mxu1 %v12292_v15 }
0x16f7   :  { %11396 = vmatmul.mubr.msk.f32.vlgmr.msra.gmra.mrb[60].mxu1 %vm213_vm6, %v4507_v51  ;;  %11411 = vmatprep.subr.bf16.mxu0 %v12292_v15 }
0x16f8   :  { %11401 = vmatmul.mubr.msk.f32.vlgmr.msra.gmra.mrb[68].mxu0 %vm213_vm6, %v4508_v56  ;;  %11407 = vmatprep.mubr.msk.bf16.mxu1 %vm12293_vm1, %v12292_v15 }
0x16f9   :  { %11415 = vmatprep.mubr.msk.bf16.mxu0 %vm12293_vm1, %v12292_v15  ;;  %11404 = vmatpush3.bf16.msra.mxu1 %v11890_v7 }
0x16fa   :  { %11405 = vmatprep.subr.bf16.mxu1 %v12292_v15 }
0x16fd   :  { %11406 = vmatpush3.bf16.msra.mxu1 %v11891_v6  ;;  %v11893_v6 = vld [vmem:[#allocation2 + $0xc8] sm:$0xff]  }
0x16fe   :  { %11419 = vmatprep.subr.bf16.mxu1 %v12292_v15 }
0x1765   :  { %v4581_v60 = vpop.f32.mrb[54].mxu1 }
0x1766   :  { %v11367_v4 = vpop.f32.mrb[55].mxu1 }
0x176d   :  { %v4657_v5 = vpop.f32.mrb[62].mxu0 }
0x176e   :  { %v11372_v43 = vpop.f32.mrb[63].mxu0 }
0x17be   :  { %v4733_v57 = vpop.f32.mrb[56].mxu1 }
0x17bf   :  { %v11377_v2 = vpop.f32.mrb[57].mxu1 }
0x17c2   :  { %v4809_v55 = vpop.f32.mrb[64].mxu0 }
0x17c3   :  { %v11808_v8 = vpack.i.bf16 %v4809_v55, %v4733_v57  ;;  %v11382_v10 = vpop.f32.mrb[65].mxu0 }
0x17c5   :  { %11809 = vrot.lane.b32.xlu0 %v11808_v8, %s12291_s21 }
0x17c6   :  { %v4885_v11 = vpop.f32.mrb[58].mxu1 }
0x17c7   :  { %v4961_v12 = vpop.f32.mrb[66].mxu0  ;;  %v11387_v13 = vpop.f32.mrb[59].mxu1 }
0x17c8   :  { %v11813_v14 = vpack.i.bf16 %v4961_v12, %v4885_v11  ;;  %v11392_v16 = vpop.f32.mrb[67].mxu0 }
0x17ca   :  { %11814 = vrot.lane.b32.xlu1 %v11813_v14, %s12298_s2  ;;  %v5037_v18 = vpop.f32.mrb[60].mxu1 }
0x17cb   :  { %v5113_v19 = vpop.f32.mrb[68].mxu0  ;;  %v11397_v20 = vpop.f32.mrb[61].mxu1 }
0x17cc   :  { %v11818_v21 = vpack.i.bf16 %v5113_v19, %v5037_v18  ;;  %v11402_v22 = vpop.f32.mrb[69].mxu0 }
0x17ce   :  { %11819 = vrot.lane.b32.xlu0 %v11818_v21, %s12299_s11 }
0x17ed   :  { %3610 = vadd.xlane.f32.xlu0 %v3609_v34 }
0x17ee   :  { %3607 = vadd.xlane.f32.xlu1 %v3606_v37 }
0x1837   :  { %v11810_v42 = vpop.permute.xlu0 %11809 }
0x1838   :  { %v11812_v62 = vunpack.i.h.bf16 %v11810_v42  ;;  %v11811_v31 = vunpack.i.l.bf16 %v11810_v42 }
0x183a   :  { %v5142_v38 = vsel %vm213_vm6, %v4657_v5, %v11812_v62  ;;  %v5141_v35 = vsel %vm213_vm6, %v4581_v60, %v11811_v31 }
0x183c   :  { %v11815_v44 = vpop.permute.xlu1 %11814 }
0x183d   :  { %v11817_v33 = vunpack.i.h.bf16 %v11815_v44  ;;  %v11816_v50 = vunpack.i.l.bf16 %v11815_v44 }
0x183f   :  { %v5144_v36 = vsel %vm1570_vm9, %v5142_v38, %v11817_v33  ;;  %v5143_v45 = vsel %vm1570_vm9, %v5141_v35, %v11816_v50 }
0x1840   :  { %v11820_v40 = vpop.permute.xlu0 %11819 }
0x1841   :  { %v11822_v41 = vunpack.i.h.bf16 %v11820_v40  ;;  %v11821_v59 = vunpack.i.l.bf16 %v11820_v40  ;;  %v10644_v40 = vld [vmem:[#allocation5 + $0x140] ss:$0 sm:$0xff] }
0x1843   :  { %v5146_v53 = vsel %vm1573_vm10, %v5144_v36, %v11822_v41  ;;  %v5145_v28 = vsel %vm1573_vm10, %v5143_v45, %v11821_v59  ;;  %v10645_v45 = vld [vmem:[#allocation5 + $0x148] ss:$0 sm:$0xff] }
0x1844   :  { %v5147_v61 = vpack.c.bf16 %v5146_v53, %v5145_v28 }
0x1846   :  { %11408 = vmatmul.mubr.msk.bf16.vlgmr.msra.gmra.mrb[64].mxu1 %vm71_vm0, %v5147_v61 }
0x1847   :  { %11423 = vmatprep.mubr.msk.bf16.mxu1 %vm12293_vm1, %v12292_v15 }
0x187a   :  { %v3611_v63 = vpop.xlane.xlu0 %3610 }
0x187b   :  { %v3608_v30 = vpop.xlane.xlu1 %3607  ;;  %v3613_v52 = vmul.f32 0.03125, %v3611_v63 }
0x187c   :  { %v3612_v24 = vmul.f32 0.03125, %v3608_v30 }
0x187d   :  { %v3615_v5 = vsub.f32 %v3603_v27, %v3613_v52 }
0x187e   :  { %v13124_v32 = vsub.f32 %v3602_v48, %v3612_v24 }
0x187f   :  { %v3617_v2 = vmul.f32 %v3615_v5, %v3615_v5  ;;  %v3631_v41 = vmul.f32 %v10644_v40, %v3615_v5 }
0x1880   :  { %v3616_v29 = vmul.f32 %v13124_v32, %v13124_v32  ;;  %v3630_v35 = vmul.f32 %v10644_v40, %v13124_v32 }
0x1881   :  { %v3621_v55 = vsel %vm71_vm0, %v3617_v2, 0.0  ;;  %v10680_v2 = vld [vmem:[#allocation5 + $0xa0] ss:$0 sm:$0xff] }
0x1882   :  { %v3618_v49 = vsel %vm71_vm0, %v3616_v29, 0.0 }
0x1883   :  { %3619 = vadd.xlane.f32.xlu1 %v3618_v49 }
0x1919   :  { %v5201_v0 = vpop.f32.mrb[64].mxu1 }
0x191a   :  { %v5202_v46 = vadd.f32 %v10676_v3, %v5201_v0  ;;  %v11409_v54 = vpop.f32.mrb[65].mxu1 }
0x191b   :  { %v5204_v51 = vpop.f32.mrb[66].mxu1 }
0x191c   :  { %v13130_v56 = vadd.f32 %v5202_v46, %v12845_v39  ;;  %v5205_v60 = vadd.f32 %v10676_v3, %v5204_v51  ;;  %v11410_v4 = vpop.f32.mrb[67].mxu1  ;;  %v11892_v39 = vld [vmem:[#allocation2 + $0xc0] sm:$0xff]  }
0x191d   :  { %11420 = vmatpush3.bf16.msra.mxu1 %v11892_v39  ;;  %11412 = vmatpush3.bf16.msra.mxu0 %v11892_v39 }
0x191e   :  { %v13133_v43 = vadd.f32 %v5205_v60, %v12859_v58  ;;  %v5212_v57 = vsel %vm71_vm0, %v13130_v56, 0.0  ;;  %11421 = vmatprep.subr.bf16.mxu1 %v12292_v15  ;;  %11413 = vmatprep.subr.bf16.mxu0 %v12292_v15  ;;  %v3620_v58 = vpop.xlane.xlu1 %3619 }
0x191f   :  { %5213 = vadd.xlane.f32.xlu0 %v5212_v57  ;;  %v3624_v8 = vmul.f32 0.032258064, %v3620_v58 }
0x1920   :  { %v5215_v7 = vsel %vm71_vm0, %v13133_v43, 0.0 }
0x1921   :  { %11422 = vmatpush3.bf16.msra.mxu1 %v11893_v6  ;;  %11414 = vmatpush3.bf16.msra.mxu0 %v11893_v6  ;;  %12054 = vrsqrt.f32 %v3624_v8  ;;  %vm3634_vm7 = vcmp.eq.f32.partialorder %v3624_v8, inf  ;;  %v3637_v48 = vand.u32 2147483648, %v3624_v8  ;;  %vm3636_vm8 = vcmp.eq.f32.partialorder %v3624_v8, 0.0 }
0x1922   :  { %11427 = vmatprep.subr.mxu0 %v12292_v15  ;;  %11437 = vmatprep.subr.mxu1 %v12292_v15 }
0x1923   :  { %5216 = vadd.xlane.f32.xlu0 %v5215_v7 }
0x1927   :  { %3622 = vadd.xlane.f32.xlu0 %v3621_v55 }
0x192b   :  { %v12055_v18 = vpop.eup %12054 }
0x192c   :  { %v3633_v25 = vmul.f32 %v12055_v18, %v3624_v8  ;;  %v10682_v18 = vld [vmem:[#allocation5 + $0xb0] ss:$0 sm:$0xff] }
0x192e   :  { %v3635_v27 = vsel %vm3634_vm7, %v3624_v8, %v3633_v25 }
0x192f   :  { %v3638_v34 = vsel %vm3636_vm8, %v3637_v48, %v3635_v27 }
0x1930   :  { %v3646_v37 = vadd.f32 1e-06, %v3638_v34 }
0x19ac   :  { %v5214_v10 = vpop.xlane.xlu0 %5213 }
0x19ad   :  { %v5218_v11 = vmul.f32 0.03125, %v5214_v10  ;;  %v10681_v10 = vld [vmem:[#allocation5 + $0xa8] ss:$0 sm:$0xff] }
0x19af   :  { %v13145_v12 = vsub.f32 %v13130_v56, %v5218_v11 }
0x19b0   :  { %v5217_v13 = vpop.xlane.xlu0 %5216 }
0x19b1   :  { %v5219_v14 = vmul.f32 0.03125, %v5217_v13  ;;  %v5222_v16 = vmul.f32 %v13145_v12, %v13145_v12  ;;  %v5236_v39 = vmul.f32 %v10680_v2, %v13145_v12 }
0x19b3   :  { %v13150_v19 = vsub.f32 %v13133_v43, %v5219_v14  ;;  %v5224_v20 = vsel %vm71_vm0, %v5222_v16, 0.0 }
0x19b4   :  { %5225 = vadd.xlane.f32.xlu1 %v5224_v20  ;;  %v3623_v21 = vpop.xlane.xlu0 %3622 }
0x19b5   :  { %v3625_v22 = vmul.f32 0.032258064, %v3623_v21  ;;  %v5223_v23 = vmul.f32 %v13150_v19, %v13150_v19  ;;  %v5237_v6 = vmul.f32 %v10680_v2, %v13150_v19 }
0x19b7   :  { %12056 = vrsqrt.f32 %v3625_v22  ;;  %v5227_v26 = vsel %vm71_vm0, %v5223_v23, 0.0  ;;  %vm3641_vm11 = vcmp.eq.f32.partialorder %v3625_v22, inf  ;;  %v3644_v62 = vand.u32 2147483648, %v3625_v22 }
0x19b8   :  { %5228 = vadd.xlane.f32.xlu0 %v5227_v26  ;;  %12058 = vrcp.f32 %v3646_v37  ;;  %vm3643_vm12 = vcmp.eq.f32.partialorder %v3625_v22, 0.0 }
0x19c1   :  { %v12057_v42 = vpop.eup %12056 }
0x19c2   :  { %v3640_v44 = vmul.f32 %v12057_v42, %v3625_v22  ;;  %v12059_v38 = vpop.eup %12058 }
0x19c3   :  { %v3649_v59 = vmul.f32 %v12059_v38, %v3630_v35 }
0x19c4   :  { %v3642_v31 = vsel %vm3641_vm11, %v3625_v22, %v3640_v44 }
0x19c5   :  { %v3645_v33 = vsel %vm3643_vm12, %v3644_v62, %v3642_v31  ;;  %v3656_v28 = vadd.f32 %v10645_v45, %v3649_v59 }
0x19c6   :  { %v3647_v50 = vadd.f32 1e-06, %v3645_v33 }
0x19c8   :  { %12060 = vrcp.f32 %v3647_v50 }
0x19d2   :  { %v12061_v36 = vpop.eup %12060 }
0x19d3   :  { %v3651_v53 = vmul.f32 %v12061_v36, %v3631_v41 }
0x19d5   :  { %v3657_v61 = vadd.f32 %v10645_v45, %v3651_v53 }
0x19d7   :  { %v13157_v30 = vpack.c.bf16 %v3657_v61, %v3656_v28 }
0x19d9   :  { %11424 = vmatmul.mubr.msk.bf16.vlgmr.msra.gmra.mrb[68].mxu1 %vm71_vm0, %v13157_v30 }
0x19da   :  { %11439 = vmatprep.mubr.msk.f32.mxu1 %vm12293_vm1, %v12292_v15 }
0x1a41   :  { %v5226_v24 = vpop.xlane.xlu1 %5225 }
0x1a42   :  { %v5230_v29 = vmul.f32 0.032258064, %v5226_v24 }
0x1a44   :  { %12062 = vrsqrt.f32 %v5230_v29  ;;  %vm5240_vm13 = vcmp.eq.f32.partialorder %v5230_v29, inf  ;;  %v5243_v0 = vand.u32 2147483648, %v5230_v29  ;;  %vm5242_vm14 = vcmp.eq.f32.partialorder %v5230_v29, 0.0 }
0x1a45   :  { %v5229_v49 = vpop.xlane.xlu0 %5228 }
0x1a46   :  { %v5231_v32 = vmul.f32 0.032258064, %v5229_v49 }
0x1a48   :  { %12064 = vrsqrt.f32 %v5231_v32  ;;  %vm5247_vm2 = vcmp.eq.f32.partialorder %v5231_v32, inf  ;;  %v5250_v4 = vand.u32 2147483648, %v5231_v32  ;;  %vm5249_vm3 = vcmp.eq.f32.partialorder %v5231_v32, 0.0 }
0x1a4e   :  { %v12063_v63 = vpop.eup %12062 }
0x1a4f   :  { %v5239_v3 = vmul.f32 %v12063_v63, %v5230_v29 }
0x1a51   :  { %v5241_v52 = vsel %vm5240_vm13, %v5230_v29, %v5239_v3 }
0x1a52   :  { %v5244_v46 = vsel %vm5242_vm14, %v5243_v0, %v5241_v52  ;;  %v12065_v54 = vpop.eup %12064 }
0x1a53   :  { %v5252_v51 = vadd.f32 1e-06, %v5244_v46  ;;  %v5246_v60 = vmul.f32 %v12065_v54, %v5231_v32 }
0x1a55   :  { %12066 = vrcp.f32 %v5252_v51  ;;  %v5248_v5 = vsel %vm5247_vm2, %v5231_v32, %v5246_v60 }
0x1a56   :  { %v5251_v57 = vsel %vm5249_vm3, %v5250_v4, %v5248_v5 }
0x1a57   :  { %v5253_v7 = vadd.f32 1e-06, %v5251_v57 }
0x1a59   :  { %12068 = vrcp.f32 %v5253_v7 }
0x1a5f   :  { %v12067_v55 = vpop.eup %12066 }
0x1a60   :  { %v5255_v58 = vmul.f32 %v12067_v55, %v5236_v39 }
0x1a62   :  { %v5262_v13 = vadd.f32 %v10681_v10, %v5255_v58 }
0x1a63   :  { %v12069_v8 = vpop.eup %12068 }
0x1a64   :  { %v5257_v11 = vmul.f32 %v12069_v8, %v5237_v6 }
0x1a66   :  { %v5263_v14 = vadd.f32 %v10681_v10, %v5257_v11 }
0x1a68   :  { %v5274_v16 = vpack.c.bf16 %v5263_v14, %v5262_v13 }
0x1a6a   :  { %11416 = vmatmul.mubr.msk.bf16.vlgmr.msra.gmra.mrb[72].mxu0 %vm71_vm0, %v5274_v16 }
0x1a6b   :  { %11429 = vmatprep.mubr.msk.f32.mxu0 %vm12293_vm1, %v12292_v15 }
0x1aac   :  { %v5373_v20 = vpop.f32.mrb[68].mxu1 }
0x1aad   :  { %v13168_v21 = vadd.f32 %v10682_v18, %v5373_v20  ;;  %v11425_v22 = vpop.f32.mrb[69].mxu1 }
0x1aae   :  { %v5376_v12 = vpop.f32.mrb[70].mxu1 }
0x1aaf   :  { %v13170_v23 = vadd.f32 %v10682_v18, %v5376_v12  ;;  %5396 = vrot.lane.b32.xlu1 %v13168_v21, %s12295_s5  ;;  %v11426_v19 = vpop.f32.mrb[71].mxu1 }
0x1ab1   :  { %5398 = vrot.lane.b32.xlu0 %v13170_v23, %s12295_s5 }
0x1ab3   :  { %5400 = vrot.lane.b32.xlu1 %v13168_v21, %s12294_s0 }
0x1ab5   :  { %5406 = vrot.lane.b32.xlu0 %v13170_v23, %s12296_s28 }
0x1ab7   :  { %5402 = vrot.lane.b32.xlu1 %v13170_v23, %s12294_s0 }
0x1ab9   :  { %5484 = vrot.lane.b32.xlu0 %v13170_v23, %s12297_s29 }
0x1abb   :  { %5404 = vrot.lane.b32.xlu1 %v13168_v21, %s12296_s28 }
0x1abf   :  { %5408 = vrot.lane.b32.xlu1 %v13168_v21, %s12297_s29 }
0x1b21   :  { %v13188_v25 = vpop.permute.xlu1 %5396 }
0x1b22   :  { %5560 = vrot.lane.b32.xlu1 %v13188_v25, %s12297_s29 }
0x1b23   :  { %v13192_v26 = vpop.permute.xlu0 %5398 }
0x1b24   :  { %5636 = vrot.lane.b32.xlu0 %v13192_v26, %s12297_s29 }
0x1b25   :  { %v13196_v27 = vpop.permute.xlu1 %5400 }
0x1b26   :  { %5712 = vrot.lane.b32.xlu1 %v13196_v27, %s12297_s29 }
0x1b27   :  { %v13204_v34 = vpop.permute.xlu0 %5406 }
0x1b29   :  { %v13200_v48 = vpop.permute.xlu1 %5402 }
0x1b2a   :  { %5788 = vrot.lane.b32.xlu0 %v13200_v48, %s12297_s29 }
0x1b2b   :  { %v5485_v50 = vpop.permute.xlu0 %5484 }
0x1b2d   :  { %v13206_v37 = vpop.permute.xlu1 %5404 }
0x1b2e   :  { %5864 = vrot.lane.b32.xlu1 %v13206_v37, %s12297_s29  ;;  %5940 = vrot.lane.b32.xlu0 %v13204_v34, %s12297_s29 }
0x1b31   :  { %v5409_v42 = vpop.permute.xlu1 %5408 }
0x1b32   :  { %11428 = vmatpush3.xpose.msk.msra.mxu0 %vm213_vm6, %v5409_v42 }
0x1b33   :  { %11432 = vmatprep.subr.mxu0 %v12292_v15 }
0x1b3d   :  { %v5328_v44 = vpop.f32.mrb[72].mxu0 }
0x1b3e   :  { %v5329_v62 = vadd.f32 %v10682_v18, %v5328_v44  ;;  %v11417_v31 = vpop.f32.mrb[73].mxu0 }
0x1b3f   :  { %v5331_v33 = vpop.f32.mrb[74].mxu0 }
0x1b40   :  { %v5332_v40 = vadd.f32 %v10682_v18, %v5331_v33  ;;  %5382 = vrot.lane.b32.xlu1 %v5329_v62, %s12295_s5  ;;  %v11418_v38 = vpop.f32.mrb[75].mxu0  ;;  %11430 = vmatmul.mubr.msk.f32.vlgmr.msra.gmra.mrb[70].mxu0 %vm213_vm6, %v5329_v62 }
0x1b41   :  { %11433 = vmatpush3.xpose.msk.msra.mxu0 %vm213_vm6, %v5485_v50  ;;  %11434 = vmatprep.mubr.msk.f32.mxu0 %vm12293_vm1, %v12292_v15 }
0x1b42   :  { %5384 = vrot.lane.b32.xlu0 %v5332_v40, %s12295_s5  ;;  %11442 = vmatprep.subr.mxu0 %v12292_v15 }
0x1b44   :  { %5386 = vrot.lane.b32.xlu1 %v5329_v62, %s12294_s0  ;;  %11435 = vmatmul.mubr.msk.f32.vlgmr.msra.gmra.mrb[76].mxu0 %vm213_vm6, %v5332_v40 }
0x1b45   :  { %11444 = vmatprep.mubr.msk.f32.mxu0 %vm12293_vm1, %v12292_v15 }
0x1b46   :  { %5388 = vrot.lane.b32.xlu0 %v5332_v40, %s12294_s0 }
0x1b48   :  { %5390 = vrot.lane.b32.xlu1 %v5329_v62, %s12296_s28 }
0x1b4a   :  { %5392 = vrot.lane.b32.xlu0 %v5332_v40, %s12296_s28 }
0x1b94   :  { %v5561_v35 = vpop.permute.xlu1 %5560 }
0x1b95   :  { %11438 = vmatpush3.xpose.msk.msra.mxu1 %vm213_vm6, %v5561_v35 }
0x1b96   :  { %v5637_v41 = vpop.permute.xlu0 %5636  ;;  %11447 = vmatprep.subr.mxu1 %v12292_v15 }
0x1b97   :  { %11443 = vmatpush3.xpose.msk.msra.mxu0 %vm213_vm6, %v5637_v41 }
0x1b98   :  { %11452 = vmatprep.subr.mxu0 %v12292_v15  ;;  %v5713_v59 = vpop.permute.xlu1 %5712 }
0x1b9c   :  { %v5789_v36 = vpop.permute.xlu0 %5788 }
0x1ba0   :  { %v5865_v45 = vpop.permute.xlu1 %5864  ;;  %v5941_v53 = vpop.permute.xlu0 %5940 }
0x1bb2   :  { %v5383_v28 = vpop.permute.xlu1 %5382 }
0x1bb3   :  { %11440 = vmatmul.mubr.msk.f32.vlgmr.msra.gmra.mrb[62].mxu1 %vm213_vm6, %v5383_v28 }
0x1bb4   :  { %11448 = vmatpush3.xpose.msk.msra.mxu1 %vm213_vm6, %v5713_v59  ;;  %v5385_v61 = vpop.permute.xlu0 %5384  ;;  %11449 = vmatprep.mubr.msk.f32.mxu1 %vm12293_vm1, %v12292_v15 }
0x1bb5   :  { %11445 = vmatmul.mubr.msk.f32.vlgmr.msra.gmra.mrb[78].mxu0 %vm213_vm6, %v5385_v61  ;;  %11457 = vmatprep.subr.mxu1 %v12292_v15 }
0x1bb6   :  { %11453 = vmatpush3.xpose.msk.msra.mxu0 %vm213_vm6, %v5789_v36  ;;  %v5387_v24 = vpop.permute.xlu1 %5386  ;;  %11454 = vmatprep.mubr.msk.f32.mxu0 %vm12293_vm1, %v12292_v15 }
0x1bb7   :  { %11450 = vmatmul.mubr.msk.f32.vlgmr.msra.gmra.mrb[72].mxu1 %vm213_vm6, %v5387_v24  ;;  %11462 = vmatprep.subr.mxu0 %v12292_v15 }
0x1bb8   :  { %11458 = vmatpush3.xpose.msk.msra.mxu1 %vm213_vm6, %v5865_v45  ;;  %v5389_v29 = vpop.permute.xlu0 %5388  ;;  %11459 = vmatprep.mubr.msk.f32.mxu1 %vm12293_vm1, %v12292_v15 }
0x1bb9   :  { %11455 = vmatmul.mubr.msk.f32.vlgmr.msra.gmra.mrb[80].mxu0 %vm213_vm6, %v5389_v29  ;;  %11467 = vmatprep.subr.mxu1 %v12292_v15 }
0x1bba   :  { %11463 = vmatpush3.xpose.msk.msra.mxu0 %vm213_vm6, %v5941_v53  ;;  %v5391_v49 = vpop.permute.xlu1 %5390  ;;  %11464 = vmatprep.mubr.msk.f32.mxu0 %vm12293_vm1, %v12292_v15 }
0x1bbb   :  { %11460 = vmatmul.mubr.msk.f32.vlgmr.msra.gmra.mrb[74].mxu1 %vm213_vm6, %v5391_v49  ;;  %11472 = vmatprep.subr.mxu0 %v12292_v15 }
0x1bbc   :  { %v5393_v32 = vpop.permute.xlu0 %5392  ;;  %11469 = vmatprep.mubr.msk.f32.mxu1 %vm12293_vm1, %v12292_v15 }
0x1bbd   :  { %11465 = vmatmul.mubr.msk.f32.vlgmr.msra.gmra.mrb[82].mxu0 %vm213_vm6, %v5393_v32 }
0x1bbe   :  { %11474 = vmatprep.mubr.msk.f32.mxu0 %vm12293_vm1, %v12292_v15 }
0x1c13   :  { %v5480_v63 = vpop.f32.mrb[70].mxu0 }
0x1c14   :  { %v6016_v3 = vmul.f32 0.35355338, %v5480_v63  ;;  %v11431_v0 = vpop.f32.mrb[71].mxu0 }
0x1c16   :  { %v6024_v52 = vadd.f32 %v6016_v3, %v12493_v9 }
0x1c17   :  { %v5556_v46 = vpop.f32.mrb[76].mxu0 }
0x1c18   :  { %v6017_v54 = vmul.f32 0.35355338, %v5556_v46  ;;  %v11436_v51 = vpop.f32.mrb[77].mxu0  ;;  %v6032_v60 = vsel %vm213_vm6, %v6024_v52, -inf }
0x1c19   :  { %6033 = vmax.xlane.f32.xlu1 %v6032_v60 }
0x1c1a   :  { %v6025_v4 = vadd.f32 %v6017_v54, %v12498_v17 }
0x1c1c   :  { %v6035_v5 = vsel %vm213_vm6, %v6025_v4, -inf }
0x1c1d   :  { %6036 = vmax.xlane.f32.xlu0 %v6035_v5 }
0x1c86   :  { %v5632_v57 = vpop.f32.mrb[62].mxu1 }
0x1c87   :  { %v6018_v7 = vmul.f32 0.35355338, %v5632_v57  ;;  %v11441_v2 = vpop.f32.mrb[63].mxu1 }
0x1c88   :  { %v5708_v55 = vpop.f32.mrb[78].mxu0 }
0x1c89   :  { %v6026_v39 = vadd.f32 %v6018_v7, %v12493_v9  ;;  %v6019_v6 = vmul.f32 0.35355338, %v5708_v55  ;;  %v11446_v58 = vpop.f32.mrb[79].mxu0 }
0x1c8a   :  { %v5784_v8 = vpop.f32.mrb[72].mxu1 }
0x1c8b   :  { %v6027_v10 = vadd.f32 %v6019_v6, %v12498_v17  ;;  %v6020_v11 = vmul.f32 0.35355338, %v5784_v8  ;;  %v11451_v13 = vpop.f32.mrb[73].mxu1  ;;  %v6038_v14 = vsel %vm213_vm6, %v6026_v39, -inf }
0x1c8c   :  { %6039 = vmax.xlane.f32.xlu0 %v6038_v14  ;;  %v5860_v16 = vpop.f32.mrb[80].mxu0 }
0x1c8d   :  { %v6028_v18 = vadd.f32 %v6020_v11, %v12493_v9  ;;  %v6021_v20 = vmul.f32 0.35355338, %v5860_v16  ;;  %v11456_v22 = vpop.f32.mrb[81].mxu0  ;;  %v6041_v31 = vsel %vm213_vm6, %v6027_v10, -inf }
0x1c8e   :  { %v5936_v12 = vpop.f32.mrb[74].mxu1 }
0x1c8f   :  { %v6029_v19 = vadd.f32 %v6021_v20, %v12498_v17  ;;  %v6022_v42 = vmul.f32 0.35355338, %v5936_v12  ;;  %v11461_v44 = vpop.f32.mrb[75].mxu1  ;;  %v6044_v62 = vsel %vm213_vm6, %v6028_v18, -inf }
0x1c90   :  { %6045 = vmax.xlane.f32.xlu1 %v6044_v62  ;;  %6042 = vmax.xlane.f32.xlu0 %v6041_v31  ;;  %v6012_v33 = vpop.f32.mrb[82].mxu0 }
0x1c91   :  { %v6030_v50 = vadd.f32 %v6022_v42, %v12493_v9  ;;  %v6023_v40 = vmul.f32 0.35355338, %v6012_v33  ;;  %v11466_v38 = vpop.f32.mrb[83].mxu0  ;;  %v6047_v59 = vsel %vm213_vm6, %v6029_v19, -inf }
0x1c93   :  { %v6031_v35 = vadd.f32 %v6023_v40, %v12498_v17  ;;  %v6050_v41 = vsel %vm213_vm6, %v6030_v50, -inf }
0x1c94   :  { %6051 = vmax.xlane.f32.xlu1 %v6050_v41  ;;  %6048 = vmax.xlane.f32.xlu0 %v6047_v59 }
0x1c95   :  { %v6053_v36 = vsel %vm213_vm6, %v6031_v35, -inf }
0x1c98   :  { %6054 = vmax.xlane.f32.xlu0 %v6053_v36 }
0x1ca5   :  { %6120 = vrot.lane.b32.xlu1 %v13168_v21, %s12287_s7 }
0x1ca6   :  { %v6034_v28 = vpop.xlane.xlu1 %6033 }
0x1ca7   :  { %v6056_v61 = vsub.f32 %v6024_v52, %v6034_v28 }
0x1ca9   :  { %6272 = vrot.lane.b32.xlu1 %v13188_v25, %s12287_s7  ;;  %v6064_v24 = vmul.f32 1.442695, %v6056_v61 }
0x1caa   :  { %v6037_v45 = vpop.xlane.xlu0 %6036 }
0x1cab   :  { %v6057_v53 = vsub.f32 %v6025_v4, %v6037_v45 }
0x1cad   :  { %6348 = vrot.lane.b32.xlu1 %v13192_v26, %s12287_s7  ;;  %v6066_v21 = vmul.f32 1.442695, %v6057_v53 }
0x1cae   :  { %6196 = vrot.lane.b32.xlu0 %v13170_v23, %s12287_s7 }
0x1caf   :  { %12070 = vpow2.f32 %v6066_v21 }
0x1cb0   :  { %12072 = vpow2.f32 %v6064_v24 }
0x1cb1   :  { %6424 = vrot.lane.b32.xlu1 %v13196_v27, %s12287_s7 }
0x1cb2   :  { %6500 = vrot.lane.b32.xlu0 %v13200_v48, %s12287_s7 }
0x1cb9   :  { %v13286_v25 = vpop.eup %12070 }
0x1cba   :  { %v6083_v26 = vsel %vm213_vm6, %v13286_v25, 0.0  ;;  %v13290_v23 = vpop.eup %12072 }
0x1cbb   :  { %v6080_v27 = vsel %vm213_vm6, %v13290_v23, 0.0 }
0x1cd1   :  { %6084 = vadd.xlane.f32.xlu0 %v6083_v26 }
0x1cd5   :  { %6081 = vadd.xlane.f32.xlu1 %v6080_v27 }
0x1d19   :  { %v6040_v48 = vpop.xlane.xlu0 %6039 }
0x1d1a   :  { %v6058_v29 = vsub.f32 %v6026_v39, %v6040_v48 }
0x1d1c   :  { %v6068_v49 = vmul.f32 1.442695, %v6058_v29 }
0x1d1d   :  { %v6046_v32 = vpop.xlane.xlu1 %6045  ;;  %v6043_v63 = vpop.xlane.xlu0 %6042 }
0x1d1e   :  { %12074 = vpow2.f32 %v6068_v49  ;;  %v6060_v3 = vsub.f32 %v6028_v18, %v6046_v32  ;;  %v6059_v0 = vsub.f32 %v6027_v10, %v6043_v63 }
0x1d20   :  { %v6072_v52 = vmul.f32 1.442695, %v6060_v3  ;;  %v6070_v46 = vmul.f32 1.442695, %v6059_v0 }
0x1d21   :  { %v6052_v54 = vpop.xlane.xlu1 %6051  ;;  %v6049_v51 = vpop.xlane.xlu0 %6048 }
0x1d22   :  { %12076 = vpow2.f32 %v6072_v52  ;;  %v6062_v60 = vsub.f32 %v6030_v50, %v6052_v54  ;;  %v6061_v4 = vsub.f32 %v6029_v19, %v6049_v51 }
0x1d23   :  { %12078 = vpow2.f32 %v6070_v46 }
0x1d24   :  { %v6076_v5 = vmul.f32 1.442695, %v6062_v60  ;;  %v6074_v57 = vmul.f32 1.442695, %v6061_v4  ;;  %v11894_v60 = vld [vmem:[#allocation2 + $0xd0] sm:$0xff]  }
0x1d25   :  { %v6121_v7 = vpop.permute.xlu1 %6120  ;;  %v6055_v2 = vpop.xlane.xlu0 %6054 }
0x1d26   :  { %12080 = vpow2.f32 %v6076_v5  ;;  %v6063_v55 = vsub.f32 %v6031_v35, %v6055_v2  ;;  %11468 = vmatpush3.msra.mxu1 %v6121_v7 }
0x1d27   :  { %12082 = vpow2.f32 %v6074_v57  ;;  %11477 = vmatprep.subr.mxu1 %v12292_v15  ;;  %v11895_v57 = vld [vmem:[#allocation2 + $0xd8] sm:$0xff]  }
0x1d28   :  { %v12075_v39 = vpop.eup %12074  ;;  %v6078_v6 = vmul.f32 1.442695, %v6063_v55 }
0x1d29   :  { %v6197_v58 = vpop.permute.xlu0 %6196  ;;  %v6086_v8 = vsel %vm213_vm6, %v12075_v39, 0.0  ;;  %v6273_v42 = vpop.permute.xlu1 %6272 }
0x1d2a   :  { %12084 = vpow2.f32 %v6078_v6  ;;  %6087 = vadd.xlane.f32.xlu1 %v6086_v8  ;;  %11473 = vmatpush3.msra.mxu0 %v6197_v58 }
0x1d2b   :  { %11482 = vmatprep.subr.mxu0 %v12292_v15 }
0x1d2c   :  { %v12077_v10 = vpop.eup %12076 }
0x1d2d   :  { %v12079_v11 = vpop.eup %12078  ;;  %v6092_v13 = vsel %vm213_vm6, %v12077_v10, 0.0  ;;  %v6349_v44 = vpop.permute.xlu1 %6348 }
0x1d2e   :  { %6093 = vadd.xlane.f32.xlu1 %v6092_v13  ;;  %v6089_v14 = vsel %vm213_vm6, %v12079_v11, 0.0  ;;  %v6501_v62 = vpop.permute.xlu0 %6500 }
0x1d2f   :  { %6090 = vadd.xlane.f32.xlu0 %v6089_v14 }
0x1d30   :  { %v12081_v16 = vpop.eup %12080 }
0x1d31   :  { %v13299_v18 = vpop.eup %12082  ;;  %v6098_v20 = vsel %vm213_vm6, %v12081_v16, 0.0  ;;  %v6425_v31 = vpop.permute.xlu1 %6424 }
0x1d32   :  { %6099 = vadd.xlane.f32.xlu1 %v6098_v20  ;;  %v6095_v22 = vsel %vm213_vm6, %v13299_v18, 0.0 }
0x1d33   :  { %6096 = vadd.xlane.f32.xlu0 %v6095_v22 }
0x1d34   :  { %v13304_v12 = vpop.eup %12084 }
0x1d35   :  { %v6101_v19 = vsel %vm213_vm6, %v13304_v12, 0.0 }
0x1d37   :  { %6102 = vadd.xlane.f32.xlu0 %v6101_v19 }
0x1d43   :  { %6576 = vrot.lane.b32.xlu1 %v13206_v37, %s12287_s7 }
0x1d4d   :  { %6652 = vrot.lane.b32.xlu0 %v13204_v34, %s12287_s7 }
0x1d5e   :  { %v6085_v33 = vpop.xlane.xlu0 %6084 }
0x1d5f   :  { %12086 = vrcp.f32 %v6085_v33 }
0x1d62   :  { %v6082_v50 = vpop.xlane.xlu1 %6081 }
0x1d63   :  { %12088 = vrcp.f32 %v6082_v50 }
0x1d69   :  { %v12087_v40 = vpop.eup %12086 }
0x1d6a   :  { %v6113_v38 = vmul.f32 %v12087_v40, %v13286_v25 }
0x1d6c   :  { %11475 = vmatmul.mubr.msk.f32.vlgmr.msra.gmra.mrb[84].mxu0 %vm213_vm6, %v6113_v38 }
0x1d6d   :  { %v12089_v35 = vpop.eup %12088  ;;  %11483 = vmatpush3.msra.mxu0 %v6349_v44  ;;  %11484 = vmatprep.mubr.msk.f32.mxu0 %vm12293_vm1, %v12292_v15 }
0x1d6e   :  { %v6112_v34 = vmul.f32 %v12089_v35, %v13290_v23  ;;  %11492 = vmatprep.subr.mxu0 %v12292_v15 }
0x1d70   :  { %11470 = vmatmul.mubr.msk.f32.vlgmr.msra.gmra.mrb[76].mxu1 %vm213_vm6, %v6112_v34 }
0x1d71   :  { %11478 = vmatpush3.msra.mxu1 %v6273_v42  ;;  %11479 = vmatprep.mubr.msk.f32.mxu1 %vm12293_vm1, %v12292_v15 }
0x1d72   :  { %11487 = vmatprep.subr.mxu1 %v12292_v15 }
0x1db7   :  { %v6088_v37 = vpop.xlane.xlu1 %6087 }
0x1db8   :  { %12090 = vrcp.f32 %v6088_v37 }
0x1dbb   :  { %v6094_v41 = vpop.xlane.xlu1 %6093 }
0x1dbc   :  { %12092 = vrcp.f32 %v6094_v41  ;;  %v6091_v59 = vpop.xlane.xlu0 %6090  ;;  %v10711_v41 = vld [vmem:[#allocation5 + $0xb8] ss:$0 sm:$0xff] }
0x1dbd   :  { %12094 = vrcp.f32 %v6091_v59 }
0x1dbf   :  { %v6100_v36 = vpop.xlane.xlu1 %6099 }
0x1dc0   :  { %12096 = vrcp.f32 %v6100_v36  ;;  %v6097_v45 = vpop.xlane.xlu0 %6096 }
0x1dc1   :  { %12098 = vrcp.f32 %v6097_v45 }
0x1dc2   :  { %v12091_v53 = vpop.eup %12090 }
0x1dc3   :  { %v6114_v28 = vmul.f32 %v12091_v53, %v12075_v39  ;;  %v6577_v23 = vpop.permute.xlu1 %6576 }
0x1dc4   :  { %v6103_v61 = vpop.xlane.xlu0 %6102 }
0x1dc5   :  { %12100 = vrcp.f32 %v6103_v61  ;;  %11480 = vmatmul.mubr.msk.f32.vlgmr.msra.gmra.mrb[78].mxu1 %vm213_vm6, %v6114_v28 }
0x1dc6   :  { %v12093_v21 = vpop.eup %12092  ;;  %11488 = vmatpush3.msra.mxu1 %v6425_v31  ;;  %11489 = vmatprep.mubr.msk.f32.mxu1 %vm12293_vm1, %v12292_v15 }
0x1dc7   :  { %v12095_v24 = vpop.eup %12094  ;;  %11497 = vmatprep.subr.mxu1 %v12292_v15  ;;  %v6116_v25 = vmul.f32 %v12093_v21, %v12077_v10 }
0x1dc8   :  { %v6115_v26 = vmul.f32 %v12095_v24, %v12079_v11  ;;  %v6653_v32 = vpop.permute.xlu0 %6652 }
0x1dc9   :  { %11490 = vmatmul.mubr.msk.f32.vlgmr.msra.gmra.mrb[80].mxu1 %vm213_vm6, %v6116_v25 }
0x1dca   :  { %v12097_v27 = vpop.eup %12096  ;;  %11485 = vmatmul.mubr.msk.f32.vlgmr.msra.gmra.mrb[86].mxu0 %vm213_vm6, %v6115_v26  ;;  %11498 = vmatpush3.msra.mxu1 %v6577_v23 }
0x1dcb   :  { %v12099_v48 = vpop.eup %12098  ;;  %11493 = vmatpush3.msra.mxu0 %v6501_v62  ;;  %11494 = vmatprep.mubr.msk.f32.mxu0 %vm12293_vm1, %v12292_v15  ;;  %v6118_v29 = vmul.f32 %v12097_v27, %v12081_v16 }
0x1dcc   :  { %11499 = vmatprep.mubr.msk.f32.mxu1 %vm12293_vm1, %v12292_v15  ;;  %11502 = vmatprep.subr.mxu0 %v12292_v15  ;;  %v6117_v49 = vmul.f32 %v12099_v48, %v13299_v18 }
0x1dcd   :  { %11500 = vmatmul.mubr.msk.f32.vlgmr.msra.gmra.mrb[82].mxu1 %vm213_vm6, %v6118_v29  ;;  %11507 = vmatprep.subr.bf16.mxu1 %v12292_v15 }
0x1dce   :  { %11495 = vmatmul.mubr.msk.f32.vlgmr.msra.gmra.mrb[88].mxu0 %vm213_vm6, %v6117_v49  ;;  %11511 = vmatprep.mubr.msk.bf16.mxu1 %vm12293_vm1, %v12292_v15 }
0x1dcf   :  { %v12101_v63 = vpop.eup %12100  ;;  %11503 = vmatpush3.msra.mxu0 %v6653_v32  ;;  %11504 = vmatprep.mubr.msk.f32.mxu0 %vm12293_vm1, %v12292_v15 }
0x1dd0   :  { %v6119_v3 = vmul.f32 %v12101_v63, %v13304_v12  ;;  %11515 = vmatprep.subr.bf16.mxu0 %v12292_v15  ;;  %11508 = vmatpush3.bf16.msra.mxu1 %v11894_v60 }
0x1dd1   :  { %11509 = vmatprep.subr.bf16.mxu1 %v12292_v15 }
0x1dd2   :  { %11505 = vmatmul.mubr.msk.f32.vlgmr.msra.gmra.mrb[90].mxu0 %vm213_vm6, %v6119_v3 }
0x1dd3   :  { %11519 = vmatprep.mubr.msk.bf16.mxu0 %vm12293_vm1, %v12292_v15 }
0x1dd4   :  { %11510 = vmatpush3.bf16.msra.mxu1 %v11895_v57 }
0x1dd5   :  { %11523 = vmatprep.subr.bf16.mxu1 %v12292_v15 }
0x1e3f   :  { %v6268_v0 = vpop.f32.mrb[84].mxu0 }
0x1e40   :  { %v11476_v52 = vpop.f32.mrb[85].mxu0 }
0x1e41   :  { %v11897_v52 = vld [vmem:[#allocation2 + $0xe8] sm:$0xff]  }
0x1e43   :  { %v6192_v46 = vpop.f32.mrb[76].mxu1 }
0x1e44   :  { %v11471_v54 = vpop.f32.mrb[77].mxu1 }
0x1e45   :  { %v11899_v54 = vld [vmem:[#allocation2 + $0xf8] sm:$0xff]  }
0x1e98   :  { %v6344_v51 = vpop.f32.mrb[78].mxu1 }
0x1e99   :  { %v11481_v4 = vpop.f32.mrb[79].mxu1 }
0x1e9c   :  { %v6496_v5 = vpop.f32.mrb[80].mxu1 }
0x1e9d   :  { %v6420_v7 = vpop.f32.mrb[86].mxu0  ;;  %v11491_v2 = vpop.f32.mrb[81].mxu1 }
0x1e9e   :  { %v11823_v55 = vpack.i.bf16 %v6420_v7, %v6344_v51  ;;  %v11486_v39 = vpop.f32.mrb[87].mxu0 }
0x1ea0   :  { %11824 = vrot.lane.b32.xlu1 %v11823_v55, %s12291_s21  ;;  %v6648_v6 = vpop.f32.mrb[82].mxu1 }
0x1ea1   :  { %v6572_v58 = vpop.f32.mrb[88].mxu0  ;;  %v11501_v8 = vpop.f32.mrb[83].mxu1 }
0x1ea2   :  { %v11828_v10 = vpack.i.bf16 %v6572_v58, %v6496_v5  ;;  %v11496_v11 = vpop.f32.mrb[89].mxu0 }
0x1ea4   :  { %11829 = vrot.lane.b32.xlu0 %v11828_v10, %s12298_s2 }
0x1ea5   :  { %v6724_v13 = vpop.f32.mrb[90].mxu0 }
0x1ea6   :  { %v11833_v14 = vpack.i.bf16 %v6724_v13, %v6648_v6  ;;  %v11506_v16 = vpop.f32.mrb[91].mxu0 }
0x1ea7   :  { %v10715_v16 = vld [vmem:[#allocation5 + $0xc0] ss:$0 sm:$0xff] }
0x1ea8   :  { %11834 = vrot.lane.b32.xlu1 %v11833_v14, %s12299_s11 }
0x1f12   :  { %v11825_v18 = vpop.permute.xlu1 %11824 }
0x1f13   :  { %v11827_v22 = vunpack.i.h.bf16 %v11825_v18  ;;  %v11826_v12 = vunpack.i.l.bf16 %v11825_v18 }
0x1f15   :  { %v6753_v62 = vsel %vm213_vm6, %v6268_v0, %v11827_v22  ;;  %v6752_v31 = vsel %vm213_vm6, %v6192_v46, %v11826_v12  ;;  %v11896_v0 = vld [vmem:[#allocation2 + $0xe0] sm:$0xff]   ;;  %v11898_v46 = vld [vmem:[#allocation2 + $0xf0] sm:$0xff]  }
0x1f16   :  { %v11830_v20 = vpop.permute.xlu0 %11829  ;;  %11516 = vmatpush3.bf16.msra.mxu0 %v11896_v0 }
0x1f17   :  { %v11832_v19 = vunpack.i.h.bf16 %v11830_v20  ;;  %v11831_v42 = vunpack.i.l.bf16 %v11830_v20  ;;  %11517 = vmatprep.subr.bf16.mxu0 %v12292_v15 }
0x1f19   :  { %v6755_v40 = vsel %vm1570_vm9, %v6753_v62, %v11832_v19  ;;  %v6754_v38 = vsel %vm1570_vm9, %v6752_v31, %v11831_v42  ;;  %v10716_v42 = vld [vmem:[#allocation5 + $0xc8] ss:$0 sm:$0xff] }
0x1f1a   :  { %v11835_v44 = vpop.permute.xlu1 %11834  ;;  %11518 = vmatpush3.bf16.msra.mxu0 %v11897_v52 }
0x1f1b   :  { %v11837_v33 = vunpack.i.h.bf16 %v11835_v44  ;;  %v11836_v50 = vunpack.i.l.bf16 %v11835_v44  ;;  %11535 = vmatprep.subr.bf16.mxu0 %v12292_v15 }
0x1f1d   :  { %v6757_v35 = vsel %vm1573_vm10, %v6755_v40, %v11837_v33  ;;  %v6756_v34 = vsel %vm1573_vm10, %v6754_v38, %v11836_v50  ;;  %v11900_v50 = vld [vmem:[#allocation2 + $0x100] sm:$0xff]   ;;  %v11901_v40 = vld [vmem:[#allocation2 + $0x108] sm:$0xff]  }
0x1f1e   :  { %v6758_v37 = vpack.c.bf16 %v6757_v35, %v6756_v34  ;;  %v10717_v38 = vld [vmem:[#allocation5 + $0xd0] ss:$0 sm:$0xff] }
0x1f20   :  { %11512 = vmatmul.mubr.msk.bf16.vlgmr.msra.gmra.mrb[84].mxu1 %vm71_vm0, %v6758_v37 }
0x1f21   :  { %11531 = vmatprep.mubr.msk.bf16.mxu1 %vm12293_vm1, %v12292_v15  ;;  %11524 = vmatpush3.bf16.msra.mxu1 %v11898_v46 }
0x1f22   :  { %11525 = vmatprep.subr.bf16.mxu1 %v12292_v15 }
0x1f25   :  { %11526 = vmatpush3.bf16.msra.mxu1 %v11899_v54 }
0x1f26   :  { %11527 = vmatprep.subr.bf16.mxu1 %v12292_v15 }
0x1f29   :  { %11528 = vmatpush3.bf16.msra.mxu1 %v11900_v50 }
0x1f2a   :  { %11529 = vmatprep.subr.bf16.mxu1 %v12292_v15 }
0x1f2d   :  { %11530 = vmatpush3.bf16.msra.mxu1 %v11901_v40 }
0x1f2e   :  { %11553 = vmatprep.subr.mxu1 %v12292_v15 }
0x1ff3   :  { %v6812_v59 = vpop.f32.mrb[84].mxu1 }
0x1ff4   :  { %v6813_v36 = vadd.f32 %v10711_v41, %v6812_v59  ;;  %v11513_v45 = vpop.f32.mrb[85].mxu1 }
0x1ff5   :  { %v6815_v53 = vpop.f32.mrb[86].mxu1 }
0x1ff6   :  { %v13361_v28 = vadd.f32 %v6813_v36, %v13130_v56  ;;  %v6816_v61 = vadd.f32 %v10711_v41, %v6815_v53  ;;  %v11514_v21 = vpop.f32.mrb[87].mxu1 }
0x1ff7   :  { %v10721_v21 = vld [vmem:[#allocation5 + $0xd8] ss:$0 sm:$0xff] }
0x1ff8   :  { %v13364_v24 = vadd.f32 %v6816_v61, %v13133_v43  ;;  %v6823_v25 = vsel %vm71_vm0, %v13361_v28, 0.0 }
0x1ff9   :  { %6824 = vadd.xlane.f32.xlu0 %v6823_v25 }
0x1ffa   :  { %v6826_v26 = vsel %vm71_vm0, %v13364_v24, 0.0 }
0x1ffb   :  { %6827 = vadd.xlane.f32.xlu1 %v6826_v26 }
0x2086   :  { %v6825_v23 = vpop.xlane.xlu0 %6824 }
0x2087   :  { %v6829_v27 = vmul.f32 0.03125, %v6825_v23 }
0x2088   :  { %v6828_v48 = vpop.xlane.xlu1 %6827 }
0x2089   :  { %v6831_v29 = vsub.f32 %v13361_v28, %v6829_v27  ;;  %v6830_v56 = vmul.f32 0.03125, %v6828_v48 }
0x208b   :  { %v6832_v49 = vsub.f32 %v13364_v24, %v6830_v56  ;;  %v6833_v32 = vmul.f32 %v6831_v29, %v6831_v29  ;;  %v6847_v20 = vmul.f32 %v10715_v16, %v6831_v29 }
0x208d   :  { %v6835_v43 = vsel %vm71_vm0, %v6833_v32, 0.0  ;;  %v6834_v63 = vmul.f32 %v6832_v49, %v6832_v49  ;;  %v6848_v22 = vmul.f32 %v10715_v16, %v6832_v49 }
0x208e   :  { %6836 = vadd.xlane.f32.xlu0 %v6835_v43 }
0x208f   :  { %v6838_v3 = vsel %vm71_vm0, %v6834_v63, 0.0 }
0x2092   :  { %6839 = vadd.xlane.f32.xlu0 %v6838_v3 }
0x211b   :  { %v6837_v51 = vpop.xlane.xlu0 %6836 }
0x211c   :  { %v6841_v60 = vmul.f32 0.032258064, %v6837_v51 }
0x211e   :  { %12102 = vrsqrt.f32 %v6841_v60  ;;  %vm6851_vm4 = vcmp.eq.f32.partialorder %v6841_v60, inf  ;;  %v6854_v2 = vand.u32 2147483648, %v6841_v60  ;;  %vm6853_vm5 = vcmp.eq.f32.partialorder %v6841_v60, 0.0 }
0x211f   :  { %v6840_v4 = vpop.xlane.xlu0 %6839 }
0x2120   :  { %v6842_v5 = vmul.f32 0.032258064, %v6840_v4  ;;  %v11902_v4 = vld [vmem:[#allocation2 + $0x110] sm:$0xff]  }
0x2122   :  { %12104 = vrsqrt.f32 %v6842_v5  ;;  %vm6858_vm7 = vcmp.eq.f32.partialorder %v6842_v5, inf  ;;  %v6861_v10 = vand.u32 2147483648, %v6842_v5  ;;  %vm6860_vm8 = vcmp.eq.f32.partialorder %v6842_v5, 0.0 }
0x2128   :  { %v12103_v57 = vpop.eup %12102 }
0x2129   :  { %v6850_v7 = vmul.f32 %v12103_v57, %v6841_v60 }
0x212b   :  { %v6852_v55 = vsel %vm6851_vm4, %v6841_v60, %v6850_v7 }
0x212c   :  { %v12105_v39 = vpop.eup %12104  ;;  %v6855_v6 = vsel %vm6853_vm5, %v6854_v2, %v6852_v55 }
0x212d   :  { %v6863_v58 = vadd.f32 1e-06, %v6855_v6  ;;  %v6857_v8 = vmul.f32 %v12105_v39, %v6842_v5 }
0x212f   :  { %12106 = vrcp.f32 %v6863_v58  ;;  %v6859_v11 = vsel %vm6858_vm7, %v6842_v5, %v6857_v8  ;;  %v11903_v5 = vld [vmem:[#allocation2 + $0x118] sm:$0xff]  }
0x2130   :  { %v6862_v13 = vsel %vm6860_vm8, %v6861_v10, %v6859_v11 }
0x2131   :  { %v6864_v14 = vadd.f32 1e-06, %v6862_v13 }
0x2133   :  { %12108 = vrcp.f32 %v6864_v14 }
0x2139   :  { %v12107_v18 = vpop.eup %12106 }
0x213a   :  { %v6866_v12 = vmul.f32 %v12107_v18, %v6847_v20 }
0x213c   :  { %v6873_v62 = vadd.f32 %v10716_v42, %v6866_v12  ;;  %v10727_v12 = vld [vmem:[#allocation5 + $0xe0] ss:$0 sm:$0xff] }
0x213d   :  { %v12109_v19 = vpop.eup %12108 }
0x213e   :  { %v6868_v44 = vmul.f32 %v12109_v19, %v6848_v22 }
0x2140   :  { %v6874_v31 = vadd.f32 %v10716_v42, %v6868_v44 }
0x2142   :  { %v6889_v33 = vpack.c.bf16 %v6874_v31, %v6873_v62 }
0x2144   :  { %11520 = vmatmul.mubr.msk.bf16.vlgmr.msra.gmra.mrb[92].mxu0 %vm71_vm0, %v6889_v33  ;;  %v10728_v33 = vld [vmem:[#allocation5 + $0xe8] ss:$0 sm:$0xff] }
0x2145   :  { %11539 = vmatprep.mubr.msk.bf16.mxu0 %vm12293_vm1, %v12292_v15  ;;  %11536 = vmatpush3.bf16.msra.mxu0 %v11902_v4 }
0x2146   :  { %11537 = vmatprep.subr.bf16.mxu0 %v12292_v15 }
0x2149   :  { %11538 = vmatpush3.bf16.msra.mxu0 %v11903_v5 }
0x214a   :  { %11543 = vmatprep.subr.mxu0 %v12292_v15 }
0x2217   :  { %v6943_v35 = vpop.f32.mrb[92].mxu0 }
0x2218   :  { %v6944_v34 = vadd.f32 %v10717_v38, %v6943_v35  ;;  %v11521_v37 = vpop.f32.mrb[93].mxu0 }
0x2219   :  { %v6946_v41 = vpop.f32.mrb[94].mxu0 }
0x221a   :  { %v6947_v59 = vadd.f32 %v10717_v38, %v6946_v41  ;;  %v11522_v36 = vpop.f32.mrb[95].mxu0  ;;  %v6950_v45 = vmax.f32 %v6944_v34, 0.0  ;;  %v10729_v34 = vld [vmem:[#allocation5 + $0xf0] ss:$0 sm:$0xff] }
0x221c   :  { %v6951_v53 = vmax.f32 %v6947_v59, 0.0 }
0x221e   :  { %v6952_v61 = vpack.c.bf16 %v6951_v53, %v6950_v45 }
0x2220   :  { %11532 = vmatmul.mubr.msk.bf16.vlgmr.msra.gmra.mrb[88].mxu1 %vm1799_vm15, %v6952_v61 }
0x2221   :  { %11555 = vmatprep.mubr.msk.f32.mxu1 %vm12293_vm1, %v12292_v15 }
0x22f3   :  { %v7018_v25 = vpop.f32.mrb[88].mxu1 }
0x22f4   :  { %v7019_v26 = vadd.f32 %v10721_v21, %v7018_v25  ;;  %v11533_v23 = vpop.f32.mrb[89].mxu1 }
0x22f5   :  { %v7021_v27 = vpop.f32.mrb[90].mxu1 }
0x22f6   :  { %v13387_v48 = vadd.f32 %v7019_v26, %v13361_v28  ;;  %v7022_v29 = vadd.f32 %v10721_v21, %v7021_v27  ;;  %v11534_v56 = vpop.f32.mrb[91].mxu1 }
0x22f8   :  { %v13390_v49 = vadd.f32 %v7022_v29, %v13364_v24  ;;  %v7029_v32 = vsel %vm71_vm0, %v13387_v48, 0.0 }
0x22f9   :  { %7030 = vadd.xlane.f32.xlu0 %v7029_v32 }
0x22fa   :  { %v7032_v43 = vsel %vm71_vm0, %v13390_v49, 0.0 }
0x22fb   :  { %7033 = vadd.xlane.f32.xlu1 %v7032_v43 }
0x2386   :  { %v7031_v63 = vpop.xlane.xlu0 %7030 }
0x2387   :  { %v7035_v3 = vmul.f32 0.03125, %v7031_v63 }
0x2388   :  { %v7034_v0 = vpop.xlane.xlu1 %7033 }
0x2389   :  { %v7037_v52 = vsub.f32 %v13387_v48, %v7035_v3  ;;  %v7036_v28 = vmul.f32 0.03125, %v7034_v0 }
0x238b   :  { %v7038_v46 = vsub.f32 %v13390_v49, %v7036_v28  ;;  %v7039_v54 = vmul.f32 %v7037_v52, %v7037_v52  ;;  %v7053_v42 = vmul.f32 %v10727_v12, %v7037_v52 }
0x238d   :  { %v7041_v24 = vsel %vm71_vm0, %v7039_v54, 0.0  ;;  %v7040_v51 = vmul.f32 %v7038_v46, %v7038_v46  ;;  %v7054_v44 = vmul.f32 %v10727_v12, %v7038_v46 }
0x238e   :  { %7042 = vadd.xlane.f32.xlu0 %v7041_v24 }
0x238f   :  { %v7044_v60 = vsel %vm71_vm0, %v7040_v51, 0.0 }
0x2390   :  { %7045 = vadd.xlane.f32.xlu1 %v7044_v60 }
0x241b   :  { %v7043_v57 = vpop.xlane.xlu0 %7042 }
0x241c   :  { %v7047_v7 = vmul.f32 0.032258064, %v7043_v57 }
0x241d   :  { %v7046_v2 = vpop.xlane.xlu1 %7045 }
0x241e   :  { %12110 = vrsqrt.f32 %v7047_v7  ;;  %v7048_v55 = vmul.f32 0.032258064, %v7046_v2  ;;  %vm7057_vm11 = vcmp.eq.f32.partialorder %v7047_v7, inf  ;;  %v7060_v58 = vand.u32 2147483648, %v7047_v7 }
0x241f   :  { %vm7059_vm12 = vcmp.eq.f32.partialorder %v7047_v7, 0.0 }
0x2420   :  { %12112 = vrsqrt.f32 %v7048_v55  ;;  %vm7064_vm13 = vcmp.eq.f32.partialorder %v7048_v55, inf  ;;  %v7067_v16 = vand.u32 2147483648, %v7048_v55  ;;  %vm7066_vm14 = vcmp.eq.f32.partialorder %v7048_v55, 0.0 }
0x2428   :  { %v12111_v39 = vpop.eup %12110 }
0x2429   :  { %v7056_v6 = vmul.f32 %v12111_v39, %v7047_v7 }
0x242a   :  { %v12113_v8 = vpop.eup %12112 }
0x242b   :  { %v7058_v10 = vsel %vm7057_vm11, %v7047_v7, %v7056_v6  ;;  %v7063_v13 = vmul.f32 %v12113_v8, %v7048_v55 }
0x242c   :  { %v7061_v11 = vsel %vm7059_vm12, %v7060_v58, %v7058_v10 }
0x242d   :  { %v7069_v14 = vadd.f32 1e-06, %v7061_v11  ;;  %v7065_v18 = vsel %vm7064_vm13, %v7048_v55, %v7063_v13 }
0x242e   :  { %v7068_v20 = vsel %vm7066_vm14, %v7067_v16, %v7065_v18 }
0x242f   :  { %12114 = vrcp.f32 %v7069_v14  ;;  %v7070_v22 = vadd.f32 1e-06, %v7068_v20 }
0x2431   :  { %12116 = vrcp.f32 %v7070_v22 }
0x2439   :  { %v12115_v19 = vpop.eup %12114 }
0x243a   :  { %v7072_v62 = vmul.f32 %v12115_v19, %v7053_v42 }
0x243b   :  { %v12117_v31 = vpop.eup %12116 }
0x243c   :  { %v7074_v50 = vmul.f32 %v12117_v31, %v7054_v44  ;;  %v7079_v40 = vadd.f32 %v10728_v33, %v7072_v62 }
0x243e   :  { %v7080_v38 = vadd.f32 %v10728_v33, %v7074_v50 }
0x2440   :  { %v7091_v35 = vpack.c.bf16 %v7080_v38, %v7079_v40 }
0x2442   :  { %11540 = vmatmul.mubr.msk.bf16.vlgmr.msra.gmra.mrb[96].mxu0 %vm71_vm0, %v7091_v35 }
0x2443   :  { %11545 = vmatprep.mubr.msk.f32.mxu0 %vm12293_vm1, %v12292_v15 }
0x2515   :  { %v7145_v37 = vpop.f32.mrb[96].mxu0 }
0x2516   :  { %v13405_v41 = vadd.f32 %v10729_v34, %v7145_v37  ;;  %v11541_v59 = vpop.f32.mrb[97].mxu0 }
0x2517   :  { %v7148_v36 = vpop.f32.mrb[98].mxu0 }
0x2518   :  { %7158 = vrot.lane.b32.xlu1 %v13405_v41, %s12294_s0  ;;  %7154 = vrot.lane.b32.xlu0 %v13405_v41, %s12295_s5  ;;  %v11542_v45 = vpop.f32.mrb[99].mxu0  ;;  %v13411_v53 = vadd.f32 %v10729_v34, %v7148_v36 }
0x251c   :  { %7162 = vrot.lane.b32.xlu0 %v13405_v41, %s12296_s28  ;;  %7156 = vrot.lane.b32.xlu1 %v13411_v53, %s12295_s5 }
0x2520   :  { %7166 = vrot.lane.b32.xlu0 %v13405_v41, %s12297_s29  ;;  %7160 = vrot.lane.b32.xlu1 %v13411_v53, %s12294_s0 }
0x2524   :  { %7164 = vrot.lane.b32.xlu1 %v13411_v53, %s12296_s28 }
0x2528   :  { %7242 = vrot.lane.b32.xlu1 %v13411_v53, %s12297_s29 }
0x258a   :  { %v13425_v61 = vpop.permute.xlu1 %7158  ;;  %v13427_v21 = vpop.permute.xlu0 %7154 }
0x258b   :  { %7318 = vrot.lane.b32.xlu0 %v13427_v21, %s12297_s29 }
0x258e   :  { %v13431_v25 = vpop.permute.xlu0 %7162  ;;  %v13433_v26 = vpop.permute.xlu1 %7156 }
0x258f   :  { %7470 = vrot.lane.b32.xlu0 %v13425_v61, %s12297_s29  ;;  %7394 = vrot.lane.b32.xlu1 %v13433_v26, %s12297_s29 }
0x2592   :  { %v7167_v23 = vpop.permute.xlu0 %7166  ;;  %v13439_v27 = vpop.permute.xlu1 %7160 }
0x2593   :  { %7622 = vrot.lane.b32.xlu0 %v13431_v25, %s12297_s29  ;;  %11544 = vmatpush3.xpose.msk.msra.mxu0 %vm213_vm6, %v7167_v23 }
0x2594   :  { %7546 = vrot.lane.b32.xlu1 %v13439_v27, %s12297_s29  ;;  %11548 = vmatprep.subr.mxu0 %v12292_v15 }
0x2596   :  { %11546 = vmatmul.mubr.msk.f32.vlgmr.msra.gmra.mrb[100].mxu0 %vm213_vm6, %v13405_v41  ;;  %v13449_v29 = vpop.permute.xlu1 %7164 }
0x2597   :  { %11550 = vmatprep.mubr.msk.f32.mxu0 %vm12293_vm1, %v12292_v15 }
0x2598   :  { %7698 = vrot.lane.b32.xlu1 %v13449_v29, %s12297_s29 }
0x259a   :  { %v7243_v56 = vpop.permute.xlu1 %7242 }
0x259b   :  { %11549 = vmatpush3.xpose.msk.msra.mxu0 %vm213_vm6, %v7243_v56 }
0x259c   :  { %11558 = vmatprep.subr.mxu0 %v12292_v15 }
0x259e   :  { %11551 = vmatmul.mubr.msk.f32.vlgmr.msra.gmra.mrb[102].mxu0 %vm213_vm6, %v13411_v53 }
0x259f   :  { %11560 = vmatprep.mubr.msk.f32.mxu0 %vm12293_vm1, %v12292_v15 }
0x25fd   :  { %v7319_v32 = vpop.permute.xlu0 %7318 }
0x25fe   :  { %11554 = vmatpush3.xpose.msk.msra.mxu1 %vm213_vm6, %v7319_v32 }
0x25ff   :  { %11563 = vmatprep.subr.mxu1 %v12292_v15 }
0x2601   :  { %11556 = vmatmul.mubr.msk.f32.vlgmr.msra.gmra.mrb[92].mxu1 %vm213_vm6, %v13427_v21  ;;  %v7471_v43 = vpop.permute.xlu0 %7470  ;;  %v7395_v63 = vpop.permute.xlu1 %7394 }
0x2602   :  { %11559 = vmatpush3.xpose.msk.msra.mxu0 %vm213_vm6, %v7395_v63  ;;  %11564 = vmatpush3.xpose.msk.msra.mxu1 %vm213_vm6, %v7471_v43 }
0x2603   :  { %11565 = vmatprep.mubr.msk.f32.mxu1 %vm12293_vm1, %v12292_v15  ;;  %11573 = vmatprep.subr.mxu1 %v12292_v15 }
0x2604   :  { %11568 = vmatprep.subr.mxu0 %v12292_v15 }
0x2605   :  { %11566 = vmatmul.mubr.msk.f32.vlgmr.msra.gmra.mrb[94].mxu1 %vm213_vm6, %v13425_v61  ;;  %v7623_v3 = vpop.permute.xlu0 %7622  ;;  %11561 = vmatmul.mubr.msk.f32.vlgmr.msra.gmra.mrb[104].mxu0 %vm213_vm6, %v13433_v26 }
0x2606   :  { %v7547_v0 = vpop.permute.xlu1 %7546  ;;  %11574 = vmatpush3.xpose.msk.msra.mxu1 %vm213_vm6, %v7623_v3  ;;  %11570 = vmatprep.mubr.msk.f32.mxu0 %vm12293_vm1, %v12292_v15 }
0x2607   :  { %11569 = vmatpush3.xpose.msk.msra.mxu0 %vm213_vm6, %v7547_v0  ;;  %11575 = vmatprep.mubr.msk.f32.mxu1 %vm12293_vm1, %v12292_v15 }
0x2608   :  { %11578 = vmatprep.subr.mxu0 %v12292_v15  ;;  %11583 = vmatprep.subr.mxu1 %v12292_v15 }
0x2609   :  { %11576 = vmatmul.mubr.msk.f32.vlgmr.msra.gmra.mrb[96].mxu1 %vm213_vm6, %v13431_v25 }
0x260a   :  { %11571 = vmatmul.mubr.msk.f32.vlgmr.msra.gmra.mrb[106].mxu0 %vm213_vm6, %v13439_v27  ;;  %v7699_v52 = vpop.permute.xlu1 %7698  ;;  %11585 = vmatprep.mubr.msk.f32.mxu1 %vm12293_vm1, %v12292_v15 }
0x260b   :  { %11579 = vmatpush3.xpose.msk.msra.mxu0 %vm213_vm6, %v7699_v52  ;;  %11580 = vmatprep.mubr.msk.f32.mxu0 %vm12293_vm1, %v12292_v15 }
0x260c   :  { %11588 = vmatprep.subr.mxu0 %v12292_v15 }
0x260e   :  { %11581 = vmatmul.mubr.msk.f32.vlgmr.msra.gmra.mrb[108].mxu0 %vm213_vm6, %v13449_v29 }
0x260f   :  { %11590 = vmatprep.mubr.msk.f32.mxu0 %vm12293_vm1, %v12292_v15 }
0x2669   :  { %v7238_v28 = vpop.f32.mrb[100].mxu0 }
0x266a   :  { %v7774_v46 = vmul.f32 0.35355338, %v7238_v28  ;;  %v11547_v54 = vpop.f32.mrb[101].mxu0 }
0x266c   :  { %v7782_v24 = vadd.f32 %v7774_v46, %v13008_v47 }
0x266e   :  { %v7790_v51 = vsel %vm213_vm6, %v7782_v24, -inf }
0x266f   :  { %7791 = vmax.xlane.f32.xlu0 %v7790_v51 }
0x2671   :  { %v7314_v60 = vpop.f32.mrb[102].mxu0 }
0x2672   :  { %v7775_v4 = vmul.f32 0.35355338, %v7314_v60  ;;  %v11552_v5 = vpop.f32.mrb[103].mxu0 }
0x2674   :  { %v7783_v57 = vadd.f32 %v7775_v4, %v13016_v1 }
0x2676   :  { %v7793_v7 = vsel %vm213_vm6, %v7783_v57, -inf }
0x2677   :  { %7794 = vmax.xlane.f32.xlu1 %v7793_v7 }
0x26d4   :  { %v7390_v2 = vpop.f32.mrb[92].mxu1 }
0x26d5   :  { %v7776_v55 = vmul.f32 0.35355338, %v7390_v2  ;;  %v11557_v39 = vpop.f32.mrb[93].mxu1 }
0x26d7   :  { %v7784_v6 = vadd.f32 %v7776_v55, %v13008_v47 }
0x26d8   :  { %v7466_v58 = vpop.f32.mrb[104].mxu0  ;;  %v7542_v8 = vpop.f32.mrb[94].mxu1 }
0x26d9   :  { %v7777_v10 = vmul.f32 0.35355338, %v7466_v58  ;;  %v11562_v11 = vpop.f32.mrb[105].mxu0  ;;  %v11567_v13 = vpop.f32.mrb[95].mxu1  ;;  %v7778_v14 = vmul.f32 0.35355338, %v7542_v8 }
0x26da   :  { %v7796_v16 = vsel %vm213_vm6, %v7784_v6, -inf }
0x26db   :  { %v7785_v18 = vadd.f32 %v7777_v10, %v13016_v1  ;;  %7797 = vmax.xlane.f32.xlu0 %v7796_v16  ;;  %v7786_v42 = vadd.f32 %v7778_v14, %v13008_v47 }
0x26dc   :  { %v7694_v20 = vpop.f32.mrb[96].mxu1 }
0x26dd   :  { %v7618_v22 = vpop.f32.mrb[106].mxu0  ;;  %v11577_v12 = vpop.f32.mrb[97].mxu1  ;;  %v7799_v19 = vsel %vm213_vm6, %v7785_v18, -inf  ;;  %v7780_v62 = vmul.f32 0.35355338, %v7694_v20  ;;  %v7802_v34 = vsel %vm213_vm6, %v7786_v42, -inf }
0x26de   :  { %v7779_v44 = vmul.f32 0.35355338, %v7618_v22  ;;  %v11572_v31 = vpop.f32.mrb[107].mxu0 }
0x26df   :  { %7800 = vmax.xlane.f32.xlu0 %v7799_v19  ;;  %v7788_v40 = vadd.f32 %v7780_v62, %v13008_v47 }
0x26e0   :  { %v7787_v33 = vadd.f32 %v7779_v44, %v13016_v1 }
0x26e1   :  { %v7770_v50 = vpop.f32.mrb[108].mxu0  ;;  %v7808_v36 = vsel %vm213_vm6, %v7788_v40, -inf }
0x26e2   :  { %v7781_v38 = vmul.f32 0.35355338, %v7770_v50  ;;  %v11582_v35 = vpop.f32.mrb[109].mxu0  ;;  %v7805_v37 = vsel %vm213_vm6, %v7787_v33, -inf }
0x26e3   :  { %7803 = vmax.xlane.f32.xlu0 %v7802_v34  ;;  %7806 = vmax.xlane.f32.xlu1 %v7805_v37 }
0x26e4   :  { %v7789_v59 = vadd.f32 %v7781_v38, %v13016_v1 }
0x26e6   :  { %v7811_v45 = vsel %vm213_vm6, %v7789_v59, -inf }
0x26e7   :  { %7809 = vmax.xlane.f32.xlu0 %v7808_v36  ;;  %7812 = vmax.xlane.f32.xlu1 %v7811_v45 }
0x26f8   :  { %7954 = vrot.lane.b32.xlu1 %v13411_v53, %s12287_s7 }
0x26fc   :  { %8030 = vrot.lane.b32.xlu1 %v13427_v21, %s12287_s7  ;;  %v7792_v47 = vpop.xlane.xlu0 %7791 }
0x26fd   :  { %7878 = vrot.lane.b32.xlu0 %v13405_v41, %s12287_s7  ;;  %v7814_v1 = vsub.f32 %v7782_v24, %v7792_v47 }
0x26ff   :  { %v7822_v23 = vmul.f32 1.442695, %v7814_v1 }
0x2700   :  { %8106 = vrot.lane.b32.xlu1 %v13433_v26, %s12287_s7 }
0x2701   :  { %8182 = vrot.lane.b32.xlu0 %v13425_v61, %s12287_s7  ;;  %12118 = vpow2.f32 %v7822_v23 }
0x2704   :  { %8258 = vrot.lane.b32.xlu1 %v13439_v27, %s12287_s7  ;;  %v7795_v56 = vpop.xlane.xlu1 %7794 }
0x2705   :  { %v7815_v53 = vsub.f32 %v7783_v57, %v7795_v56 }
0x2707   :  { %v7824_v32 = vmul.f32 1.442695, %v7815_v53 }
0x2709   :  { %12120 = vpow2.f32 %v7824_v32 }
0x270b   :  { %v13525_v21 = vpop.eup %12118 }
0x270c   :  { %v7838_v41 = vsel %vm213_vm6, %v13525_v21, 0.0 }
0x2713   :  { %v13529_v26 = vpop.eup %12120 }
0x2714   :  { %v7841_v61 = vsel %vm213_vm6, %v13529_v26, 0.0 }
0x2720   :  { %7839 = vadd.xlane.f32.xlu0 %v7838_v41 }
0x2728   :  { %7842 = vadd.xlane.f32.xlu1 %v7841_v61 }
0x2768   :  { %v7798_v27 = vpop.xlane.xlu0 %7797 }
0x2769   :  { %v7816_v43 = vsub.f32 %v7784_v6, %v7798_v27 }
0x276b   :  { %v7826_v63 = vmul.f32 1.442695, %v7816_v43 }
0x276c   :  { %v7801_v3 = vpop.xlane.xlu0 %7800 }
0x276d   :  { %12122 = vpow2.f32 %v7826_v63  ;;  %v7817_v0 = vsub.f32 %v7785_v18, %v7801_v3 }
0x276f   :  { %v7828_v52 = vmul.f32 1.442695, %v7817_v0 }
0x2770   :  { %v7804_v28 = vpop.xlane.xlu0 %7803  ;;  %v7807_v46 = vpop.xlane.xlu1 %7806 }
0x2771   :  { %12124 = vpow2.f32 %v7828_v52  ;;  %v7818_v54 = vsub.f32 %v7786_v42, %v7804_v28  ;;  %v7819_v24 = vsub.f32 %v7787_v33, %v7807_v46 }
0x2773   :  { %v7830_v51 = vmul.f32 1.442695, %v7818_v54  ;;  %v7832_v60 = vmul.f32 1.442695, %v7819_v24  ;;  %v11904_v24 = vld [vmem:[#allocation2 + $0x120] sm:$0xff]  }
0x2774   :  { %v7810_v4 = vpop.xlane.xlu0 %7809  ;;  %v7813_v5 = vpop.xlane.xlu1 %7812 }
0x2775   :  { %12126 = vpow2.f32 %v7830_v51  ;;  %v7820_v57 = vsub.f32 %v7788_v40, %v7810_v4  ;;  %v7821_v7 = vsub.f32 %v7789_v59, %v7813_v5  ;;  %v11905_v4 = vld [vmem:[#allocation2 + $0x128] sm:$0xff]  }
0x2776   :  { %12128 = vpow2.f32 %v7832_v60 }
0x2777   :  { %v12123_v2 = vpop.eup %12122  ;;  %v7834_v55 = vmul.f32 1.442695, %v7820_v57  ;;  %v7836_v39 = vmul.f32 1.442695, %v7821_v7 }
0x2778   :  { %v7879_v6 = vpop.permute.xlu0 %7878  ;;  %v7955_v58 = vpop.permute.xlu1 %7954  ;;  %v7844_v8 = vsel %vm213_vm6, %v12123_v2, 0.0 }
0x2779   :  { %12130 = vpow2.f32 %v7834_v55  ;;  %7845 = vadd.xlane.f32.xlu0 %v7844_v8  ;;  %11584 = vmatpush3.msra.mxu1 %v7879_v6 }
0x277a   :  { %12132 = vpow2.f32 %v7836_v39  ;;  %11589 = vmatpush3.msra.mxu0 %v7955_v58  ;;  %11593 = vmatprep.subr.mxu1 %v12292_v15 }
0x277b   :  { %v12125_v10 = vpop.eup %12124  ;;  %11598 = vmatprep.subr.mxu0 %v12292_v15 }
0x277c   :  { %v7847_v11 = vsel %vm213_vm6, %v12125_v10, 0.0  ;;  %v8031_v42 = vpop.permute.xlu1 %8030  ;;  %v8183_v44 = vpop.permute.xlu0 %8182 }
0x277d   :  { %7848 = vadd.xlane.f32.xlu1 %v7847_v11 }
0x277f   :  { %v12127_v13 = vpop.eup %12126 }
0x2780   :  { %v12129_v14 = vpop.eup %12128  ;;  %v7850_v16 = vsel %vm213_vm6, %v12127_v13, 0.0  ;;  %v8107_v62 = vpop.permute.xlu1 %8106 }
0x2781   :  { %7851 = vadd.xlane.f32.xlu0 %v7850_v16  ;;  %v7853_v18 = vsel %vm213_vm6, %v12129_v14, 0.0 }
0x2782   :  { %7854 = vadd.xlane.f32.xlu1 %v7853_v18 }
0x2783   :  { %v13539_v20 = vpop.eup %12130 }
0x2784   :  { %v13541_v22 = vpop.eup %12132  ;;  %v7856_v12 = vsel %vm213_vm6, %v13539_v20, 0.0  ;;  %v8259_v33 = vpop.permute.xlu1 %8258 }
0x2785   :  { %7857 = vadd.xlane.f32.xlu0 %v7856_v12  ;;  %v7859_v19 = vsel %vm213_vm6, %v13541_v22, 0.0 }
0x2786   :  { %7860 = vadd.xlane.f32.xlu1 %v7859_v19 }
0x2797   :  { %8410 = vrot.lane.b32.xlu1 %v13449_v29, %s12287_s7 }
0x279b   :  { %8334 = vrot.lane.b32.xlu0 %v13431_v25, %s12287_s7 }
0x27ad   :  { %v7840_v31 = vpop.xlane.xlu0 %7839 }
0x27ae   :  { %12134 = vrcp.f32 %v7840_v31 }
0x27b5   :  { %v7843_v50 = vpop.xlane.xlu1 %7842 }
0x27b6   :  { %12136 = vrcp.f32 %v7843_v50 }
0x27b8   :  { %v12135_v40 = vpop.eup %12134 }
0x27b9   :  { %v7870_v38 = vmul.f32 %v12135_v40, %v13525_v21 }
0x27bb   :  { %11586 = vmatmul.mubr.msk.f32.vlgmr.msra.gmra.mrb[98].mxu1 %vm213_vm6, %v7870_v38 }
0x27bc   :  { %11594 = vmatpush3.msra.mxu1 %v8031_v42  ;;  %11595 = vmatprep.mubr.msk.f32.mxu1 %vm12293_vm1, %v12292_v15 }
0x27bd   :  { %11603 = vmatprep.subr.mxu1 %v12292_v15 }
0x27c0   :  { %v12137_v25 = vpop.eup %12136 }
0x27c1   :  { %v7871_v29 = vmul.f32 %v12137_v25, %v13529_v26 }
0x27c3   :  { %11591 = vmatmul.mubr.msk.f32.vlgmr.msra.gmra.mrb[110].mxu0 %vm213_vm6, %v7871_v29 }
0x27c4   :  { %11599 = vmatpush3.msra.mxu0 %v8107_v62  ;;  %11600 = vmatprep.mubr.msk.f32.mxu0 %vm12293_vm1, %v12292_v15 }
0x27c5   :  { %11608 = vmatprep.subr.mxu0 %v12292_v15 }
0x2806   :  { %v7846_v35 = vpop.xlane.xlu0 %7845 }
0x2807   :  { %12138 = vrcp.f32 %v7846_v35 }
0x280a   :  { %v7849_v34 = vpop.xlane.xlu1 %7848 }
0x280b   :  { %12140 = vrcp.f32 %v7849_v34  ;;  %v10757_v34 = vld [vmem:[#allocation5 + $0xf8] ss:$0 sm:$0xff] }
0x280e   :  { %v7852_v37 = vpop.xlane.xlu0 %7851 }
0x280f   :  { %12142 = vrcp.f32 %v7852_v37  ;;  %v7855_v59 = vpop.xlane.xlu1 %7854 }
0x2810   :  { %12144 = vrcp.f32 %v7855_v59 }
0x2811   :  { %v12139_v36 = vpop.eup %12138 }
0x2812   :  { %v7872_v45 = vmul.f32 %v12139_v36, %v12123_v2  ;;  %v7858_v47 = vpop.xlane.xlu0 %7857  ;;  %v11906_v2 = vld [vmem:[#allocation2 + $0x130] sm:$0xff]  }
0x2813   :  { %12146 = vrcp.f32 %v7858_v47  ;;  %v7861_v1 = vpop.xlane.xlu1 %7860 }
0x2814   :  { %12148 = vrcp.f32 %v7861_v1  ;;  %11596 = vmatmul.mubr.msk.f32.vlgmr.msra.gmra.mrb[100].mxu1 %vm213_vm6, %v7872_v45 }
0x2815   :  { %v12141_v23 = vpop.eup %12140  ;;  %11604 = vmatpush3.msra.mxu1 %v8183_v44  ;;  %11605 = vmatprep.mubr.msk.f32.mxu1 %vm12293_vm1, %v12292_v15 }
0x2816   :  { %v7873_v56 = vmul.f32 %v12141_v23, %v12125_v10  ;;  %11613 = vmatprep.subr.mxu1 %v12292_v15  ;;  %v8335_v26 = vpop.permute.xlu0 %8334  ;;  %v11907_v10 = vld [vmem:[#allocation2 + $0x138] sm:$0xff]  }
0x2817   :  { %v8411_v27 = vpop.permute.xlu1 %8410 }
0x2818   :  { %11601 = vmatmul.mubr.msk.f32.vlgmr.msra.gmra.mrb[112].mxu0 %vm213_vm6, %v7873_v56 }
0x2819   :  { %v12143_v53 = vpop.eup %12142  ;;  %11609 = vmatpush3.msra.mxu0 %v8259_v33  ;;  %11610 = vmatprep.mubr.msk.f32.mxu0 %vm12293_vm1, %v12292_v15 }
0x281a   :  { %v12145_v32 = vpop.eup %12144  ;;  %v7874_v21 = vmul.f32 %v12143_v53, %v12127_v13  ;;  %11618 = vmatprep.subr.mxu0 %v12292_v15 }
0x281b   :  { %v7875_v41 = vmul.f32 %v12145_v32, %v12129_v14 }
0x281c   :  { %11606 = vmatmul.mubr.msk.f32.vlgmr.msra.gmra.mrb[102].mxu1 %vm213_vm6, %v7874_v21 }
0x281d   :  { %v12147_v61 = vpop.eup %12146  ;;  %11611 = vmatmul.mubr.msk.f32.vlgmr.msra.gmra.mrb[114].mxu0 %vm213_vm6, %v7875_v41  ;;  %11614 = vmatpush3.msra.mxu1 %v8335_v26 }
0x281e   :  { %v12149_v43 = vpop.eup %12148  ;;  %v7876_v63 = vmul.f32 %v12147_v61, %v13539_v20  ;;  %11619 = vmatpush3.msra.mxu0 %v8411_v27  ;;  %11615 = vmatprep.mubr.msk.f32.mxu1 %vm12293_vm1, %v12292_v15  ;;  %v13617_v61 = vld [vmem:[#allocation5 + $0x110] ss:$0 sm:$0xff] }
0x281f   :  { %v7877_v3 = vmul.f32 %v12149_v43, %v13541_v22  ;;  %11620 = vmatprep.mubr.msk.f32.mxu0 %vm12293_vm1, %v12292_v15  ;;  %11623 = vmatprep.subr.bf16.mxu1 %v12292_v15 }
0x2820   :  { %11616 = vmatmul.mubr.msk.f32.vlgmr.msra.gmra.mrb[104].mxu1 %vm213_vm6, %v7876_v63  ;;  %11631 = vmatprep.subr.bf16.mxu0 %v12292_v15 }
0x2821   :  { %11621 = vmatmul.mubr.msk.f32.vlgmr.msra.gmra.mrb[116].mxu0 %vm213_vm6, %v7877_v3  ;;  %11627 = vmatprep.mubr.msk.bf16.mxu1 %vm12293_vm1, %v12292_v15 }
0x2822   :  { %11635 = vmatprep.mubr.msk.bf16.mxu0 %vm12293_vm1, %v12292_v15  ;;  %11624 = vmatpush3.bf16.msra.mxu1 %v11904_v24 }
0x2823   :  { %11625 = vmatprep.subr.bf16.mxu1 %v12292_v15  ;;  %11632 = vmatpush3.bf16.msra.mxu0 %v11906_v2 }
0x2824   :  { %11633 = vmatprep.subr.bf16.mxu0 %v12292_v15 }
0x2826   :  { %11626 = vmatpush3.bf16.msra.mxu1 %v11905_v4 }
0x2827   :  { %11639 = vmatprep.subr.bf16.mxu1 %v12292_v15  ;;  %11634 = vmatpush3.bf16.msra.mxu0 %v11907_v10 }
0x2828   :  { %11647 = vmatprep.subr.mxu0 %v12292_v15 }
0x288e   :  { %v7950_v0 = vpop.f32.mrb[98].mxu1 }
0x288f   :  { %v11587_v52 = vpop.f32.mrb[99].mxu1 }
0x2896   :  { %v8026_v28 = vpop.f32.mrb[110].mxu0 }
0x2897   :  { %v11592_v46 = vpop.f32.mrb[111].mxu0 }
0x28e7   :  { %v8102_v54 = vpop.f32.mrb[100].mxu1 }
0x28e8   :  { %v11597_v51 = vpop.f32.mrb[101].mxu1 }
0x28eb   :  { %v8178_v60 = vpop.f32.mrb[112].mxu0 }
0x28ec   :  { %v11838_v5 = vpack.i.bf16 %v8178_v60, %v8102_v54  ;;  %v11602_v57 = vpop.f32.mrb[113].mxu0 }
0x28ee   :  { %11839 = vrot.lane.b32.xlu0 %v11838_v5, %s12291_s21 }
0x28ef   :  { %v8254_v7 = vpop.f32.mrb[102].mxu1 }
0x28f0   :  { %v8330_v55 = vpop.f32.mrb[114].mxu0  ;;  %v11607_v39 = vpop.f32.mrb[103].mxu1 }
0x28f1   :  { %v11843_v6 = vpack.i.bf16 %v8330_v55, %v8254_v7  ;;  %v11612_v58 = vpop.f32.mrb[115].mxu0 }
0x28f3   :  { %11844 = vrot.lane.b32.xlu1 %v11843_v6, %s12298_s2  ;;  %v8406_v8 = vpop.f32.mrb[104].mxu1 }
0x28f4   :  { %v8482_v11 = vpop.f32.mrb[116].mxu0  ;;  %v11617_v13 = vpop.f32.mrb[105].mxu1 }
0x28f5   :  { %v11848_v14 = vpack.i.bf16 %v8482_v11, %v8406_v8  ;;  %v11622_v16 = vpop.f32.mrb[117].mxu0 }
0x28f7   :  { %11849 = vrot.lane.b32.xlu0 %v11848_v14, %s12299_s11 }
0x2960   :  { %v11840_v18 = vpop.permute.xlu0 %11839 }
0x2961   :  { %v11842_v22 = vunpack.i.h.bf16 %v11840_v18  ;;  %v11841_v12 = vunpack.i.l.bf16 %v11840_v18 }
0x2963   :  { %v8511_v62 = vsel %vm213_vm6, %v8026_v28, %v11842_v22  ;;  %v8510_v31 = vsel %vm213_vm6, %v7950_v0, %v11841_v12 }
0x2965   :  { %v11845_v20 = vpop.permute.xlu1 %11844 }
0x2966   :  { %v11847_v19 = vunpack.i.h.bf16 %v11845_v20  ;;  %v11846_v42 = vunpack.i.l.bf16 %v11845_v20 }
0x2968   :  { %v8513_v40 = vsel %vm1570_vm9, %v8511_v62, %v11847_v19  ;;  %v8512_v38 = vsel %vm1570_vm9, %v8510_v31, %v11846_v42  ;;  %v10761_v62 = vld [vmem:[#allocation5 + $0x100] ss:$0 sm:$0xff] }
0x2969   :  { %v11850_v44 = vpop.permute.xlu0 %11849 }
0x296a   :  { %v11852_v33 = vunpack.i.h.bf16 %v11850_v44  ;;  %v11851_v50 = vunpack.i.l.bf16 %v11850_v44 }
0x296c   :  { %v8515_v25 = vsel %vm1573_vm10, %v8513_v40, %v11852_v33  ;;  %v8514_v29 = vsel %vm1573_vm10, %v8512_v38, %v11851_v50 }
0x296d   :  { %v8516_v35 = vpack.c.bf16 %v8515_v25, %v8514_v29  ;;  %v10762_v25 = vld [vmem:[#allocation5 + $0x108] ss:$0 sm:$0xff] }
0x296f   :  { %11628 = vmatmul.mubr.msk.bf16.vlgmr.msra.gmra.mrb[108].mxu1 %vm71_vm0, %v8516_v35 }
0x2970   :  { %11640 = vmatpush3.bf16.msra.mxu1 %v11906_v2  ;;  %11643 = vmatprep.mubr.msk.bf16.mxu1 %vm12293_vm1, %v12292_v15 }
0x2971   :  { %11641 = vmatprep.subr.bf16.mxu1 %v12292_v15 }
0x2974   :  { %11642 = vmatpush3.bf16.msra.mxu1 %v11907_v10 }
0x2975   :  { %11657 = vmatprep.subr.mxu1 %v12292_v15 }
0x2977   :  { %11644 = vmatmul.mubr.msk.bf16.vlgmr.msra.gmra.mrb[112].mxu1 %vm71_vm0, %v13157_v30 }
0x2978   :  { %11659 = vmatprep.mubr.msk.f32.mxu1 %vm12293_vm1, %v12292_v15 }
0x2a42   :  { %v8570_v37 = vpop.f32.mrb[108].mxu1 }
0x2a43   :  { %v8571_v59 = vadd.f32 %v10757_v34, %v8570_v37  ;;  %v11629_v36 = vpop.f32.mrb[109].mxu1 }
0x2a44   :  { %v8573_v45 = vpop.f32.mrb[110].mxu1 }
0x2a45   :  { %v13608_v47 = vadd.f32 %v8571_v59, %v13387_v48  ;;  %v8574_v1 = vadd.f32 %v10757_v34, %v8573_v45  ;;  %v11630_v23 = vpop.f32.mrb[111].mxu1 }
0x2a47   :  { %v13611_v56 = vadd.f32 %v8574_v1, %v13390_v49  ;;  %v8581_v53 = vsel %vm71_vm0, %v13608_v47, 0.0 }
0x2a48   :  { %8582 = vadd.xlane.f32.xlu1 %v8581_v53 }
0x2a49   :  { %v8584_v30 = vsel %vm71_vm0, %v13611_v56, 0.0 }
0x2a4a   :  { %8585 = vadd.xlane.f32.xlu0 %v8584_v30  ;;  %v8738_v32 = vpop.f32.mrb[112].mxu1 }
0x2a4b   :  { %v11645_v21 = vpop.f32.mrb[113].mxu1  ;;  %v13620_v48 = vadd.f32 %v13617_v61, %v8738_v32 }
0x2a4c   :  { %v8741_v41 = vpop.f32.mrb[114].mxu1 }
0x2a4d   :  { %v11646_v26 = vpop.f32.mrb[115].mxu1  ;;  %v13627_v49 = vadd.f32 %v13617_v61, %v8741_v41 }
0x2a59   :  { %8761 = vrot.lane.b32.xlu1 %v13620_v48, %s12295_s5 }
0x2a5d   :  { %8765 = vrot.lane.b32.xlu1 %v13620_v48, %s12294_s0 }
0x2a61   :  { %8767 = vrot.lane.b32.xlu1 %v13627_v49, %s12294_s0 }
0x2a65   :  { %8769 = vrot.lane.b32.xlu1 %v13620_v48, %s12296_s28 }
0x2a69   :  { %8773 = vrot.lane.b32.xlu1 %v13620_v48, %s12297_s29 }
0x2ad5   :  { %v8583_v27 = vpop.xlane.xlu1 %8582 }
0x2ad6   :  { %v8587_v43 = vmul.f32 0.03125, %v8583_v27 }
0x2ad7   :  { %v8586_v63 = vpop.xlane.xlu0 %8585 }
0x2ad8   :  { %v8589_v3 = vsub.f32 %v13608_v47, %v8587_v43  ;;  %v8588_v0 = vmul.f32 0.03125, %v8586_v63 }
0x2ad9   :  { %v13636_v52 = vpop.permute.xlu1 %8761 }
0x2ada   :  { %v8590_v28 = vsub.f32 %v13611_v56, %v8588_v0  ;;  %8925 = vrot.lane.b32.xlu1 %v13636_v52, %s12297_s29  ;;  %v8591_v46 = vmul.f32 %v8589_v3, %v8589_v3  ;;  %v8605_v33 = vmul.f32 %v10761_v62, %v8589_v3 }
0x2adc   :  { %v8593_v54 = vsel %vm71_vm0, %v8591_v46, 0.0  ;;  %v8592_v24 = vmul.f32 %v8590_v28, %v8590_v28  ;;  %v8606_v50 = vmul.f32 %v10761_v62, %v8590_v28 }
0x2add   :  { %8594 = vadd.xlane.f32.xlu0 %v8593_v54  ;;  %v13642_v51 = vpop.permute.xlu1 %8765 }
0x2ade   :  { %9077 = vrot.lane.b32.xlu1 %v13642_v51, %s12297_s29  ;;  %v8596_v60 = vsel %vm71_vm0, %v8592_v24, 0.0 }
0x2ae1   :  { %8597 = vadd.xlane.f32.xlu0 %v8596_v60  ;;  %v13647_v4 = vpop.permute.xlu1 %8767 }
0x2ae5   :  { %v13649_v5 = vpop.permute.xlu1 %8769 }
0x2ae6   :  { %9229 = vrot.lane.b32.xlu1 %v13649_v5, %s12297_s29 }
0x2ae9   :  { %v8774_v57 = vpop.permute.xlu1 %8773 }
0x2af7   :  { %8763 = vrot.lane.b32.xlu0 %v13627_v49, %s12295_s5 }
0x2afb   :  { %8771 = vrot.lane.b32.xlu0 %v13627_v49, %s12296_s28 }
0x2aff   :  { %8849 = vrot.lane.b32.xlu0 %v13627_v49, %s12297_s29 }
0x2b4c   :  { %v8926_v7 = vpop.permute.xlu1 %8925 }
0x2b4d   :  { %11658 = vmatpush3.xpose.msk.msra.mxu1 %vm213_vm6, %v8926_v7 }
0x2b4e   :  { %11667 = vmatprep.subr.mxu1 %v12292_v15 }
0x2b50   :  { %v9078_v21 = vpop.permute.xlu1 %9077 }
0x2b58   :  { %v9230_v26 = vpop.permute.xlu1 %9229 }
0x2b6a   :  { %v8595_v2 = vpop.xlane.xlu0 %8594 }
0x2b6b   :  { %v8599_v55 = vmul.f32 0.032258064, %v8595_v2 }
0x2b6d   :  { %12150 = vrsqrt.f32 %v8599_v55  ;;  %vm8609_vm2 = vcmp.eq.f32.partialorder %v8599_v55, inf  ;;  %v8612_v11 = vand.u32 2147483648, %v8599_v55  ;;  %vm8611_vm3 = vcmp.eq.f32.partialorder %v8599_v55, 0.0 }
0x2b6e   :  { %v8598_v39 = vpop.xlane.xlu0 %8597 }
0x2b6f   :  { %v8600_v6 = vmul.f32 0.032258064, %v8598_v39 }
0x2b71   :  { %12152 = vrsqrt.f32 %v8600_v6  ;;  %vm8616_vm4 = vcmp.eq.f32.partialorder %v8600_v6, inf  ;;  %v8619_v12 = vand.u32 2147483648, %v8600_v6  ;;  %vm8618_vm5 = vcmp.eq.f32.partialorder %v8600_v6, 0.0 }
0x2b72   :  { %v13661_v58 = vpop.permute.xlu0 %8763 }
0x2b73   :  { %9001 = vrot.lane.b32.xlu0 %v13661_v58, %s12297_s29 }
0x2b76   :  { %v13667_v14 = vpop.permute.xlu0 %8771 }
0x2b77   :  { %v12151_v8 = vpop.eup %12150  ;;  %9153 = vrot.lane.b32.xlu0 %v13647_v4, %s12297_s29 }
0x2b78   :  { %v8608_v10 = vmul.f32 %v12151_v8, %v8599_v55 }
0x2b7a   :  { %v8610_v13 = vsel %vm8609_vm2, %v8599_v55, %v8608_v10  ;;  %v8850_v23 = vpop.permute.xlu0 %8849 }
0x2b7b   :  { %v12153_v16 = vpop.eup %12152  ;;  %v8613_v18 = vsel %vm8611_vm3, %v8612_v11, %v8610_v13  ;;  %9305 = vrot.lane.b32.xlu0 %v13667_v14, %s12297_s29 }
0x2b7c   :  { %v8621_v20 = vadd.f32 1e-06, %v8613_v18  ;;  %v8615_v22 = vmul.f32 %v12153_v16, %v8600_v6 }
0x2b7e   :  { %12154 = vrcp.f32 %v8621_v20  ;;  %v8617_v19 = vsel %vm8616_vm4, %v8600_v6, %v8615_v22 }
0x2b7f   :  { %v8620_v42 = vsel %vm8618_vm5, %v8619_v12, %v8617_v19 }
0x2b80   :  { %v8622_v44 = vadd.f32 1e-06, %v8620_v42 }
0x2b82   :  { %12156 = vrcp.f32 %v8622_v44 }
0x2b88   :  { %v12155_v31 = vpop.eup %12154 }
0x2b89   :  { %v8624_v40 = vmul.f32 %v12155_v31, %v8605_v33 }
0x2b8b   :  { %v8631_v35 = vadd.f32 %v10762_v25, %v8624_v40 }
0x2b8c   :  { %v12157_v38 = vpop.eup %12156 }
0x2b8d   :  { %v8626_v29 = vmul.f32 %v12157_v38, %v8606_v50 }
0x2b8f   :  { %v8632_v34 = vadd.f32 %v10762_v25, %v8626_v29 }
0x2b91   :  { %v8643_v37 = vpack.c.bf16 %v8632_v34, %v8631_v35 }
0x2b93   :  { %11636 = vmatmul.mubr.msk.bf16.vlgmr.msra.gmra.mrb[120].mxu0 %vm71_vm0, %v8643_v37 }
0x2b94   :  { %11648 = vmatpush3.xpose.msk.msra.mxu0 %vm213_vm6, %v8774_v57  ;;  %11649 = vmatprep.mubr.msk.f32.mxu0 %vm12293_vm1, %v12292_v15 }
0x2b95   :  { %11652 = vmatprep.subr.mxu0 %v12292_v15 }
0x2be5   :  { %v9002_v32 = vpop.permute.xlu0 %9001 }
0x2be9   :  { %v9154_v41 = vpop.permute.xlu0 %9153 }
0x2c66   :  { %v8697_v59 = vpop.f32.mrb[120].mxu0 }
0x2c67   :  { %v8698_v36 = vadd.f32 %v13617_v61, %v8697_v59  ;;  %v11637_v45 = vpop.f32.mrb[121].mxu0 }
0x2c68   :  { %v8700_v1 = vpop.f32.mrb[122].mxu0 }
0x2c69   :  { %v8701_v53 = vadd.f32 %v13617_v61, %v8700_v1  ;;  %8747 = vrot.lane.b32.xlu1 %v8698_v36, %s12295_s5  ;;  %v11638_v30 = vpop.f32.mrb[123].mxu0  ;;  %11650 = vmatmul.mubr.msk.f32.vlgmr.msra.gmra.mrb[118].mxu0 %vm213_vm6, %v8698_v36  ;;  %v9306_v61 = vpop.permute.xlu0 %9305 }
0x2c6a   :  { %11653 = vmatpush3.xpose.msk.msra.mxu0 %vm213_vm6, %v8850_v23  ;;  %11654 = vmatprep.mubr.msk.f32.mxu0 %vm12293_vm1, %v12292_v15 }
0x2c6b   :  { %8749 = vrot.lane.b32.xlu0 %v8701_v53, %s12295_s5  ;;  %11662 = vmatprep.subr.mxu0 %v12292_v15 }
0x2c6d   :  { %8751 = vrot.lane.b32.xlu1 %v8698_v36, %s12294_s0  ;;  %11655 = vmatmul.mubr.msk.f32.vlgmr.msra.gmra.mrb[124].mxu0 %vm213_vm6, %v8701_v53 }
0x2c6e   :  { %11663 = vmatpush3.xpose.msk.msra.mxu0 %vm213_vm6, %v9002_v32  ;;  %11664 = vmatprep.mubr.msk.f32.mxu0 %vm12293_vm1, %v12292_v15 }
0x2c6f   :  { %8753 = vrot.lane.b32.xlu0 %v8701_v53, %s12294_s0  ;;  %11672 = vmatprep.subr.mxu0 %v12292_v15 }
0x2c71   :  { %8755 = vrot.lane.b32.xlu1 %v8698_v36, %s12296_s28 }
0x2c73   :  { %8757 = vrot.lane.b32.xlu0 %v8701_v53, %s12296_s28 }
0x2cdb   :  { %v8748_v27 = vpop.permute.xlu1 %8747 }
0x2cdc   :  { %11660 = vmatmul.mubr.msk.f32.vlgmr.msra.gmra.mrb[106].mxu1 %vm213_vm6, %v8748_v27 }
0x2cdd   :  { %11668 = vmatpush3.xpose.msk.msra.mxu1 %vm213_vm6, %v9078_v21  ;;  %v8750_v43 = vpop.permute.xlu0 %8749  ;;  %11669 = vmatprep.mubr.msk.f32.mxu1 %vm12293_vm1, %v12292_v15 }
0x2cde   :  { %11665 = vmatmul.mubr.msk.f32.vlgmr.msra.gmra.mrb[126].mxu0 %vm213_vm6, %v8750_v43  ;;  %11677 = vmatprep.subr.mxu1 %v12292_v15 }
0x2cdf   :  { %11673 = vmatpush3.xpose.msk.msra.mxu0 %vm213_vm6, %v9154_v41  ;;  %v8752_v63 = vpop.permute.xlu1 %8751  ;;  %11674 = vmatprep.mubr.msk.f32.mxu0 %vm12293_vm1, %v12292_v15 }
0x2ce0   :  { %11670 = vmatmul.mubr.msk.f32.vlgmr.msra.gmra.mrb[116].mxu1 %vm213_vm6, %v8752_v63  ;;  %11682 = vmatprep.subr.mxu0 %v12292_v15 }
0x2ce1   :  { %11678 = vmatpush3.xpose.msk.msra.mxu1 %vm213_vm6, %v9230_v26  ;;  %v8754_v3 = vpop.permute.xlu0 %8753  ;;  %11679 = vmatprep.mubr.msk.f32.mxu1 %vm12293_vm1, %v12292_v15 }
0x2ce2   :  { %11675 = vmatmul.mubr.msk.f32.vlgmr.msra.gmra.mrb[128].mxu0 %vm213_vm6, %v8754_v3  ;;  %11687 = vmatprep.subr.mxu1 %v12292_v15 }
0x2ce3   :  { %11683 = vmatpush3.xpose.msk.msra.mxu0 %vm213_vm6, %v9306_v61  ;;  %v8756_v0 = vpop.permute.xlu1 %8755  ;;  %11684 = vmatprep.mubr.msk.f32.mxu0 %vm12293_vm1, %v12292_v15 }
0x2ce4   :  { %11680 = vmatmul.mubr.msk.f32.vlgmr.msra.gmra.mrb[118].mxu1 %vm213_vm6, %v8756_v0  ;;  %11692 = vmatprep.subr.mxu0 %v12292_v15 }
0x2ce5   :  { %v8758_v28 = vpop.permute.xlu0 %8757  ;;  %11689 = vmatprep.mubr.msk.f32.mxu1 %vm12293_vm1, %v12292_v15 }
0x2ce6   :  { %11685 = vmatmul.mubr.msk.f32.vlgmr.msra.gmra.mrb[130].mxu0 %vm213_vm6, %v8758_v28 }
0x2ce7   :  { %11694 = vmatprep.mubr.msk.f32.mxu0 %vm12293_vm1, %v12292_v15 }
0x2d3c   :  { %v8845_v46 = vpop.f32.mrb[118].mxu0 }
0x2d3d   :  { %v9381_v54 = vmul.f32 0.35355338, %v8845_v46  ;;  %v11651_v24 = vpop.f32.mrb[119].mxu0 }
0x2d3f   :  { %v9389_v60 = vadd.f32 %v9381_v54, %v12493_v9 }
0x2d40   :  { %v8921_v57 = vpop.f32.mrb[124].mxu0 }
0x2d41   :  { %v9382_v7 = vmul.f32 0.35355338, %v8921_v57  ;;  %v11656_v2 = vpop.f32.mrb[125].mxu0  ;;  %v9397_v55 = vsel %vm213_vm6, %v9389_v60, -inf }
0x2d42   :  { %9398 = vmax.xlane.f32.xlu1 %v9397_v55 }
0x2d43   :  { %v9390_v39 = vadd.f32 %v9382_v7, %v12498_v17 }
0x2d45   :  { %v9400_v6 = vsel %vm213_vm6, %v9390_v39, -inf }
0x2d46   :  { %9401 = vmax.xlane.f32.xlu0 %v9400_v6 }
0x2daf   :  { %v8997_v8 = vpop.f32.mrb[106].mxu1 }
0x2db0   :  { %v9383_v10 = vmul.f32 0.35355338, %v8997_v8  ;;  %v11661_v11 = vpop.f32.mrb[107].mxu1 }
0x2db1   :  { %v9073_v13 = vpop.f32.mrb[126].mxu0 }
0x2db2   :  { %v9391_v16 = vadd.f32 %v9383_v10, %v12493_v9  ;;  %v9384_v18 = vmul.f32 0.35355338, %v9073_v13  ;;  %v11666_v20 = vpop.f32.mrb[127].mxu0 }
0x2db3   :  { %v9149_v22 = vpop.f32.mrb[116].mxu1 }
0x2db4   :  { %v9392_v12 = vadd.f32 %v9384_v18, %v12498_v17  ;;  %v9385_v19 = vmul.f32 0.35355338, %v9149_v22  ;;  %v11671_v42 = vpop.f32.mrb[117].mxu1  ;;  %v9403_v44 = vsel %vm213_vm6, %v9391_v16, -inf }
0x2db5   :  { %9404 = vmax.xlane.f32.xlu0 %v9403_v44  ;;  %v9225_v62 = vpop.f32.mrb[128].mxu0 }
0x2db6   :  { %v9393_v31 = vadd.f32 %v9385_v19, %v12493_v9  ;;  %v9386_v33 = vmul.f32 0.35355338, %v9225_v62  ;;  %v11676_v50 = vpop.f32.mrb[129].mxu0  ;;  %v9406_v34 = vsel %vm213_vm6, %v9392_v12, -inf }
0x2db7   :  { %v9301_v40 = vpop.f32.mrb[118].mxu1 }
0x2db8   :  { %v9394_v38 = vadd.f32 %v9386_v33, %v12498_v17  ;;  %v9387_v25 = vmul.f32 0.35355338, %v9301_v40  ;;  %v11681_v29 = vpop.f32.mrb[119].mxu1  ;;  %v9409_v35 = vsel %vm213_vm6, %v9393_v31, -inf }
0x2db9   :  { %9410 = vmax.xlane.f32.xlu1 %v9409_v35  ;;  %9407 = vmax.xlane.f32.xlu0 %v9406_v34  ;;  %v9377_v37 = vpop.f32.mrb[130].mxu0 }
0x2dba   :  { %v9395_v59 = vadd.f32 %v9387_v25, %v12493_v9  ;;  %v9388_v36 = vmul.f32 0.35355338, %v9377_v37  ;;  %v11686_v45 = vpop.f32.mrb[131].mxu0  ;;  %v9412_v53 = vsel %vm213_vm6, %v9394_v38, -inf }
0x2dbc   :  { %v9396_v1 = vadd.f32 %v9388_v36, %v12498_v17  ;;  %v9415_v23 = vsel %vm213_vm6, %v9395_v59, -inf }
0x2dbd   :  { %9416 = vmax.xlane.f32.xlu1 %v9415_v23  ;;  %9413 = vmax.xlane.f32.xlu0 %v9412_v53 }
0x2dbe   :  { %v9418_v30 = vsel %vm213_vm6, %v9396_v1, -inf }
0x2dc1   :  { %9419 = vmax.xlane.f32.xlu0 %v9418_v30 }
0x2dce   :  { %9485 = vrot.lane.b32.xlu1 %v13620_v48, %s12287_s7 }
0x2dcf   :  { %v9399_v32 = vpop.xlane.xlu1 %9398 }
0x2dd0   :  { %v9421_v21 = vsub.f32 %v9389_v60, %v9399_v32 }
0x2dd2   :  { %9637 = vrot.lane.b32.xlu1 %v13636_v52, %s12287_s7  ;;  %v9429_v41 = vmul.f32 1.442695, %v9421_v21 }
0x2dd3   :  { %v9402_v9 = vpop.xlane.xlu0 %9401 }
0x2dd4   :  { %v9422_v17 = vsub.f32 %v9390_v39, %v9402_v9 }
0x2dd6   :  { %9713 = vrot.lane.b32.xlu1 %v13661_v58, %s12287_s7  ;;  %v9431_v48 = vmul.f32 1.442695, %v9422_v17 }
0x2dd7   :  { %9561 = vrot.lane.b32.xlu0 %v13627_v49, %s12287_s7 }
0x2dd8   :  { %12158 = vpow2.f32 %v9431_v48 }
0x2dd9   :  { %12160 = vpow2.f32 %v9429_v41 }
0x2dda   :  { %9789 = vrot.lane.b32.xlu1 %v13642_v51, %s12287_s7 }
0x2ddb   :  { %9865 = vrot.lane.b32.xlu0 %v13647_v4, %s12287_s7 }
0x2de2   :  { %v13748_v52 = vpop.eup %12158 }
0x2de3   :  { %v9448_v58 = vsel %vm213_vm6, %v13748_v52, 0.0  ;;  %v13752_v49 = vpop.eup %12160 }
0x2de4   :  { %v9445_v51 = vsel %vm213_vm6, %v13752_v49, 0.0 }
0x2dfa   :  { %9449 = vadd.xlane.f32.xlu0 %v9448_v58 }
0x2dfe   :  { %9446 = vadd.xlane.f32.xlu1 %v9445_v51 }
0x2e42   :  { %v9405_v4 = vpop.xlane.xlu0 %9404 }
0x2e43   :  { %v9423_v26 = vsub.f32 %v9391_v16, %v9405_v4 }
0x2e45   :  { %v9433_v61 = vmul.f32 1.442695, %v9423_v26 }
0x2e46   :  { %v9411_v27 = vpop.xlane.xlu1 %9410  ;;  %v9408_v43 = vpop.xlane.xlu0 %9407 }
0x2e47   :  { %12162 = vpow2.f32 %v9433_v61  ;;  %v9425_v63 = vsub.f32 %v9393_v31, %v9411_v27  ;;  %v9424_v3 = vsub.f32 %v9392_v12, %v9408_v43 }
0x2e49   :  { %v9437_v0 = vmul.f32 1.442695, %v9425_v63  ;;  %v9435_v28 = vmul.f32 1.442695, %v9424_v3  ;;  %v11908_v3 = vld [vmem:[#allocation2 + $0x140] sm:$0xff]  }
0x2e4a   :  { %v9417_v46 = vpop.xlane.xlu1 %9416  ;;  %v9414_v54 = vpop.xlane.xlu0 %9413 }
0x2e4b   :  { %12164 = vpow2.f32 %v9437_v0  ;;  %v9427_v24 = vsub.f32 %v9395_v59, %v9417_v46  ;;  %v9426_v60 = vsub.f32 %v9394_v38, %v9414_v54  ;;  %v11909_v46 = vld [vmem:[#allocation2 + $0x148] sm:$0xff]  }
0x2e4c   :  { %12166 = vpow2.f32 %v9435_v28 }
0x2e4d   :  { %v9441_v57 = vmul.f32 1.442695, %v9427_v24  ;;  %v9439_v7 = vmul.f32 1.442695, %v9426_v60 }
0x2e4e   :  { %v9486_v2 = vpop.permute.xlu1 %9485  ;;  %v9420_v55 = vpop.xlane.xlu0 %9419 }
0x2e4f   :  { %12168 = vpow2.f32 %v9441_v57  ;;  %v9428_v39 = vsub.f32 %v9396_v1, %v9420_v55  ;;  %11688 = vmatpush3.msra.mxu1 %v9486_v2 }
0x2e50   :  { %12170 = vpow2.f32 %v9439_v7  ;;  %11697 = vmatprep.subr.mxu1 %v12292_v15 }
0x2e51   :  { %v12163_v6 = vpop.eup %12162  ;;  %v9443_v8 = vmul.f32 1.442695, %v9428_v39 }
0x2e52   :  { %v9562_v10 = vpop.permute.xlu0 %9561  ;;  %v9451_v11 = vsel %vm213_vm6, %v12163_v6, 0.0  ;;  %v9638_v31 = vpop.permute.xlu1 %9637 }
0x2e53   :  { %12172 = vpow2.f32 %v9443_v8  ;;  %9452 = vadd.xlane.f32.xlu1 %v9451_v11  ;;  %11693 = vmatpush3.msra.mxu0 %v9562_v10 }
0x2e54   :  { %11702 = vmatprep.subr.mxu0 %v12292_v15 }
0x2e55   :  { %v12165_v13 = vpop.eup %12164 }
0x2e56   :  { %v12167_v16 = vpop.eup %12166  ;;  %v9457_v18 = vsel %vm213_vm6, %v12165_v13, 0.0  ;;  %v9714_v33 = vpop.permute.xlu1 %9713 }
0x2e57   :  { %9458 = vadd.xlane.f32.xlu1 %v9457_v18  ;;  %v9454_v20 = vsel %vm213_vm6, %v12167_v16, 0.0  ;;  %v9866_v50 = vpop.permute.xlu0 %9865 }
0x2e58   :  { %9455 = vadd.xlane.f32.xlu0 %v9454_v20 }
0x2e59   :  { %v12169_v22 = vpop.eup %12168 }
0x2e5a   :  { %v12171_v12 = vpop.eup %12170  ;;  %v9463_v19 = vsel %vm213_vm6, %v12169_v22, 0.0  ;;  %v9790_v40 = vpop.permute.xlu1 %9789 }
0x2e5b   :  { %9464 = vadd.xlane.f32.xlu1 %v9463_v19  ;;  %v9460_v42 = vsel %vm213_vm6, %v12171_v12, 0.0 }
0x2e5c   :  { %9461 = vadd.xlane.f32.xlu0 %v9460_v42 }
0x2e5d   :  { %v13763_v44 = vpop.eup %12172 }
0x2e5e   :  { %v9466_v62 = vsel %vm213_vm6, %v13763_v44, 0.0 }
0x2e60   :  { %9467 = vadd.xlane.f32.xlu0 %v9466_v62 }
0x2e6c   :  { %9941 = vrot.lane.b32.xlu1 %v13649_v5, %s12287_s7 }
0x2e76   :  { %10017 = vrot.lane.b32.xlu0 %v13667_v14, %s12287_s7  ;;  %s10539_s7 = sshll.u32 %s12300_s3, 4  ;;  %s10540_s7 = int_to_ptr.vmem [resolvable:$true] %s10539_s7 }
0x2e77   :  { %s12258_s19 = scalar_lea.vmem %s10540_s7, 256  ;;  %p12263_p3 = scmp.lt.s32.totalorder %s10540_s7, %s10540_s7 }
0x2e78   :  { %p12259_p2 = scmp.ne.s32.totalorder %s10540_s7, %s12258_s19  ;;  %p12264_p4 = scmp.lt.s32.totalorder %s12258_s19, %s12258_s19 }
0x2e7a   :  { %p12265_p5 = por %p12264_p4, %p12263_p3 }
0x2e7c   :  { %p12266_p6 = pnand %p12265_p5, %p12259_p2 }
0x2e87   :  { %v9450_v38 = vpop.xlane.xlu0 %9449 }
0x2e88   :  { %12174 = vrcp.f32 %v9450_v38 }
0x2e8b   :  { %v9447_v25 = vpop.xlane.xlu1 %9446 }
0x2e8c   :  { %12176 = vrcp.f32 %v9447_v25 }
0x2e92   :  { %v12175_v29 = vpop.eup %12174 }
0x2e93   :  { %v9478_v35 = vmul.f32 %v12175_v29, %v13748_v52  ;;  %v10792_v29 = vld [vmem:[#allocation5 + $0x118] ss:$0 sm:$0xff] }
0x2e95   :  { %11695 = vmatmul.mubr.msk.f32.vlgmr.msra.gmra.mrb[132].mxu0 %vm213_vm6, %v9478_v35 }
0x2e96   :  { %v12177_v34 = vpop.eup %12176  ;;  %11703 = vmatpush3.msra.mxu0 %v9714_v33  ;;  %11704 = vmatprep.mubr.msk.f32.mxu0 %vm12293_vm1, %v12292_v15 }
0x2e97   :  { %v9477_v5 = vmul.f32 %v12177_v34, %v13752_v49  ;;  %11712 = vmatprep.subr.mxu0 %v12292_v15 }
0x2e99   :  { %11690 = vmatmul.mubr.msk.f32.vlgmr.msra.gmra.mrb[120].mxu1 %vm213_vm6, %v9477_v5 }
0x2e9a   :  { %11698 = vmatpush3.msra.mxu1 %v9638_v31  ;;  %11699 = vmatprep.mubr.msk.f32.mxu1 %vm12293_vm1, %v12292_v15 }
0x2e9b   :  { %11707 = vmatprep.subr.mxu1 %v12292_v15 }
0x2ee0   :  { %v9453_v14 = vpop.xlane.xlu1 %9452 }
0x2ee1   :  { %12178 = vrcp.f32 %v9453_v14 }
0x2ee4   :  { %v9459_v37 = vpop.xlane.xlu1 %9458 }
0x2ee5   :  { %12180 = vrcp.f32 %v9459_v37  ;;  %v9456_v59 = vpop.xlane.xlu0 %9455 }
0x2ee6   :  { %12182 = vrcp.f32 %v9456_v59 }
0x2ee8   :  { %v9465_v36 = vpop.xlane.xlu1 %9464 }
0x2ee9   :  { %12184 = vrcp.f32 %v9465_v36  ;;  %v9462_v45 = vpop.xlane.xlu0 %9461 }
0x2eea   :  { %12186 = vrcp.f32 %v9462_v45 }
0x2eeb   :  { %v12179_v1 = vpop.eup %12178 }
0x2eec   :  { %v9479_v23 = vmul.f32 %v12179_v1, %v12163_v6  ;;  %v9942_v21 = vpop.permute.xlu1 %9941 }
0x2eed   :  { %v9468_v53 = vpop.xlane.xlu0 %9467 }
0x2eee   :  { %12188 = vrcp.f32 %v9468_v53  ;;  %11700 = vmatmul.mubr.msk.f32.vlgmr.msra.gmra.mrb[122].mxu1 %vm213_vm6, %v9479_v23 }
0x2eef   :  { %v12181_v30 = vpop.eup %12180  ;;  %11708 = vmatpush3.msra.mxu1 %v9790_v40  ;;  %11709 = vmatprep.mubr.msk.f32.mxu1 %vm12293_vm1, %v12292_v15 }
0x2ef0   :  { %v12183_v9 = vpop.eup %12182  ;;  %v9481_v17 = vmul.f32 %v12181_v30, %v12165_v13  ;;  %11717 = vmatprep.subr.mxu1 %v12292_v15 }
0x2ef1   :  { %v9480_v32 = vmul.f32 %v12183_v9, %v12167_v16  ;;  %v10018_v49 = vpop.permute.xlu0 %10017 }
0x2ef2   :  { %11710 = vmatmul.mubr.msk.f32.vlgmr.msra.gmra.mrb[124].mxu1 %vm213_vm6, %v9481_v17 }
0x2ef3   :  { %v12185_v48 = vpop.eup %12184  ;;  %11705 = vmatmul.mubr.msk.f32.vlgmr.msra.gmra.mrb[134].mxu0 %vm213_vm6, %v9480_v32  ;;  %11718 = vmatpush3.msra.mxu1 %v9942_v21 }
0x2ef4   :  { %v12187_v41 = vpop.eup %12186  ;;  %v9483_v52 = vmul.f32 %v12185_v48, %v12169_v22  ;;  %11713 = vmatpush3.msra.mxu0 %v9866_v50  ;;  %11714 = vmatprep.mubr.msk.f32.mxu0 %vm12293_vm1, %v12292_v15 }
0x2ef5   :  { %v9482_v58 = vmul.f32 %v12187_v41, %v12171_v12  ;;  %11719 = vmatprep.mubr.msk.f32.mxu1 %vm12293_vm1, %v12292_v15  ;;  %11722 = vmatprep.subr.mxu0 %v12292_v15 }
0x2ef6   :  { %11720 = vmatmul.mubr.msk.f32.vlgmr.msra.gmra.mrb[126].mxu1 %vm213_vm6, %v9483_v52  ;;  %11727 = vmatprep.subr.bf16.mxu1 %v12292_v15  ;;  %v11910_v52 = vld [vmem:[#allocation2 + $0x150] sm:$0xff]  }
0x2ef7   :  { %11715 = vmatmul.mubr.msk.f32.vlgmr.msra.gmra.mrb[136].mxu0 %vm213_vm6, %v9482_v58  ;;  %11731 = vmatprep.mubr.msk.bf16.mxu1 %vm12293_vm1, %v12292_v15  ;;  %v11911_v58 = vld [vmem:[#allocation2 + $0x158] sm:$0xff]  }
0x2ef8   :  { %v12189_v51 = vpop.eup %12188  ;;  %11723 = vmatpush3.msra.mxu0 %v10018_v49  ;;  %11724 = vmatprep.mubr.msk.f32.mxu0 %vm12293_vm1, %v12292_v15  ;;  %v11912_v49 = vld [vmem:[#allocation2 + $0x160] sm:$0xff]  }
0x2ef9   :  { %v9484_v4 = vmul.f32 %v12189_v51, %v13763_v44  ;;  %11735 = vmatprep.subr.bf16.mxu0 %v12292_v15  ;;  %11728 = vmatpush3.bf16.msra.mxu1 %v11908_v3  ;;  %v11913_v51 = vld [vmem:[#allocation2 + $0x168] sm:$0xff]  }
0x2efa   :  { %11729 = vmatprep.subr.bf16.mxu1 %v12292_v15 }
0x2efb   :  { %11725 = vmatmul.mubr.msk.f32.vlgmr.msra.gmra.mrb[138].mxu0 %vm213_vm6, %v9484_v4 }
0x2efc   :  { %11739 = vmatprep.mubr.msk.bf16.mxu0 %vm12293_vm1, %v12292_v15  ;;  %11736 = vmatpush3.bf16.msra.mxu0 %v11910_v52 }
0x2efd   :  { %11730 = vmatpush3.bf16.msra.mxu1 %v11909_v46  ;;  %11737 = vmatprep.subr.bf16.mxu0 %v12292_v15 }
0x2efe   :  { %11743 = vmatprep.subr.bf16.mxu1 %v12292_v15 }
0x2f00   :  { %11738 = vmatpush3.bf16.msra.mxu0 %v11911_v58 }
0x2f01   :  { %11755 = vmatprep.subr.bf16.mxu0 %v12292_v15 }
0x2f68   :  { %v9633_v26 = vpop.f32.mrb[132].mxu0 }
0x2f69   :  { %v11696_v61 = vpop.f32.mrb[133].mxu0 }
0x2f6c   :  { %v9557_v27 = vpop.f32.mrb[120].mxu1 }
0x2f6d   :  { %v11691_v43 = vpop.f32.mrb[121].mxu1 }
0x2fc1   :  { %v9709_v63 = vpop.f32.mrb[122].mxu1 }
0x2fc2   :  { %v11701_v0 = vpop.f32.mrb[123].mxu1 }
0x2fc5   :  { %v9861_v28 = vpop.f32.mrb[124].mxu1 }
0x2fc6   :  { %v9785_v54 = vpop.f32.mrb[134].mxu0  ;;  %v11711_v24 = vpop.f32.mrb[125].mxu1 }
0x2fc7   :  { %v11853_v60 = vpack.i.bf16 %v9785_v54, %v9709_v63  ;;  %v11706_v57 = vpop.f32.mrb[135].mxu0 }
0x2fc9   :  { %11854 = vrot.lane.b32.xlu1 %v11853_v60, %s12291_s21  ;;  %v10013_v7 = vpop.f32.mrb[126].mxu1 }
0x2fca   :  { %v9937_v2 = vpop.f32.mrb[136].mxu0  ;;  %v11721_v55 = vpop.f32.mrb[127].mxu1 }
0x2fcb   :  { %v11858_v39 = vpack.i.bf16 %v9937_v2, %v9861_v28  ;;  %v11716_v6 = vpop.f32.mrb[137].mxu0  ;;  %v10796_v55 = vld [vmem:[#allocation5 + $0x120] ss:$0 sm:$0xff] }
0x2fcd   :  { %11859 = vrot.lane.b32.xlu0 %v11858_v39, %s12298_s2 }
0x2fce   :  { %v10089_v8 = vpop.f32.mrb[138].mxu0 }
0x2fcf   :  { %v11863_v10 = vpack.i.bf16 %v10089_v8, %v10013_v7  ;;  %v11726_v11 = vpop.f32.mrb[139].mxu0 }
0x2fd1   :  { %11864 = vrot.lane.b32.xlu1 %v11863_v10, %s12299_s11 }
0x303b   :  { %v11855_v13 = vpop.permute.xlu1 %11854 }
0x303c   :  { %v11857_v18 = vunpack.i.h.bf16 %v11855_v13  ;;  %v11856_v20 = vunpack.i.l.bf16 %v11855_v13  ;;  %v10797_v13 = vld [vmem:[#allocation5 + $0x128] ss:$0 sm:$0xff] }
0x303e   :  { %v10118_v42 = vsel %vm213_vm6, %v9633_v26, %v11857_v18  ;;  %v10117_v44 = vsel %vm213_vm6, %v9557_v27, %v11856_v20 }
0x303f   :  { %v11860_v16 = vpop.permute.xlu0 %11859 }
0x3040   :  { %v11862_v22 = vunpack.i.h.bf16 %v11860_v16  ;;  %v11861_v12 = vunpack.i.l.bf16 %v11860_v16 }
0x3042   :  { %v10120_v33 = vsel %vm1570_vm9, %v10118_v42, %v11862_v22  ;;  %v10119_v50 = vsel %vm1570_vm9, %v10117_v44, %v11861_v12  ;;  %v11914_v12 = vld [vmem:[#allocation2 + $0x170] sm:$0xff]   ;;  %v10798_v42 = vld [vmem:[#allocation5 + $0x130] ss:$0 sm:$0xff] }
0x3043   :  { %v11865_v19 = vpop.permute.xlu1 %11864 }
0x3044   :  { %v11867_v62 = vunpack.i.h.bf16 %v11865_v19  ;;  %v11866_v31 = vunpack.i.l.bf16 %v11865_v19  ;;  %v11915_v19 = vld [vmem:[#allocation2 + $0x178] sm:$0xff]  }
0x3046   :  { %v10122_v40 = vsel %vm1573_vm10, %v10120_v33, %v11867_v62  ;;  %v10121_v38 = vsel %vm1573_vm10, %v10119_v50, %v11866_v31 }
0x3047   :  { %v10123_v25 = vpack.c.bf16 %v10122_v40, %v10121_v38 }
0x3049   :  { %11732 = vmatmul.mubr.msk.bf16.vlgmr.msra.gmra.mrb[128].mxu1 %vm71_vm0, %v10123_v25 }
0x304a   :  { %11751 = vmatprep.mubr.msk.bf16.mxu1 %vm12293_vm1, %v12292_v15  ;;  %11744 = vmatpush3.bf16.msra.mxu1 %v11912_v49  ;;  %v11917_v49 = vld [vmem:[#allocation2 + $0x188] sm:$0xff]  }
0x304b   :  { %11745 = vmatprep.subr.bf16.mxu1 %v12292_v15 }
0x304e   :  { %11746 = vmatpush3.bf16.msra.mxu1 %v11913_v51 }
0x304f   :  { %11747 = vmatprep.subr.bf16.mxu1 %v12292_v15 }
0x3052   :  { %11748 = vmatpush3.bf16.msra.mxu1 %v11914_v12 }
0x3053   :  { %11749 = vmatprep.subr.bf16.mxu1 %v12292_v15 }
0x3056   :  { %11750 = vmatpush3.bf16.msra.mxu1 %v11915_v19 }
0x311c   :  { %v10177_v35 = vpop.f32.mrb[128].mxu1 }
0x311d   :  { %v10178_v34 = vadd.f32 %v10792_v29, %v10177_v35  ;;  %v11733_v5 = vpop.f32.mrb[129].mxu1  ;;  %v10802_v35 = vld [vmem:[#allocation5 + $0x138] ss:$0 sm:$0xff] }
0x311e   :  { %v10180_v14 = vpop.f32.mrb[130].mxu1 }
0x311f   :  { %v13819_v37 = vadd.f32 %v10178_v34, %v13608_v47  ;;  %v10181_v59 = vadd.f32 %v10792_v29, %v10180_v14  ;;  %v11734_v36 = vpop.f32.mrb[131].mxu1 }
0x3121   :  { %v13822_v45 = vadd.f32 %v10181_v59, %v13611_v56  ;;  %v10188_v1 = vsel %vm71_vm0, %v13819_v37, 0.0 }
0x3122   :  { %10189 = vadd.xlane.f32.xlu0 %v10188_v1 }
0x3123   :  { %v10191_v23 = vsel %vm71_vm0, %v13822_v45, 0.0 }
0x3124   :  { %10192 = vadd.xlane.f32.xlu1 %v10191_v23 }
0x31af   :  { %v10190_v53 = vpop.xlane.xlu0 %10189 }
0x31b0   :  { %v10194_v30 = vmul.f32 0.03125, %v10190_v53 }
0x31b1   :  { %v10193_v9 = vpop.xlane.xlu1 %10192 }
0x31b2   :  { %v10196_v17 = vsub.f32 %v13819_v37, %v10194_v30  ;;  %v10195_v47 = vmul.f32 0.03125, %v10193_v9 }
0x31b4   :  { %v10197_v32 = vsub.f32 %v13822_v45, %v10195_v47  ;;  %v10198_v21 = vmul.f32 %v10196_v17, %v10196_v17  ;;  %v10212_v6 = vmul.f32 %v10796_v55, %v10196_v17 }
0x31b6   :  { %v10200_v56 = vsel %vm71_vm0, %v10198_v21, 0.0  ;;  %v10199_v48 = vmul.f32 %v10197_v32, %v10197_v32  ;;  %v10213_v8 = vmul.f32 %v10796_v55, %v10197_v32 }
0x31b7   :  { %10201 = vadd.xlane.f32.xlu0 %v10200_v56 }
0x31b8   :  { %v10203_v41 = vsel %vm71_vm0, %v10199_v48, 0.0 }
0x31bb   :  { %10204 = vadd.xlane.f32.xlu0 %v10203_v41 }
0x3244   :  { %v10202_v4 = vpop.xlane.xlu0 %10201 }
0x3245   :  { %v10206_v26 = vmul.f32 0.032258064, %v10202_v4 }
0x3247   :  { %12190 = vrsqrt.f32 %v10206_v26  ;;  %vm10216_vm6 = vcmp.eq.f32.partialorder %v10206_v26, inf  ;;  %v10219_v3 = vand.u32 2147483648, %v10206_v26  ;;  %vm10218_vm9 = vcmp.eq.f32.partialorder %v10206_v26, 0.0 }
0x3248   :  { %v10205_v61 = vpop.xlane.xlu0 %10204 }
0x3249   :  { %v10207_v27 = vmul.f32 0.032258064, %v10205_v61 }
0x324b   :  { %12192 = vrsqrt.f32 %v10207_v27  ;;  %vm10223_vm10 = vcmp.eq.f32.partialorder %v10207_v27, inf  ;;  %v10226_v60 = vand.u32 2147483648, %v10207_v27  ;;  %vm10225_vm7 = vcmp.eq.f32.partialorder %v10207_v27, 0.0 }
0x3251   :  { %v12191_v43 = vpop.eup %12190 }
0x3252   :  { %v10215_v63 = vmul.f32 %v12191_v43, %v10206_v26 }
0x3254   :  { %v10217_v0 = vsel %vm10216_vm6, %v10206_v26, %v10215_v63 }
0x3255   :  { %v12193_v28 = vpop.eup %12192  ;;  %v10220_v46 = vsel %vm10218_vm9, %v10219_v3, %v10217_v0 }
0x3256   :  { %v10228_v54 = vadd.f32 1e-06, %v10220_v46  ;;  %v10222_v24 = vmul.f32 %v12193_v28, %v10207_v27 }
0x3258   :  { %12194 = vrcp.f32 %v10228_v54  ;;  %v10224_v57 = vsel %vm10223_vm10, %v10207_v27, %v10222_v24 }
0x3259   :  { %v10227_v7 = vsel %vm10225_vm7, %v10226_v60, %v10224_v57 }
0x325a   :  { %v10229_v2 = vadd.f32 1e-06, %v10227_v7  ;;  %v10808_v7 = vld [vmem:[#allocation5 + $0x150] ss:$0 sm:$0xff] }
0x325c   :  { %12196 = vrcp.f32 %v10229_v2 }
0x3262   :  { %v12195_v39 = vpop.eup %12194 }
0x3263   :  { %v10231_v10 = vmul.f32 %v12195_v39, %v10212_v6 }
0x3265   :  { %v10238_v18 = vadd.f32 %v10797_v13, %v10231_v10  ;;  %v10809_v10 = vld [vmem:[#allocation5 + $0x158] ss:$0 sm:$0xff] }
0x3266   :  { %v12197_v11 = vpop.eup %12196 }
0x3267   :  { %v10233_v16 = vmul.f32 %v12197_v11, %v10213_v8 }
0x3269   :  { %v10239_v20 = vadd.f32 %v10797_v13, %v10233_v16 }
0x326b   :  { %v10254_v22 = vpack.c.bf16 %v10239_v20, %v10238_v18  ;;  %v10810_v20 = vld [vmem:[#allocation5 + $0x160] ss:$0 sm:$0xff] }
0x326d   :  { %11740 = vmatmul.mubr.msk.bf16.vlgmr.msra.gmra.mrb[140].mxu0 %vm71_vm0, %v10254_v22 }
0x326e   :  { %11759 = vmatprep.mubr.msk.bf16.mxu0 %vm12293_vm1, %v12292_v15 }
0x3340   :  { %v10308_v44 = vpop.f32.mrb[140].mxu0 }
0x3341   :  { %v10309_v62 = vadd.f32 %v10798_v42, %v10308_v44  ;;  %v11741_v31 = vpop.f32.mrb[141].mxu0 }
0x3342   :  { %v10311_v33 = vpop.f32.mrb[142].mxu0 }
0x3343   :  { %v10312_v50 = vadd.f32 %v10798_v42, %v10311_v33  ;;  %v11742_v40 = vpop.f32.mrb[143].mxu0  ;;  %v10315_v38 = vmax.f32 %v10309_v62, 0.0 }
0x3345   :  { %v10316_v25 = vmax.f32 %v10312_v50, 0.0 }
0x3347   :  { %v10317_v29 = vpack.c.bf16 %v10316_v25, %v10315_v38 }
0x3349   :  { %11752 = vmatmul.mubr.msk.bf16.vlgmr.msra.gmra.mrb[132].mxu1 %vm1799_vm15, %v10317_v29 }
0x341c   :  { %v10383_v34 = vpop.f32.mrb[132].mxu1 }
0x341d   :  { %v10384_v5 = vadd.f32 %v10802_v35, %v10383_v34  ;;  %v11753_v14 = vpop.f32.mrb[133].mxu1 }
0x341e   :  { %v10386_v59 = vpop.f32.mrb[134].mxu1 }
0x341f   :  { %v10390_v36 = vadd.f32 %v10384_v5, %v13819_v37  ;;  %v10387_v1 = vadd.f32 %v10802_v35, %v10386_v59  ;;  %v11754_v23 = vpop.f32.mrb[135].mxu1 }
0x3421   :  { %v10391_v53 = vadd.f32 %v10387_v1, %v13822_v45  ;;  %v10394_v30 = vsel %vm71_vm0, %v10390_v36, 0.0  ;;  %v11916_v45 = vld [vmem:[#allocation2 + $0x180] sm:$0xff]  }
0x3422   :  { %10395 = vadd.xlane.f32.xlu0 %v10394_v30  ;;  %11756 = vmatpush3.bf16.msra.mxu0 %v11916_v45 }
0x3423   :  { %v10397_v9 = vsel %vm71_vm0, %v10391_v53, 0.0  ;;  %11757 = vmatprep.subr.bf16.mxu0 %v12292_v15 }
0x3424   :  { %10398 = vadd.xlane.f32.xlu1 %v10397_v9 }
0x3426   :  { %11758 = vmatpush3.bf16.msra.mxu0 %v11917_v49 }
0x34af   :  { %v10396_v17 = vpop.xlane.xlu0 %10395 }
0x34b0   :  { %v10400_v47 = vmul.f32 0.03125, %v10396_v17 }
0x34b1   :  { %v10399_v32 = vpop.xlane.xlu1 %10398 }
0x34b2   :  { %v10402_v21 = vsub.f32 %v10390_v36, %v10400_v47  ;;  %v10401_v56 = vmul.f32 0.03125, %v10399_v32 }
0x34b4   :  { %v10403_v48 = vsub.f32 %v10391_v53, %v10401_v56  ;;  %v10404_v41 = vmul.f32 %v10402_v21, %v10402_v21  ;;  %v10418_v55 = vmul.f32 %v10808_v7, %v10402_v21 }
0x34b6   :  { %v10406_v52 = vsel %vm71_vm0, %v10404_v41, 0.0  ;;  %v10405_v37 = vmul.f32 %v10403_v48, %v10403_v48  ;;  %v10419_v39 = vmul.f32 %v10808_v7, %v10403_v48 }
0x34b7   :  { %10407 = vadd.xlane.f32.xlu0 %v10406_v52 }
0x34b8   :  { %v10409_v58 = vsel %vm71_vm0, %v10405_v37, 0.0 }
0x34b9   :  { %10410 = vadd.xlane.f32.xlu1 %v10409_v58 }
0x3544   :  { %v10408_v51 = vpop.xlane.xlu0 %10407 }
0x3545   :  { %v10412_v4 = vmul.f32 0.032258064, %v10408_v51 }
0x3546   :  { %v10411_v26 = vpop.xlane.xlu1 %10410 }
0x3547   :  { %12198 = vrsqrt.f32 %v10412_v4  ;;  %v10413_v61 = vmul.f32 0.032258064, %v10411_v26  ;;  %vm10422_vm1 = vcmp.eq.f32.partialorder %v10412_v4, inf  ;;  %v10425_v63 = vand.u32 2147483648, %v10412_v4 }
0x3548   :  { %vm10424_vm15 = vcmp.eq.f32.partialorder %v10412_v4, 0.0 }
0x3549   :  { %12200 = vrsqrt.f32 %v10413_v61  ;;  %vm10429_vm8 = vcmp.eq.f32.partialorder %v10413_v61, inf  ;;  %v10432_v24 = vand.u32 2147483648, %v10413_v61  ;;  %vm10431_vm11 = vcmp.eq.f32.partialorder %v10413_v61, 0.0 }
0x3551   :  { %v12199_v27 = vpop.eup %12198 }
0x3552   :  { %v10421_v43 = vmul.f32 %v12199_v27, %v10412_v4 }
0x3553   :  { %v12201_v3 = vpop.eup %12200 }
0x3554   :  { %v10423_v0 = vsel %vm10422_vm1, %v10412_v4, %v10421_v43  ;;  %v10428_v46 = vmul.f32 %v12201_v3, %v10413_v61 }
0x3555   :  { %v10426_v28 = vsel %vm10424_vm15, %v10425_v63, %v10423_v0 }
0x3556   :  { %v10434_v54 = vadd.f32 1e-06, %v10426_v28  ;;  %v10430_v15 = vsel %vm10429_vm8, %v10413_v61, %v10428_v46 }
0x3557   :  { %v10433_v60 = vsel %vm10431_vm11, %v10432_v24, %v10430_v15 }
0x3558   :  { %12202 = vrcp.f32 %v10434_v54  ;;  %v10435_v57 = vadd.f32 1e-06, %v10433_v60 }
0x355a   :  { %12204 = vrcp.f32 %v10435_v57 }
0x3562   :  { %v12203_v2 = vpop.eup %12202 }
0x3563   :  { %v10437_v6 = vmul.f32 %v12203_v2, %v10418_v55 }
0x3564   :  { %v12205_v8 = vpop.eup %12204 }
0x3565   :  { %v10439_v11 = vmul.f32 %v12205_v8, %v10419_v39  ;;  %v10444_v13 = vadd.f32 %v10809_v10, %v10437_v6 }
0x3567   :  { %v10445_v16 = vadd.f32 %v10809_v10, %v10439_v11 }
0x3569   :  { %v10446_v18 = vpack.c.bf16 %v10445_v16, %v10444_v13 }
0x356b   :  { %11760 = vmatmul.mubr.msk.bf16.vlgmr.msra.gmra.mrb[144].mxu0 %vm71_vm0, %v10446_v18 }
0x363e   :  { %v10505_v22 = vpop.f32.mrb[144].mxu0 }
0x363f   :  { %v10506_v12 = vadd.f32 %v10810_v20, %v10505_v22  ;;  %v11761_v19 = vpop.f32.mrb[145].mxu0 }
0x3640   :  { %v10508_v42 = vpop.f32.mrb[146].mxu0 }
0x3641   :  { %v10509_v44 = vadd.f32 %v10810_v20, %v10508_v42  ;;  %10512 = vmax.xlane.f32.xlu0 %v10506_v12  ;;  %v11762_v62 = vpop.f32.mrb[147].mxu0 }
0x3643   :  { %10514 = vmax.xlane.f32.xlu1 %v10509_v44 }
0x36ce   :  { %v10513_v31 = vpop.xlane.xlu0 %10512 }
0x36cf   :  { %v10516_v33 = vsub.f32 %v10506_v12, %v10513_v31 }
0x36d0   :  { %v10515_v50 = vpop.xlane.xlu1 %10514 }
0x36d1   :  { %v10518_v40 = vmul.f32 1.442695, %v10516_v33  ;;  %v10517_v38 = vsub.f32 %v10509_v44, %v10515_v50 }
0x36d3   :  { %12206 = vpow2.f32 %v10518_v40  ;;  %v10520_v25 = vmul.f32 1.442695, %v10517_v38 }
0x36d5   :  { %12208 = vpow2.f32 %v10520_v25 }
0x36dd   :  { %v12207_v29 = vpop.eup %12206 }
0x36de   :  { %10522 = vadd.xlane.f32.xlu0 %v12207_v29 }
0x36df   :  { %v12209_v35 = vpop.eup %12208 }
0x36e0   :  { %10524 = vadd.xlane.f32.xlu1 %v12209_v35 }
0x376b   :  { %v10523_v34 = vpop.xlane.xlu0 %10522 }
0x376c   :  { %12210 = vlog2.f32 %v10523_v34 }
0x376d   :  { %v10525_v5 = vpop.xlane.xlu1 %10524 }
0x376e   :  { %12212 = vlog2.f32 %v10525_v5 }
0x3776   :  { %v12211_v14 = vpop.eup %12210 }
0x3777   :  { %v10527_v59 = vmul.f32 0.6931472, %v12211_v14 }
0x3778   :  { %v12213_v36 = vpop.eup %12212 }
0x3779   :  { %v10530_v1 = vsub.f32 %v10516_v33, %v10527_v59  ;;  %v10529_v23 = vmul.f32 0.6931472, %v12213_v36 }
0x377b   :  { %10532 = vst [vmem:[#allocation7] sm:$0xff] %v10530_v1  ;;  %v10531_v53 = vsub.f32 %v10517_v38, %v10529_v23 }
0x377d   :  { %10533 = vst [vmem:[#allocation7 + $0x8] sm:$0xff] %v10531_v53 }
0x377e   :  { %12269 = shalt.err (!%p12266_p6)
}
0x377f   :  { %s12270_s23 = scalar_lea.hbm %s13870_s6, 256 }
0x3780   :  { %p12271_p7 = scmp.ne.s32.totalorder %s13870_s6, %s12270_s23  ;;  %p12274_p8 = scmp.lt.u32.totalorder %s12270_s23, %s13870_s6 }
0x3782   :  { %p12276_p9 = pnand %p12274_p8, %p12271_p7 }
0x3784   :  { %12279 = shalt.err (!%p12276_p9)
}
0x3785   :  { %10545 = dma.vmem_to_hbm [thread:$0]  %s10540_s7, 256, %s13870_s6, [#allocation4], %s12290_s4, %s12290_s4, %s12291_s21  }
0x3786   :  { %12284 = dma.done.wait [#allocation4], 256  }
0x3787   :  { %12285 = vsyncadd [#allocation4], 4294967040 }
0x3788   :  { %10549 = vsyncpa [#allocation3], 1 }
0x3789   :  { %10550 = vsyncpa [#allocation6], 1 }
0x378a   :  { %10551 = vsyncpa [#allocation4], 1 }

</bundles_post_ra>
